<compile_context>
chip_gen: v6e
topology: v6e:2x2x1
jax: 0.10.0
libtpu: 0.0.40
codegen_flags: <defaults>
</compile_context>

<pallas_src>
import jax
import jax.numpy as jnp
from jax.experimental import pallas as pl
from jax.experimental.pallas import tpu as pltpu

LATENT = 100
LATENT_PAD = 128           # K of first matmul, lane-aligned
OUT = 28 * 28              # 784
OUT_PAD = 896              # 7 * 128, lane-dense output
HIDDEN = (256, 512, 1024)


def generator_kernel(x_ref,
                     w1_ref, b1_ref,
                     w2_ref, b2_ref,
                     w3_ref, b3_ref,
                     w4_ref, b4_ref,
                     o_ref):
    # Layer 1: (TM,128) @ (128,256) + (1,256), ReLU   (bf16 inputs, f32 acc)
    h = jnp.dot(x_ref[...], w1_ref[...], preferred_element_type=jnp.float32)
    h = jnp.maximum(h + b1_ref[...], 0.0)
    # Layer 2: (TM,256) @ (256,512) + (1,512), ReLU
    h = jnp.dot(h.astype(jnp.bfloat16), w2_ref[...],
                preferred_element_type=jnp.float32)
    h = jnp.maximum(h + b2_ref[...], 0.0)
    # Layer 3: (TM,512) @ (512,1024) + (1,1024), ReLU
    h = jnp.dot(h.astype(jnp.bfloat16), w3_ref[...],
                preferred_element_type=jnp.float32)
    h = jnp.maximum(h + b3_ref[...], 0.0)
    # Layer 4: (TM,1024) @ (1024,896) + (1,896), Tanh (EUP)
    h = jnp.dot(h.astype(jnp.bfloat16), w4_ref[...],
                preferred_element_type=jnp.float32)
    o_ref[...] = jnp.tanh(h + b4_ref[...])


def _round_up(n, m):
    return ((n + m - 1) // m) * m


@jax.jit
def generator_forward(x, prepared_params):
    """x: (B, 100) f32, prepared_params from prepare_params() -> (B,1,28,28) f32."""
    B = x.shape[0]
    # Batch tile: target 256 rows (MXU-shaped) without over-padding tiny
    # batches; always a multiple of 8 sublanes.
    TM = min(256, _round_up(B, 8))
    Bp = _round_up(B, TM)

    # Pad batch rows and latent dim with zeros (zeros never affect real rows),
    # cast once to bf16 for the MXU.
    xp = jnp.zeros((Bp, LATENT_PAD), jnp.float32).at[:B, :LATENT].set(x)
    xp = xp.astype(jnp.bfloat16)

    (w1, b1), (w2, b2), (w3, b3), (w4, b4) = prepared_params
    h1, h2, h3 = HIDDEN

    flops = 2 * Bp * (LATENT_PAD * h1 + h1 * h2 + h2 * h3 + h3 * OUT_PAD)
    bytes_accessed = (
        xp.size * 2
        + sum(w.size * 2 + b.size * 4 for (w, b) in prepared_params)
        + Bp * OUT_PAD * 4
    )
    cost = pl.CostEstimate(flops=flops,
                           transcendentals=Bp * OUT_PAD,
                           bytes_accessed=bytes_accessed)

    flat = pl.pallas_call(
        generator_kernel,
        out_shape=jax.ShapeDtypeStruct((Bp, OUT_PAD), jnp.float32),
        grid_spec=pltpu.PrefetchScalarGridSpec(
            num_scalar_prefetch=0,
            grid=(Bp // TM,),
            in_specs=[
                pl.BlockSpec((TM, LATENT_PAD), lambda i: (i, 0)),
                # Weights/biases: full-extent blocks, constant index_map
                # -> DMA'd once, resident in VMEM across all batch tiles.
                pl.BlockSpec((LATENT_PAD, h1), lambda i: (0, 0)),
                pl.BlockSpec((1, h1), lambda i: (0, 0)),
                pl.BlockSpec((h1, h2), lambda i: (0, 0)),
                pl.BlockSpec((1, h2), lambda i: (0, 0)),
                pl.BlockSpec((h2, h3), lambda i: (0, 0)),
                pl.BlockSpec((1, h3), lambda i: (0, 0)),
                pl.BlockSpec((h3, OUT_PAD), lambda i: (0, 0)),
                pl.BlockSpec((1, OUT_PAD), lambda i: (0, 0)),
            ],
            out_specs=pl.BlockSpec((TM, OUT_PAD), lambda i: (i, 0)),
        ),
        compiler_params=pltpu.CompilerParams(
            dimension_semantics=("parallel",)),
        cost_estimate=cost,
    )(xp, w1, b1, w2, b2, w3, b3, w4, b4)

    # Slice away batch/lane padding, then the PyTorch .view(-1, 1, 28, 28).
    return flat[:B, :OUT].reshape(B, 1, 28, 28)


def init_params(key):
    """Deterministic f32 init mimicking nn.Linear default U(-1/sqrt(fan_in), +).

    Weights stored pre-transposed as (in_features, out_features) so the kernel
    does x @ W; biases stored as (1, out_features) for a clean 2-D broadcast.
    """
    dims = [(LATENT, HIDDEN[0]), (HIDDEN[0], HIDDEN[1]),
            (HIDDEN[1], HIDDEN[2]), (HIDDEN[2], OUT)]
    params = []
    for fan_in, fan_out in dims:
        key, kw, kb = jax.random.split(key, 3)
        bound = 1.0 / jnp.sqrt(float(fan_in))
        w = jax.random.uniform(kw, (fan_in, fan_out), jnp.float32,
                               minval=-bound, maxval=bound)
        b = jax.random.uniform(kb, (1, fan_out), jnp.float32,
                               minval=-bound, maxval=bound)
        params.append((w, b))
    return params


def prepare_params(params_f32):
    """Pad to lane-aligned shapes and cast weights to bf16 (biases stay f32)."""
    (w1, b1), (w2, b2), (w3, b3), (w4, b4) = params_f32
    w1p = jnp.zeros((LATENT_PAD, HIDDEN[0]), jnp.float32).at[:LATENT, :].set(w1)
    w4p = jnp.zeros((HIDDEN[2], OUT_PAD), jnp.float32).at[:, :OUT].set(w4)
    b4p = jnp.zeros((1, OUT_PAD), jnp.float32).at[:, :OUT].set(b4)
    weights = [w1p, w2, w3, w4p]
    biases = [b1, b2, b3, b4p]
    return tuple((w.astype(jnp.bfloat16), b) for w, b in zip(weights, biases))


def generator_reference_matched(x, prepared_params):
    """Pure-JAX reference matching the kernel numerics (bf16 weights/acts)."""
    B = x.shape[0]
    h = jnp.zeros((B, LATENT_PAD), jnp.float32).at[:, :LATENT].set(x)
    for i, (w, b) in enumerate(prepared_params):
        h = jnp.dot(h.astype(jnp.bfloat16), w,
                    preferred_element_type=jnp.float32) + b
        h = jnp.maximum(h, 0.0) if i < 3 else jnp.tanh(h)
    return h[:, :OUT].reshape(B, 1, 28, 28)


def generator_reference_f32(x, params_f32):
    """Pure-f32 reference with the original PyTorch semantics (sanity check)."""
    h = x
    for i, (w, b) in enumerate(params_f32):
        h = h @ w + b
        h = jnp.maximum(h, 0.0) if i < 3 else jnp.tanh(h)
    return h.reshape(-1, 1, 28, 28)


if __name__ == "__main__":
    key = jax.random.PRNGKey(0)
    key, kx1, kx2 = jax.random.split(key, 3)

    params_f32 = init_params(key)
    prepared = prepare_params(params_f32)

    # --- Small batch (single grid step) ---
    B1 = 8
    x1 = jax.random.normal(kx1, (B1, LATENT), jnp.float32)
    out1 = jax.block_until_ready(generator_forward(x1, prepared))
    assert out1.shape == (B1, 1, 28, 28), out1.shape
    assert out1.dtype == jnp.float32

    ref1 = generator_reference_matched(x1, prepared)
    err1 = float(jnp.max(jnp.abs(out1 - ref1)))
    assert jnp.allclose(out1, ref1, atol=2e-3, rtol=2e-3), err1

    # bf16 weights vs. the f32 PyTorch-semantics model: loose sanity check.
    ref1_f32 = generator_reference_f32(x1, params_f32)
    err1_f32 = float(jnp.max(jnp.abs(out1 - ref1_f32)))
    assert jnp.allclose(out1, ref1_f32, atol=5e-2, rtol=5e-2), err1_f32

    # --- Larger batch (exercises multi-step grid + batch padding) ---
    B2 = 260
    x2 = jax.random.normal(kx2, (B2, LATENT), jnp.float32)
    out2 = jax.block_until_ready(generator_forward(x2, prepared))
    assert out2.shape == (B2, 1, 28, 28), out2.shape
    ref2 = generator_reference_matched(x2, prepared)
    err2 = float(jnp.max(jnp.abs(out2 - ref2)))
    assert jnp.allclose(out2, ref2, atol=2e-3, rtol=2e-3), err2

    print("KERNEL_OK")
</pallas_src>

<mosaic_0001>
module attributes {stable_mosaic.version = 11 : i64} {
  func.func @generator_kernel(%arg0: i32, %arg1: memref<8x128xbf16, #tpu.memory_space<vmem>>, %arg2: memref<128x256xbf16, #tpu.memory_space<vmem>>, %arg3: memref<1x256xf32, #tpu.memory_space<vmem>>, %arg4: memref<256x512xbf16, #tpu.memory_space<vmem>>, %arg5: memref<1x512xf32, #tpu.memory_space<vmem>>, %arg6: memref<512x1024xbf16, #tpu.memory_space<vmem>>, %arg7: memref<1x1024xf32, #tpu.memory_space<vmem>>, %arg8: memref<1024x896xbf16, #tpu.memory_space<vmem>>, %arg9: memref<1x896xf32, #tpu.memory_space<vmem>>, %arg10: memref<8x896xf32, #tpu.memory_space<vmem>>) attributes {dimension_semantics = [#tpu.dimension_semantics<parallel>], iteration_bounds = array<i64: 1>, scalar_prefetch = 0 : i64, scratch_operands = 0 : i64, tpu.core_type = #tpu.core_type<tc>, window_params = [{transform_indices = @transform_0, window_bounds = array<i64: 8, 128>}, {pipeline_mode = #tpu.pipeline_mode<synchronous>, transform_indices = @transform_1, window_bounds = array<i64: 128, 256>}, {pipeline_mode = #tpu.pipeline_mode<synchronous>, transform_indices = @transform_2, window_bounds = array<i64: 1, 256>}, {pipeline_mode = #tpu.pipeline_mode<synchronous>, transform_indices = @transform_3, window_bounds = array<i64: 256, 512>}, {pipeline_mode = #tpu.pipeline_mode<synchronous>, transform_indices = @transform_4, window_bounds = array<i64: 1, 512>}, {pipeline_mode = #tpu.pipeline_mode<synchronous>, transform_indices = @transform_5, window_bounds = array<i64: 512, 1024>}, {pipeline_mode = #tpu.pipeline_mode<synchronous>, transform_indices = @transform_6, window_bounds = array<i64: 1, 1024>}, {pipeline_mode = #tpu.pipeline_mode<synchronous>, transform_indices = @transform_7, window_bounds = array<i64: 1024, 896>}, {pipeline_mode = #tpu.pipeline_mode<synchronous>, transform_indices = @transform_8, window_bounds = array<i64: 1, 896>}, {transform_indices = @transform_9, window_bounds = array<i64: 8, 896>}]} {
    %c0 = arith.constant 0 : index
    %c0_0 = arith.constant 0 : index
    %0 = vector.load %arg1[%c0, %c0_0] : memref<8x128xbf16, #tpu.memory_space<vmem>>, vector<8x128xbf16>
    %c0_1 = arith.constant 0 : index
    %c0_2 = arith.constant 0 : index
    %1 = vector.load %arg2[%c0_1, %c0_2] : memref<128x256xbf16, #tpu.memory_space<vmem>>, vector<128x256xbf16>
    %cst = arith.constant dense<0.000000e+00> : vector<8x256xf32>
    %2 = tpu.matmul %0, %1, %cst {dimension_numbers = #tpu.dot_dimension_numbers<[1], [0], [0], [1], [0, 0, 1, 1], [], []>} : vector<8x128xbf16>, vector<128x256xbf16>, vector<8x256xf32> -> vector<8x256xf32>
    %c0_3 = arith.constant 0 : index
    %c0_4 = arith.constant 0 : index
    %3 = vector.load %arg3[%c0_3, %c0_4] : memref<1x256xf32, #tpu.memory_space<vmem>>, vector<1x256xf32>
    %4 = vector.broadcast %3 : vector<1x256xf32> to vector<8x256xf32>
    %5 = arith.addf %2, %4 : vector<8x256xf32>
    %cst_5 = arith.constant 0.000000e+00 : f32
    %6 = vector.broadcast %cst_5 : f32 to vector<8x256xf32>
    %7 = arith.maximumf %5, %6 : vector<8x256xf32>
    %8 = arith.truncf %7 : vector<8x256xf32> to vector<8x256xbf16>
    %c0_6 = arith.constant 0 : index
    %c0_7 = arith.constant 0 : index
    %9 = vector.load %arg4[%c0_6, %c0_7] : memref<256x512xbf16, #tpu.memory_space<vmem>>, vector<256x512xbf16>
    %cst_8 = arith.constant dense<0.000000e+00> : vector<8x512xf32>
    %10 = tpu.matmul %8, %9, %cst_8 {dimension_numbers = #tpu.dot_dimension_numbers<[1], [0], [0], [1], [0, 0, 1, 1], [], []>} : vector<8x256xbf16>, vector<256x512xbf16>, vector<8x512xf32> -> vector<8x512xf32>
    %c0_9 = arith.constant 0 : index
    %c0_10 = arith.constant 0 : index
    %11 = vector.load %arg5[%c0_9, %c0_10] : memref<1x512xf32, #tpu.memory_space<vmem>>, vector<1x512xf32>
    %12 = vector.broadcast %11 : vector<1x512xf32> to vector<8x512xf32>
    %13 = arith.addf %10, %12 : vector<8x512xf32>
    %cst_11 = arith.constant 0.000000e+00 : f32
    %14 = vector.broadcast %cst_11 : f32 to vector<8x512xf32>
    %15 = arith.maximumf %13, %14 : vector<8x512xf32>
    %16 = arith.truncf %15 : vector<8x512xf32> to vector<8x512xbf16>
    %c0_12 = arith.constant 0 : index
    %c0_13 = arith.constant 0 : index
    %17 = vector.load %arg6[%c0_12, %c0_13] : memref<512x1024xbf16, #tpu.memory_space<vmem>>, vector<512x1024xbf16>
    %cst_14 = arith.constant dense<0.000000e+00> : vector<8x1024xf32>
    %18 = tpu.matmul %16, %17, %cst_14 {dimension_numbers = #tpu.dot_dimension_numbers<[1], [0], [0], [1], [0, 0, 1, 1], [], []>} : vector<8x512xbf16>, vector<512x1024xbf16>, vector<8x1024xf32> -> vector<8x1024xf32>
    %c0_15 = arith.constant 0 : index
    %c0_16 = arith.constant 0 : index
    %19 = vector.load %arg7[%c0_15, %c0_16] : memref<1x1024xf32, #tpu.memory_space<vmem>>, vector<1x1024xf32>
    %20 = vector.broadcast %19 : vector<1x1024xf32> to vector<8x1024xf32>
    %21 = arith.addf %18, %20 : vector<8x1024xf32>
    %cst_17 = arith.constant 0.000000e+00 : f32
    %22 = vector.broadcast %cst_17 : f32 to vector<8x1024xf32>
    %23 = arith.maximumf %21, %22 : vector<8x1024xf32>
    %24 = arith.truncf %23 : vector<8x1024xf32> to vector<8x1024xbf16>
    %c0_18 = arith.constant 0 : index
    %c0_19 = arith.constant 0 : index
    %25 = vector.load %arg8[%c0_18, %c0_19] : memref<1024x896xbf16, #tpu.memory_space<vmem>>, vector<1024x896xbf16>
    %cst_20 = arith.constant dense<0.000000e+00> : vector<8x896xf32>
    %26 = tpu.matmul %24, %25, %cst_20 {dimension_numbers = #tpu.dot_dimension_numbers<[1], [0], [0], [1], [0, 0, 1, 1], [], []>} : vector<8x1024xbf16>, vector<1024x896xbf16>, vector<8x896xf32> -> vector<8x896xf32>
    %c0_21 = arith.constant 0 : index
    %c0_22 = arith.constant 0 : index
    %27 = vector.load %arg9[%c0_21, %c0_22] : memref<1x896xf32, #tpu.memory_space<vmem>>, vector<1x896xf32>
    %28 = vector.broadcast %27 : vector<1x896xf32> to vector<8x896xf32>
    %29 = arith.addf %26, %28 : vector<8x896xf32>
    %30 = math.tanh %29 : vector<8x896xf32>
    %c0_23 = arith.constant 0 : index
    %c0_24 = arith.constant 0 : index
    %31 = vector.load %arg10[%c0_23, %c0_24] : memref<8x896xf32, #tpu.memory_space<vmem>>, vector<8x896xf32>
    tpu.vector_store %arg10[%c0_23, %c0_24], %30 {strides = array<i32>} : memref<8x896xf32, #tpu.memory_space<vmem>>, vector<8x896xf32>,
    return
  }
  func.func @transform_0(%arg0: i32) -> (i32, i32) {
    %c0_i32 = arith.constant 0 : i32
    %c0_i32_0 = arith.constant 0 : i32
    return %arg0, %c0_i32 : i32, i32
  }
  func.func @transform_1(%arg0: i32) -> (i32, i32) {
    %c0_i32 = arith.constant 0 : i32
    %c0_i32_0 = arith.constant 0 : i32
    %c0_i32_1 = arith.constant 0 : i32
    return %c0_i32, %c0_i32_0 : i32, i32
  }
  func.func @transform_2(%arg0: i32) -> (i32, i32) {
    %c0_i32 = arith.constant 0 : i32
    %c0_i32_0 = arith.constant 0 : i32
    %c0_i32_1 = arith.constant 0 : i32
    return %c0_i32, %c0_i32_0 : i32, i32
  }
  func.func @transform_3(%arg0: i32) -> (i32, i32) {
    %c0_i32 = arith.constant 0 : i32
    %c0_i32_0 = arith.constant 0 : i32
    %c0_i32_1 = arith.constant 0 : i32
    return %c0_i32, %c0_i32_0 : i32, i32
  }
  func.func @transform_4(%arg0: i32) -> (i32, i32) {
    %c0_i32 = arith.constant 0 : i32
    %c0_i32_0 = arith.constant 0 : i32
    %c0_i32_1 = arith.constant 0 : i32
    return %c0_i32, %c0_i32_0 : i32, i32
  }
  func.func @transform_5(%arg0: i32) -> (i32, i32) {
    %c0_i32 = arith.constant 0 : i32
    %c0_i32_0 = arith.constant 0 : i32
    %c0_i32_1 = arith.constant 0 : i32
    return %c0_i32, %c0_i32_0 : i32, i32
  }
  func.func @transform_6(%arg0: i32) -> (i32, i32) {
    %c0_i32 = arith.constant 0 : i32
    %c0_i32_0 = arith.constant 0 : i32
    %c0_i32_1 = arith.constant 0 : i32
    return %c0_i32, %c0_i32_0 : i32, i32
  }
  func.func @transform_7(%arg0: i32) -> (i32, i32) {
    %c0_i32 = arith.constant 0 : i32
    %c0_i32_0 = arith.constant 0 : i32
    %c0_i32_1 = arith.constant 0 : i32
    return %c0_i32, %c0_i32_0 : i32, i32
  }
  func.func @transform_8(%arg0: i32) -> (i32, i32) {
    %c0_i32 = arith.constant 0 : i32
    %c0_i32_0 = arith.constant 0 : i32
    %c0_i32_1 = arith.constant 0 : i32
    return %c0_i32, %c0_i32_0 : i32, i32
  }
  func.func @transform_9(%arg0: i32) -> (i32, i32) {
    %c0_i32 = arith.constant 0 : i32
    %c0_i32_0 = arith.constant 0 : i32
    return %arg0, %c0_i32 : i32, i32
  }
}

</mosaic_0001>

<bundles_post_ra>
// kernel: generator_forward.1
= control target key start
LH: loop header
LB: loop body
LE: loop exit
PB: predicated region body
PF: predicated region fallthrough
CT: control target
= control target key end

     0   :  { %14 = vsyncpa [#allocation3], 0  ;;  %s8356_s0 = inlined_call_operand.vmem [shape: bf16[8,128], index: 0, kind: input, shape index: {}]   ;;  %s8357_s1 = inlined_call_operand.hbm [shape: bf16[128,256], index: 1, kind: input, shape index: {}]   ;;  %s8358_s2 = inlined_call_operand.hbm [shape: f32[1,256], index: 2, kind: input, shape index: {}]   ;;  %s8359_s3 = inlined_call_operand.hbm [shape: bf16[256,512], index: 3, kind: input, shape index: {}]   ;;  %s8360_s4 = inlined_call_operand.hbm [shape: f32[1,512], index: 4, kind: input, shape index: {}]   ;;  %s8361_s5 = inlined_call_operand.hbm [shape: bf16[512,1024], index: 5, kind: input, shape index: {}]   ;;  %s8362_s6 = inlined_call_operand.hbm [shape: f32[1,1024], index: 6, kind: input, shape index: {}]   ;;  %s8363_s7 = inlined_call_operand.hbm [shape: bf16[1024,896], index: 7, kind: input, shape index: {}]   ;;  %s8364_s8 = inlined_call_operand.hbm [shape: f32[1,896], index: 8, kind: input, shape index: {}]   ;;  %s8365_s9 = inlined_call_operand.vmem [shape: f32[8,896], index: 9, kind: output, shape index: {}]  }
   0x1   :  { %15 = vsyncpa [#allocation5], 0 }
   0x2   :  { %16 = vsyncpa [#allocation8], 0 }
   0x3   :  { %17 = vsyncpa [#allocation11], 0 }
   0x4   :  { %18 = vsyncpa [#allocation14], 0  ;;  %s8068_s30 = smov [#allocation4]   ;;  %s8069_s11 = smov [#allocation7]  }
   0x5   :  { %s39_s10 = sshll.u32 %s8068_s30, 4  ;;  %s61_s12 = sshll.u32 %s8069_s11, 4  ;;  %s40_s10 = int_to_ptr.vmem [resolvable:$true] %s39_s10  ;;  %s62_s12 = int_to_ptr.vmem [resolvable:$true] %s61_s12 }
   0x6   :  { %s7906_s13 = scalar_lea.vmem %s40_s10, 32  ;;  %p7911_p1 = scmp.lt.s32.totalorder %s40_s10, %s40_s10 }
   0x7   :  { %p7907_p0 = scmp.ne.s32.totalorder %s40_s10, %s7906_s13  ;;  %p7912_p2 = scmp.lt.s32.totalorder %s7906_s13, %s7906_s13 }
   0x9   :  { %p7913_p3 = por %p7912_p2, %p7911_p1 }
   0xb   :  { %p7914_p4 = pnand %p7913_p3, %p7907_p0 }
   0xd   :  { %7917 = shalt.err (!%p7914_p4)
}
   0xe   :  { %42 = dma.hbm_to_vmem [thread:$0]  %s8358_s2, 32, %s40_s10, [#allocation5]  }
   0xf   :  { %s7926_s16 = scalar_lea.vmem %s62_s12, 64  ;;  %p7931_p6 = scmp.lt.s32.totalorder %s62_s12, %s62_s12 }
  0x10   :  { %p7927_p5 = scmp.ne.s32.totalorder %s62_s12, %s7926_s16  ;;  %p7932_p7 = scmp.lt.s32.totalorder %s7926_s16, %s7926_s16 }
  0x12   :  { %p7933_p8 = por %p7932_p7, %p7931_p6 }
  0x14   :  { %p7934_p9 = pnand %p7933_p8, %p7927_p5 }
  0x16   :  { %7937 = shalt.err (!%p7934_p9)
}
  0x17   :  { %64 = dma.hbm_to_vmem [thread:$0]  %s8360_s4, 64, %s62_s12, [#allocation8]  }
  0x18   :  { %s8070_s19 = smov [#allocation10]   ;;  %s8071_s21 = smov [#allocation2]  }
  0x19   :  { %s83_s20 = sshll.u32 %s8070_s19, 4  ;;  %s26_s22 = sshll.u32 %s8071_s21, 4  ;;  %s84_s20 = int_to_ptr.vmem [resolvable:$true] %s83_s20  ;;  %s27_s22 = int_to_ptr.vmem [resolvable:$true] %s26_s22 }
  0x1a   :  { %s7946_s23 = scalar_lea.vmem %s84_s20, 128  ;;  %p7951_p11 = scmp.lt.s32.totalorder %s84_s20, %s84_s20 }
  0x1b   :  { %p7947_p10 = scmp.ne.s32.totalorder %s84_s20, %s7946_s23  ;;  %p7952_p12 = scmp.lt.s32.totalorder %s7946_s23, %s7946_s23 }
  0x1d   :  { %p7953_p13 = por %p7952_p12, %p7951_p11 }
  0x1f   :  { %p7954_p0 = pnand %p7953_p13, %p7947_p10 }
  0x21   :  { %7957 = shalt.err (!%p7954_p0)
}
  0x22   :  { %86 = dma.hbm_to_vmem [thread:$0]  %s8362_s6, 128, %s84_s20, [#allocation11]  }
  0x23   :  { %s7966_s25 = scalar_lea.vmem %s27_s22, 2048  ;;  %p7971_p2 = scmp.lt.s32.totalorder %s27_s22, %s27_s22 }
  0x24   :  { %p7967_p1 = scmp.ne.s32.totalorder %s27_s22, %s7966_s25  ;;  %p7972_p3 = scmp.lt.s32.totalorder %s7966_s25, %s7966_s25 }
  0x26   :  { %p7973_p4 = por %p7972_p3, %p7971_p2 }
  0x28   :  { %p7974_p5 = pnand %p7973_p4, %p7967_p1 }
  0x2a   :  { %7977 = shalt.err (!%p7974_p5)
}
  0x2b   :  { %s8072_s4 = smov 128   ;;  %s8073_s26 = smov 8  }
  0x2c   :  { %32 = dma.hbm_to_vmem [thread:$0]  %s8357_s1, 2048, %s27_s22, [#allocation3], %s8072_s4, %s8072_s4, %s8073_s26  }
  0x2d   :  { %s8074_s29 = smov [#allocation6]  }
  0x2e   :  { %s48_s30 = sshll.u32 %s8074_s29, 4  ;;  %s49_s30 = int_to_ptr.vmem [resolvable:$true] %s48_s30 }
  0x2f   :  { %s7986_s10 = scalar_lea.vmem %s49_s30, 8192  ;;  %p7991_p7 = scmp.lt.s32.totalorder %s49_s30, %s49_s30 }
  0x30   :  { %p7987_p6 = scmp.ne.s32.totalorder %s49_s30, %s7986_s10  ;;  %p7992_p8 = scmp.lt.s32.totalorder %s7986_s10, %s7986_s10 }
  0x32   :  { %p7993_p9 = por %p7992_p8, %p7991_p7 }
  0x34   :  { %p7994_p10 = pnand %p7993_p9, %p7987_p6 }
  0x36   :  { %7997 = shalt.err (!%p7994_p10)
}
  0x37   :  { %s8075_s6 = smov 256   ;;  %s8076_s11 = smov 16  }
  0x38   :  { %54 = dma.hbm_to_vmem [thread:$0]  %s8359_s3, 8192, %s49_s30, [#allocation5], %s8075_s6, %s8075_s6, %s8076_s11  }
  0x39   :  { %s8077_s14 = smov [#allocation9]  }
  0x3a   :  { %s70_s15 = sshll.u32 %s8077_s14, 4  ;;  %s71_s15 = int_to_ptr.vmem [resolvable:$true] %s70_s15 }
  0x3b   :  { %s8006_s1 = scalar_lea.vmem %s71_s15, 32768  ;;  %p8011_p12 = scmp.lt.s32.totalorder %s71_s15, %s71_s15 }
  0x3c   :  { %p8007_p11 = scmp.ne.s32.totalorder %s71_s15, %s8006_s1  ;;  %p8012_p13 = scmp.lt.s32.totalorder %s8006_s1, %s8006_s1 }
  0x3e   :  { %p8013_p0 = por %p8012_p13, %p8011_p12 }
  0x40   :  { %p8014_p1 = pnand %p8013_p0, %p8007_p11 }
  0x42   :  { %8017 = shalt.err (!%p8014_p1)
}
  0x43   :  { %s8078_s16 = smov 512   ;;  %s8079_s17 = smov 32  }
  0x44   :  { %76 = dma.hbm_to_vmem [thread:$0]  %s8361_s5, 32768, %s71_s15, [#allocation8], %s8078_s16, %s8078_s16, %s8079_s17  }
  0x45   :  { %s8080_s20 = smov [#allocation12]  }
  0x46   :  { %s92_s21 = sshll.u32 %s8080_s20, 4  ;;  %s93_s21 = int_to_ptr.vmem [resolvable:$true] %s92_s21 }
  0x47   :  { %s8026_s3 = scalar_lea.vmem %s93_s21, 57344  ;;  %p8031_p3 = scmp.lt.s32.totalorder %s93_s21, %s93_s21 }
  0x48   :  { %p8027_p2 = scmp.ne.s32.totalorder %s93_s21, %s8026_s3  ;;  %p8032_p4 = scmp.lt.s32.totalorder %s8026_s3, %s8026_s3 }
  0x4a   :  { %p8033_p5 = por %p8032_p4, %p8031_p3 }
  0x4c   :  { %p8034_p6 = pnand %p8033_p5, %p8027_p2 }
  0x4e   :  { %8037 = shalt.err (!%p8034_p6)
}
  0x4f   :  { %s8081_s22 = smov 448   ;;  %s8082_s23 = smov 28  }
  0x50   :  { %98 = dma.hbm_to_vmem [thread:$0]  %s8363_s7, 57344, %s93_s21, [#allocation11], %s8081_s22, %s8081_s22, %s8082_s23  }
  0x51   :  { %s8083_s25 = smov [#allocation13]  }
  0x52   :  { %s105_s4 = sshll.u32 %s8083_s25, 4  ;;  %s106_s4 = int_to_ptr.vmem [resolvable:$true] %s105_s4 }
  0x53   :  { %s8046_s5 = scalar_lea.vmem %s106_s4, 112  ;;  %s8050_s26 = scalar_lea.vmem %s106_s4, 128 }
  0x54   :  { %p8047_p7 = scmp.ne.s32.totalorder %s106_s4, %s8046_s5  ;;  %p8051_p8 = scmp.lt.s32.totalorder %s106_s4, %s106_s4 }
  0x55   :  { %p8052_p9 = scmp.lt.s32.totalorder %s8050_s26, %s8046_s5 }
  0x57   :  { %p8053_p10 = por %p8052_p9, %p8051_p8 }
  0x59   :  { %p8054_p11 = pnand %p8053_p10, %p8047_p7 }
  0x5b   :  { %8057 = shalt.err (!%p8054_p11)
}
  0x5c   :  { %108 = dma.hbm_to_vmem [thread:$0]  %s8364_s8, 112, %s106_s4, [#allocation14]  }
  0x5d   :  { %8058 = dma.done.wait [#allocation3], 2048  }
  0x5e   :  { %8059 = vsyncadd [#allocation3], 4294965248 }
  0x5f   :  { %8060 = dma.done.wait [#allocation5], 8224  }
  0x60   :  { %8061 = vsyncadd [#allocation5], 4294959072 }
  0x61   :  { %8062 = dma.done.wait [#allocation8], 32832  }
  0x62   :  { %8063 = vsyncadd [#allocation8], 4294934464 }
  0x63   :  { %8064 = dma.done.wait [#allocation11], 57472  }
  0x64   :  { %8065 = vsyncadd [#allocation11], 4294909824 }
  0x65   :  { %8066 = dma.done.wait [#allocation14], 112  }
  0x66   :  { %8067 = vsyncadd [#allocation14], 4294967184  ;;  %v8084_v0 = vmov 0   ;;  %v7123_v1 = vld [vmem:[#allocation2 + $0x74] ss:$8 sps:$4 sm:$0xff]  }
  0x67   :  { %275 = vmatprep.mubr.bf16.mxu0 %v8084_v0  ;;  %v7125_v2 = vld [vmem:[#allocation2 + $0x70] ss:$8 sps:$4 sm:$0xff]   ;;  %243 = vmatprep.subr.bf16.mxu0 %v7123_v1  ;;  %v7126_v3 = vld [vmem:[#allocation2 + $0x64] ss:$8 sps:$4 sm:$0xff]   ;;  %v7128_v4 = vld [vmem:[#allocation2 + $0x60] ss:$8 sps:$4 sm:$0xff]  }
  0x68   :  { %244 = vmatpush1.bf16.msra.mxu0 %v7125_v2  ;;  %v7129_v5 = vld [vmem:[#allocation2 + $0x54] ss:$8 sps:$4 sm:$0xff]   ;;  %v7131_v6 = vld [vmem:[#allocation2 + $0x50] ss:$8 sps:$4 sm:$0xff]   ;;  %v7132_v7 = vld [vmem:[#allocation2 + $0x44] ss:$8 sps:$4 sm:$0xff]  }
  0x69   :  { %245 = vmatprep.subr.bf16.mxu0 %v7126_v3  ;;  %v7134_v8 = vld [vmem:[#allocation2 + $0x40] ss:$8 sps:$4 sm:$0xff]   ;;  %v7135_v10 = vld [vmem:[#allocation2 + $0x34] ss:$8 sps:$4 sm:$0xff]   ;;  %v7137_v13 = vld [vmem:[#allocation2 + $0x30] ss:$8 sps:$4 sm:$0xff]  }
  0x6a   :  { %v7147_v9 = vld [vmem:[#allocation6 + $0xe4] ss:$16 sps:$4 sm:$0xff]   ;;  %v7152_v11 = vld [vmem:[#allocation6 + $0xe0] ss:$16 sps:$4 sm:$0xff]   ;;  %v7151_v26 = vld [vmem:[#allocation6 + $0xec] ss:$16 sps:$4 sm:$0xff]  }
  0x6b   :  { %694 = vmatprep.subr.bf16.mxu1 %v7147_v9  ;;  %v7153_v12 = vld [vmem:[#allocation6 + $0xc4] ss:$16 sps:$4 sm:$0xff]   ;;  %v7158_v15 = vld [vmem:[#allocation6 + $0xc0] ss:$16 sps:$4 sm:$0xff]   ;;  %v7149_v30 = vld [vmem:[#allocation6 + $0xe8] ss:$16 sps:$4 sm:$0xff]  }
  0x6c   :  { %246 = vmatpush1.bf16.msra.mxu0 %v7128_v4  ;;  %v7138_v14 = vld [vmem:[#allocation2 + $0x24] ss:$8 sps:$4 sm:$0xff]   ;;  %695 = vmatpush1.bf16.msra.mxu1 %v7152_v11  ;;  %v7140_v17 = vld [vmem:[#allocation2 + $0x20] ss:$8 sps:$4 sm:$0xff]   ;;  %v7141_v18 = vld [vmem:[#allocation2 + $0x14] ss:$8 sps:$4 sm:$0xff]  }
  0x6d   :  { %247 = vmatprep.subr.bf16.mxu0 %v7129_v5  ;;  %696 = vmatprep.subr.bf16.mxu1 %v7153_v12  ;;  %v7159_v16 = vld [vmem:[#allocation6 + $0xa4] ss:$16 sps:$4 sm:$0xff]   ;;  %v7164_v19 = vld [vmem:[#allocation6 + $0xa0] ss:$16 sps:$4 sm:$0xff]   ;;  %v7157_v31 = vld [vmem:[#allocation6 + $0xcc] ss:$16 sps:$4 sm:$0xff]  }
  0x6e   :  { %v7165_v20 = vld [vmem:[#allocation6 + $0x84] ss:$16 sps:$4 sm:$0xff]   ;;  %v7170_v23 = vld [vmem:[#allocation6 + $0x80] ss:$16 sps:$4 sm:$0xff]   ;;  %v7155_v34 = vld [vmem:[#allocation6 + $0xc8] ss:$16 sps:$4 sm:$0xff]  }
  0x6f   :  { %v7143_v21 = vld [vmem:[#allocation2 + $0x10] ss:$8 sps:$4 sm:$0xff]   ;;  %v7144_v22 = vld [vmem:[#allocation2 + $0x4] ss:$8 sps:$4 sm:$0xff]   ;;  %v7146_v25 = vld [vmem:[#allocation2] ss:$8 sps:$4 sm:$0xff]  }
  0x70   :  { %248 = vmatpush1.bf16.msra.mxu0 %v7131_v6  ;;  %697 = vmatpush1.bf16.msra.mxu1 %v7158_v15  ;;  %v7171_v24 = vld [vmem:[#allocation6 + $0x64] ss:$16 sps:$4 sm:$0xff]   ;;  %v7176_v27 = vld [vmem:[#allocation6 + $0x60] ss:$16 sps:$4 sm:$0xff]   ;;  %v7163_v35 = vld [vmem:[#allocation6 + $0xac] ss:$16 sps:$4 sm:$0xff]  }
  0x71   :  { %249 = vmatprep.subr.bf16.mxu0 %v7132_v7  ;;  %698 = vmatprep.subr.bf16.mxu1 %v7159_v16  ;;  %v7177_v28 = vld [vmem:[#allocation6 + $0x44] ss:$16 sps:$4 sm:$0xff]   ;;  %v134_v29 = vld [vmem:[%s8356_s0] sm:$0xf]  ;;  %v7161_v38 = vld [vmem:[#allocation6 + $0xa8] ss:$16 sps:$4 sm:$0xff]  }
  0x72   :  { %v7182_v32 = vld [vmem:[#allocation6 + $0x40] ss:$16 sps:$4 sm:$0xff]   ;;  %v7183_v33 = vld [vmem:[#allocation6 + $0x24] ss:$16 sps:$4 sm:$0xff]   ;;  %v7169_v39 = vld [vmem:[#allocation6 + $0x8c] ss:$16 sps:$4 sm:$0xff]  }
  0x73   :  { %v7188_v36 = vld [vmem:[#allocation6 + $0x20] ss:$16 sps:$4 sm:$0xff]   ;;  %v7189_v37 = vld [vmem:[#allocation6 + $0x4] ss:$16 sps:$4 sm:$0xff]   ;;  %v7167_v42 = vld [vmem:[#allocation6 + $0x88] ss:$16 sps:$4 sm:$0xff]  }
  0x74   :  { %250 = vmatpush1.bf16.msra.mxu0 %v7134_v8  ;;  %699 = vmatpush1.bf16.msra.mxu1 %v7164_v19  ;;  %v7194_v40 = vld [vmem:[#allocation6] ss:$16 sps:$4 sm:$0xff]   ;;  %v7195_v41 = vld [vmem:[#allocation6 + $0x1e4] ss:$16 sps:$4 sm:$0xff]   ;;  %v7175_v43 = vld [vmem:[#allocation6 + $0x6c] ss:$16 sps:$4 sm:$0xff]  }
  0x75   :  { %251 = vmatprep.subr.bf16.mxu0 %v7135_v10  ;;  %700 = vmatprep.subr.bf16.mxu1 %v7165_v20  ;;  %v7200_v44 = vld [vmem:[#allocation6 + $0x1e0] ss:$16 sps:$4 sm:$0xff]   ;;  %v7201_v45 = vld [vmem:[#allocation6 + $0x1c4] ss:$16 sps:$4 sm:$0xff]   ;;  %v7173_v46 = vld [vmem:[#allocation6 + $0x68] ss:$16 sps:$4 sm:$0xff]  }
  0x76   :  { %v7206_v47 = vld [vmem:[#allocation6 + $0x1c0] ss:$16 sps:$4 sm:$0xff]   ;;  %v7181_v48 = vld [vmem:[#allocation6 + $0x4c] ss:$16 sps:$4 sm:$0xff]   ;;  %v7207_v49 = vld [vmem:[#allocation6 + $0x1a4] ss:$16 sps:$4 sm:$0xff]  }
  0x77   :  { %v7179_v50 = vld [vmem:[#allocation6 + $0x48] ss:$16 sps:$4 sm:$0xff]   ;;  %v7212_v51 = vld [vmem:[#allocation6 + $0x1a0] ss:$16 sps:$4 sm:$0xff]   ;;  %v7187_v52 = vld [vmem:[#allocation6 + $0x2c] ss:$16 sps:$4 sm:$0xff]  }
  0x78   :  { %252 = vmatpush1.bf16.msra.mxu0 %v7137_v13  ;;  %701 = vmatpush1.bf16.msra.mxu1 %v7170_v23  ;;  %v7213_v53 = vld [vmem:[#allocation6 + $0x184] ss:$16 sps:$4 sm:$0xff]   ;;  %v7185_v54 = vld [vmem:[#allocation6 + $0x28] ss:$16 sps:$4 sm:$0xff]   ;;  %v7218_v55 = vld [vmem:[#allocation6 + $0x180] ss:$16 sps:$4 sm:$0xff]  }
  0x79   :  { %253 = vmatprep.subr.bf16.mxu0 %v7138_v14  ;;  %702 = vmatprep.subr.bf16.mxu1 %v7171_v24  ;;  %v7193_v56 = vld [vmem:[#allocation6 + $0xc] ss:$16 sps:$4 sm:$0xff]   ;;  %v7219_v57 = vld [vmem:[#allocation6 + $0x164] ss:$16 sps:$4 sm:$0xff]   ;;  %v7191_v58 = vld [vmem:[#allocation6 + $0x8] ss:$16 sps:$4 sm:$0xff]  }
  0x7a   :  { %v7224_v59 = vld [vmem:[#allocation6 + $0x160] ss:$16 sps:$4 sm:$0xff]   ;;  %v7199_v60 = vld [vmem:[#allocation6 + $0x1ec] ss:$16 sps:$4 sm:$0xff]   ;;  %v7225_v61 = vld [vmem:[#allocation6 + $0x144] ss:$16 sps:$4 sm:$0xff]  }
  0x7b   :  { %v7197_v62 = vld [vmem:[#allocation6 + $0x1e8] ss:$16 sps:$4 sm:$0xff]   ;;  %v7230_v63 = vld [vmem:[#allocation6 + $0x140] ss:$16 sps:$4 sm:$0xff]   ;;  %v7205_v0 = vld [vmem:[#allocation6 + $0x1cc] ss:$16 sps:$4 sm:$0xff]  }
  0x7c   :  { %254 = vmatpush1.bf16.msra.mxu0 %v7140_v17  ;;  %703 = vmatpush1.bf16.msra.mxu1 %v7176_v27  ;;  %v7203_v1 = vld [vmem:[#allocation6 + $0x1c8] ss:$16 sps:$4 sm:$0xff]   ;;  %v7211_v2 = vld [vmem:[#allocation6 + $0x1ac] ss:$16 sps:$4 sm:$0xff]   ;;  %v7231_v10 = vld [vmem:[#allocation6 + $0x124] ss:$16 sps:$4 sm:$0xff]  }
  0x7d   :  { %255 = vmatprep.subr.bf16.mxu0 %v7141_v18  ;;  %704 = vmatprep.subr.bf16.mxu1 %v7177_v28  ;;  %v7209_v3 = vld [vmem:[#allocation6 + $0x1a8] ss:$16 sps:$4 sm:$0xff]   ;;  %v7217_v4 = vld [vmem:[#allocation6 + $0x18c] ss:$16 sps:$4 sm:$0xff]   ;;  %v7236_v13 = vld [vmem:[#allocation6 + $0x120] ss:$16 sps:$4 sm:$0xff]  }
  0x7e   :  { %v7215_v5 = vld [vmem:[#allocation6 + $0x188] ss:$16 sps:$4 sm:$0xff]   ;;  %v7223_v6 = vld [vmem:[#allocation6 + $0x16c] ss:$16 sps:$4 sm:$0xff]   ;;  %v7237_v14 = vld [vmem:[#allocation6 + $0x104] ss:$16 sps:$4 sm:$0xff]  }
  0x7f   :  { %v7221_v7 = vld [vmem:[#allocation6 + $0x168] ss:$16 sps:$4 sm:$0xff]   ;;  %v7229_v8 = vld [vmem:[#allocation6 + $0x14c] ss:$16 sps:$4 sm:$0xff]   ;;  %v7242_v17 = vld [vmem:[#allocation6 + $0x100] ss:$16 sps:$4 sm:$0xff]  }
  0x80   :  { %256 = vmatpush1.bf16.msra.mxu0 %v7143_v21  ;;  %705 = vmatpush1.bf16.msra.mxu1 %v7182_v32  ;;  %v7227_v9 = vld [vmem:[#allocation6 + $0x148] ss:$16 sps:$4 sm:$0xff]   ;;  %v7235_v11 = vld [vmem:[#allocation6 + $0x12c] ss:$16 sps:$4 sm:$0xff]  }
  0x81   :  { %257 = vmatprep.subr.bf16.mxu0 %v7144_v22  ;;  %706 = vmatprep.subr.bf16.mxu1 %v7183_v33  ;;  %v7233_v12 = vld [vmem:[#allocation6 + $0x128] ss:$16 sps:$4 sm:$0xff]   ;;  %v7241_v15 = vld [vmem:[#allocation6 + $0x10c] ss:$16 sps:$4 sm:$0xff]  }
  0x82   :  { %v7239_v16 = vld [vmem:[#allocation6 + $0x108] ss:$16 sps:$4 sm:$0xff]   ;;  %v151_v28 = vld [vmem:[#allocation4] sm:$0x3] }
  0x83   :  { %v840_v18 = vld [vmem:[#allocation9 + $0x1c0] sm:$0xff] }
  0x84   :  { %258 = vmatpush1.bf16.msra.mxu0 %v7146_v25  ;;  %707 = vmatpush1.bf16.msra.mxu1 %v7188_v36  ;;  %v844_v19 = vld [vmem:[#allocation9 + $0x1e0] sm:$0xff] }
  0x85   :  { %735 = vmatprep.subr.bf16.mxu0 %v7151_v26  ;;  %708 = vmatprep.subr.bf16.mxu1 %v7189_v37  ;;  %v968_v20 = vld [vmem:[#allocation9 + $0x5c0] sm:$0xff]  ;;  %v6370_v21 = vcombine.low %v840_v18, %v844_v19  ;;  %v6371_v22 = vcombine.high %v840_v18, %v844_v19  ;;  %v153_v26 = vlaneseq }
  0x86   :  { %v972_v23 = vld [vmem:[#allocation9 + $0x5e0] sm:$0xff] }
  0x87   :  { %276 = vmatmul.mubr.bf16.vlgmr.msra.gmra.mxu0 %v134_v29  ;;  %v6498_v24 = vcombine.low %v968_v20, %v972_v23  ;;  %v6499_v25 = vcombine.high %v968_v20, %v972_v23  ;;  %v8162_v27 = vshrl.u32 %v153_v26, 7  ;;  %v796_v18 = vld [vmem:[#allocation9 + $0x60] sm:$0xff] }
  0x88   :  { %736 = vmatpush1.bf16.msra.mxu0 %v7149_v30  ;;  %709 = vmatpush1.bf16.msra.mxu1 %v7194_v40  ;;  %v960_v40 = vld [vmem:[#allocation9 + $0x580] sm:$0xff] }
  0x89   :  { %737 = vmatprep.subr.bf16.mxu0 %v7157_v31  ;;  %710 = vmatprep.subr.bf16.mxu1 %v7195_v41  ;;  %v8165_v29 = vsub.s32 0, %v8162_v27  ;;  %v8168_v30 = vsub.s32 1, %v8162_v27  ;;  %v920_v19 = vld [vmem:[#allocation9 + $0x440] sm:$0xff] }
  0x8a   :  { %v924_v20 = vld [vmem:[#allocation9 + $0x460] sm:$0xff] }
  0x8b   :  { %v156_v31 = vrot.slane %v151_v28, %v8165_v29  ;;  %v160_v32 = vrot.slane %v151_v28, %v8168_v30  ;;  %v788_v26 = vld [vmem:[#allocation9 + $0x20] sm:$0xff] }
  0x8c   :  { %738 = vmatpush1.bf16.msra.mxu0 %v7155_v34  ;;  %711 = vmatpush2.bf16.msra.mxu1 %v7200_v44  ;;  %v912_v28 = vld [vmem:[#allocation9 + $0x400] sm:$0xff] }
  0x8d   :  { %739 = vmatprep.subr.bf16.mxu0 %v7163_v35  ;;  %712 = vmatprep.subr.bf16.mxu1 %v7201_v45 }
  0x90   :  { %740 = vmatpush1.bf16.msra.mxu0 %v7161_v38  ;;  %713 = vmatpush2.bf16.msra.mxu1 %v7206_v47  ;;  %v832_v38 = vld [vmem:[#allocation9 + $0x180] sm:$0xff] }
  0x91   :  { %741 = vmatprep.subr.bf16.mxu0 %v7169_v39  ;;  %714 = vmatprep.subr.bf16.mxu1 %v7207_v49  ;;  %v836_v39 = vld [vmem:[#allocation9 + $0x1a0] sm:$0xff] }
  0x92   :  { %v828_v47 = vld [vmem:[#allocation9 + $0x160] sm:$0xff] }
  0x93   :  { %v956_v49 = vld [vmem:[#allocation9 + $0x560] sm:$0xff] }
  0x94   :  { %742 = vmatpush1.bf16.msra.mxu0 %v7167_v42  ;;  %715 = vmatpush2.bf16.msra.mxu1 %v7212_v51  ;;  %v6363_v51 = vcombine.high %v832_v38, %v836_v39 }
  0x95   :  { %743 = vmatprep.subr.bf16.mxu0 %v7175_v43  ;;  %716 = vmatprep.subr.bf16.mxu1 %v7213_v53  ;;  %v964_v43 = vld [vmem:[#allocation9 + $0x5a0] sm:$0xff]  ;;  %v6362_v53 = vcombine.low %v832_v38, %v836_v39 }
  0x96   :  { %v1032_v38 = vld [vmem:[#allocation9 + $0x7c0] sm:$0xff] }
  0x97   :  { %v1036_v39 = vld [vmem:[#allocation9 + $0x7e0] sm:$0xff] }
  0x98   :  { %744 = vmatpush1.bf16.msra.mxu0 %v7173_v46  ;;  %717 = vmatpush2.bf16.msra.mxu1 %v7218_v55  ;;  %v824_v46 = vld [vmem:[#allocation9 + $0x140] sm:$0xff] }
  0x99   :  { %745 = vmatprep.subr.bf16.mxu0 %v7181_v48  ;;  %718 = vmatprep.subr.bf16.mxu1 %v7219_v57  ;;  %v952_v48 = vld [vmem:[#allocation9 + $0x540] sm:$0xff] }
  0x9a   :  { %v816_v55 = vld [vmem:[#allocation9 + $0x100] sm:$0xff] }
  0x9b   :  { %v944_v57 = vld [vmem:[#allocation9 + $0x500] sm:$0xff] }
  0x9c   :  { %746 = vmatpush1.bf16.msra.mxu0 %v7179_v50  ;;  %719 = vmatpush2.bf16.msra.mxu1 %v7224_v59  ;;  %v6355_v59 = vcombine.high %v824_v46, %v828_v47 }
  0x9d   :  { %747 = vmatprep.subr.bf16.mxu0 %v7187_v52  ;;  %720 = vmatprep.subr.bf16.mxu1 %v7225_v61  ;;  %v6491_v52 = vcombine.high %v960_v40, %v964_v43  ;;  %v6354_v61 = vcombine.low %v824_v46, %v828_v47  ;;  %v1024_v46 = vld [vmem:[#allocation9 + $0x780] sm:$0xff] }
  0x9e   :  { %v1028_v47 = vld [vmem:[#allocation9 + $0x7a0] sm:$0xff] }
  0xa0   :  { %748 = vmatpush1.bf16.msra.mxu0 %v7185_v54  ;;  %721 = vmatpush2.bf16.msra.mxu1 %v7230_v63  ;;  %v6490_v54 = vcombine.low %v960_v40, %v964_v43  ;;  %v808_v63 = vld [vmem:[#allocation9 + $0xc0] sm:$0xff]  ;;  %v6563_v43 = vcombine.high %v1032_v38, %v1036_v39 }
  0xa1   :  { %749 = vmatprep.subr.bf16.mxu0 %v7193_v56  ;;  %722 = vmatprep.subr.bf16.mxu1 %v7231_v10  ;;  %v820_v56 = vld [vmem:[#allocation9 + $0x120] sm:$0xff] }
  0xa2   :  { %v804_v10 = vld [vmem:[#allocation9 + $0xa0] sm:$0xff] }
  0xa4   :  { %750 = vmatpush1.bf16.msra.mxu0 %v7191_v58  ;;  %723 = vmatpush2.bf16.msra.mxu1 %v7236_v13  ;;  %v948_v58 = vld [vmem:[#allocation9 + $0x520] sm:$0xff] }
  0xa5   :  { %751 = vmatprep.subr.bf16.mxu0 %v7199_v60  ;;  %724 = vmatprep.subr.bf16.mxu1 %v7237_v14  ;;  %v6483_v60 = vcombine.high %v952_v48, %v956_v49 }
  0xa8   :  { %752 = vmatpush2.bf16.msra.mxu0 %v7197_v62  ;;  %725 = vmatpush2.bf16.msra.mxu1 %v7242_v17  ;;  %v6482_v62 = vcombine.low %v952_v48, %v956_v49  ;;  %v792_v17 = vld [vmem:[#allocation9 + $0x40] sm:$0xff]  ;;  %v6562_v49 = vcombine.low %v1032_v38, %v1036_v39 }
  0xa9   :  { %753 = vmatprep.subr.bf16.mxu0 %v7205_v0  ;;  %2362 = vmatprep.subr.bf16.mxu1 %v6371_v22  ;;  %v812_v0 = vld [vmem:[#allocation9 + $0xe0] sm:$0xff]  ;;  %v6323_v23 = vcombine.high %v792_v17, %v796_v18 }
  0xaa   :  { %v6338_v13 = vcombine.low %v808_v63, %v812_v0 }
  0xac   :  { %754 = vmatpush2.bf16.msra.mxu0 %v7203_v1  ;;  %v936_v1 = vld [vmem:[#allocation9 + $0x4c0] sm:$0xff] }
  0xad   :  { %755 = vmatprep.subr.bf16.mxu0 %v7211_v2  ;;  %v940_v2 = vld [vmem:[#allocation9 + $0x4e0] sm:$0xff] }
  0xae   :  { %v6466_v14 = vcombine.low %v936_v1, %v940_v2 }
  0xb0   :  { %756 = vmatpush2.bf16.msra.mxu0 %v7209_v3  ;;  %v6347_v3 = vcombine.high %v816_v55, %v820_v56 }
  0xb1   :  { %757 = vmatprep.subr.bf16.mxu0 %v7217_v4  ;;  %v6475_v4 = vcombine.high %v944_v57, %v948_v58 }
  0xb4   :  { %758 = vmatpush2.bf16.msra.mxu0 %v7215_v5  ;;  %v6346_v5 = vcombine.low %v816_v55, %v820_v56  ;;  %v1020_v55 = vld [vmem:[#allocation9 + $0x760] sm:$0xff] }
  0xb5   :  { %759 = vmatprep.subr.bf16.mxu0 %v7223_v6  ;;  %v6474_v6 = vcombine.low %v944_v57, %v948_v58  ;;  %v6554_v57 = vcombine.low %v1024_v46, %v1028_v47 }
  0xb8   :  { %760 = vmatpush2.bf16.msra.mxu0 %v7221_v7  ;;  %v6339_v7 = vcombine.high %v808_v63, %v812_v0  ;;  %v1012_v63 = vld [vmem:[#allocation9 + $0x720] sm:$0xff] }
  0xb9   :  { %761 = vmatprep.subr.bf16.mxu0 %v7229_v8  ;;  %v6467_v8 = vcombine.high %v936_v1, %v940_v2 }
  0xbc   :  { %762 = vmatpush2.bf16.msra.mxu0 %v7227_v9  ;;  %v800_v9 = vld [vmem:[#allocation9 + $0x80] sm:$0xff] }
  0xbd   :  { %763 = vmatprep.subr.bf16.mxu0 %v7235_v11  ;;  %v928_v11 = vld [vmem:[#allocation9 + $0x480] sm:$0xff] }
  0xc0   :  { %764 = vmatpush2.bf16.msra.mxu0 %v7233_v12  ;;  %v932_v12 = vld [vmem:[#allocation9 + $0x4a0] sm:$0xff] }
  0xc1   :  { %765 = vmatprep.subr.bf16.mxu0 %v7241_v15  ;;  %v6331_v15 = vcombine.high %v800_v9, %v804_v10  ;;  %v6458_v22 = vcombine.low %v928_v11, %v932_v12 }
  0xc4   :  { %766 = vmatpush2.bf16.msra.mxu0 %v7239_v16  ;;  %v6459_v16 = vcombine.high %v928_v11, %v932_v12  ;;  %v864_v12 = vld [vmem:[#allocation9 + $0x280] sm:$0xff] }
  0xc5   :  { %2403 = vmatprep.subr.bf16.mxu0 %v6499_v25  ;;  %v784_v25 = vld [vmem:[#allocation9] sm:$0xff] }
  0xc6   :  { %v6314_v40 = vcombine.low %v784_v25, %v788_v26 }
 0x147   :  { %v277_v33 = vpop.f32.mrf.mxu0 }
 0x148   :  { %v278_v34 = vadd.f32 %v277_v33, %v156_v31  ;;  %v916_v31 = vld [vmem:[#allocation9 + $0x420] sm:$0xff]  ;;  %v6450_v33 = vcombine.low %v920_v19, %v924_v20 }
 0x149   :  { %v279_v35 = vpop.f32.mrf.mxu0 }
 0x14a   :  { %v284_v36 = vmax.f32 %v278_v34, 0.0  ;;  %v280_v37 = vadd.f32 %v279_v35, %v160_v32  ;;  %v6322_v32 = vcombine.low %v792_v17, %v796_v18  ;;  %v6315_v34 = vcombine.high %v784_v25, %v788_v26  ;;  %v988_v26 = vld [vmem:[#allocation9 + $0x660] sm:$0xff] }
 0x14b   :  { %v281_v41 = vpop.f32.mrf.mxu0  ;;  %v6443_v35 = vcombine.high %v912_v28, %v916_v31 }
 0x14c   :  { %v285_v42 = vmax.f32 %v280_v37, 0.0  ;;  %v286_v50 = vpack.c.bf16 %v284_v36, %v284_v36  ;;  %v904_v36 = vld [vmem:[#allocation9 + $0x3c0] sm:$0xff]  ;;  %v6442_v41 = vcombine.low %v912_v28, %v916_v31 }
 0x14d   :  { %v282_v44 = vpop.f32.mrf.mxu0  ;;  %v908_v37 = vld [vmem:[#allocation9 + $0x3e0] sm:$0xff] }
 0x14e   :  { %v287_v45 = vpack.c.bf16 %v285_v42, %v285_v42  ;;  %v6435_v42 = vcombine.high %v904_v36, %v908_v37  ;;  %v896_v44 = vld [vmem:[#allocation9 + $0x380] sm:$0xff]  ;;  %v6434_v48 = vcombine.low %v904_v36, %v908_v37 }
 0x14f   :  { %v980_v37 = vld [vmem:[#allocation9 + $0x620] sm:$0xff] }
 0x150   :  { %726 = vmatprep.mubr.bf16.mxu1 %v287_v45  ;;  %767 = vmatprep.mubr.bf16.mxu0 %v287_v45  ;;  %v900_v45 = vld [vmem:[#allocation9 + $0x3a0] sm:$0xff] }
 0x151   :  { %727 = vmatmul.mubr.bf16.vlgmr.msra.gmra.mxu1 %v286_v50  ;;  %768 = vmatmul.mubr.bf16.vlgmr.msra.gmra.mxu0 %v286_v50  ;;  %v6427_v50 = vcombine.high %v896_v44, %v900_v45  ;;  %v6426_v56 = vcombine.low %v896_v44, %v900_v45  ;;  %v973_v45 = vld [vmem:[#allocation9 + $0x5e8] sm:$0xff] }
 0x152   :  { %2363 = vmatpush1.bf16.msra.mxu1 %v6370_v21  ;;  %2404 = vmatpush1.bf16.msra.mxu0 %v6498_v24  ;;  %v6330_v21 = vcombine.low %v800_v9, %v804_v10  ;;  %v6451_v24 = vcombine.high %v920_v19, %v924_v20 }
 0x153   :  { %2364 = vmatprep.subr.bf16.mxu1 %v6363_v51  ;;  %2405 = vmatprep.subr.bf16.mxu0 %v6491_v52  ;;  %v6555_v51 = vcombine.high %v1024_v46, %v1028_v47  ;;  %v888_v52 = vld [vmem:[#allocation9 + $0x340] sm:$0xff] }
 0x156   :  { %2365 = vmatpush1.bf16.msra.mxu1 %v6362_v53  ;;  %2406 = vmatpush1.bf16.msra.mxu0 %v6490_v54  ;;  %v892_v53 = vld [vmem:[#allocation9 + $0x360] sm:$0xff] }
 0x157   :  { %2366 = vmatprep.subr.bf16.mxu1 %v6355_v59  ;;  %2407 = vmatprep.subr.bf16.mxu0 %v6483_v60  ;;  %v1016_v54 = vld [vmem:[#allocation9 + $0x740] sm:$0xff]  ;;  %v6419_v58 = vcombine.high %v888_v52, %v892_v53  ;;  %v6418_v0 = vcombine.low %v888_v52, %v892_v53 }
 0x158   :  { %v6547_v59 = vcombine.high %v1016_v54, %v1020_v55  ;;  %v880_v60 = vld [vmem:[#allocation9 + $0x300] sm:$0xff]  ;;  %v6546_v1 = vcombine.low %v1016_v54, %v1020_v55 }
 0x15a   :  { %2367 = vmatpush1.bf16.msra.mxu1 %v6354_v61  ;;  %2408 = vmatpush1.bf16.msra.mxu0 %v6482_v62  ;;  %v884_v61 = vld [vmem:[#allocation9 + $0x320] sm:$0xff] }
 0x15b   :  { %2368 = vmatprep.subr.bf16.mxu1 %v6347_v3  ;;  %2409 = vmatprep.subr.bf16.mxu0 %v6475_v4  ;;  %v1008_v62 = vld [vmem:[#allocation9 + $0x700] sm:$0xff]  ;;  %v6411_v2 = vcombine.high %v880_v60, %v884_v61 }
 0x15c   :  { %v6539_v3 = vcombine.high %v1008_v62, %v1012_v63  ;;  %v872_v4 = vld [vmem:[#allocation9 + $0x2c0] sm:$0xff]  ;;  %v6538_v9 = vcombine.low %v1008_v62, %v1012_v63 }
 0x15e   :  { %2369 = vmatpush1.bf16.msra.mxu1 %v6346_v5  ;;  %2410 = vmatpush1.bf16.msra.mxu0 %v6474_v6  ;;  %v876_v5 = vld [vmem:[#allocation9 + $0x2e0] sm:$0xff] }
 0x15f   :  { %2370 = vmatprep.subr.bf16.mxu1 %v6339_v7  ;;  %2411 = vmatprep.subr.bf16.mxu0 %v6467_v8  ;;  %v1000_v6 = vld [vmem:[#allocation9 + $0x6c0] sm:$0xff]  ;;  %v6410_v8 = vcombine.low %v880_v60, %v884_v61  ;;  %v6403_v10 = vcombine.high %v872_v4, %v876_v5 }
 0x160   :  { %v1004_v7 = vld [vmem:[#allocation9 + $0x6e0] sm:$0xff] }
 0x161   :  { %v6531_v11 = vcombine.high %v1000_v6, %v1004_v7  ;;  %v6530_v17 = vcombine.low %v1000_v6, %v1004_v7  ;;  %v833_v6 = vld [vmem:[#allocation9 + $0x188] sm:$0xff] }
 0x162   :  { %2371 = vmatpush1.bf16.msra.mxu1 %v6338_v13  ;;  %2412 = vmatpush1.bf16.msra.mxu0 %v6466_v14  ;;  %v868_v13 = vld [vmem:[#allocation9 + $0x2a0] sm:$0xff] }
 0x163   :  { %2372 = vmatprep.subr.bf16.mxu1 %v6331_v15  ;;  %2413 = vmatprep.subr.bf16.mxu0 %v6459_v16  ;;  %v992_v14 = vld [vmem:[#allocation9 + $0x680] sm:$0xff]  ;;  %v6402_v16 = vcombine.low %v872_v4, %v876_v5  ;;  %v6395_v18 = vcombine.high %v864_v12, %v868_v13  ;;  %v6394_v20 = vcombine.low %v864_v12, %v868_v13 }
 0x164   :  { %v996_v15 = vld [vmem:[#allocation9 + $0x6a0] sm:$0xff] }
 0x165   :  { %v6523_v19 = vcombine.high %v992_v14, %v996_v15 }
 0x166   :  { %2373 = vmatpush1.bf16.msra.mxu1 %v6330_v21  ;;  %2414 = vmatpush1.bf16.msra.mxu0 %v6458_v22  ;;  %v6522_v21 = vcombine.low %v992_v14, %v996_v15  ;;  %v856_v22 = vld [vmem:[#allocation9 + $0x240] sm:$0xff] }
 0x167   :  { %2374 = vmatprep.subr.bf16.mxu1 %v6323_v23  ;;  %2415 = vmatprep.subr.bf16.mxu0 %v6451_v24  ;;  %v860_v23 = vld [vmem:[#allocation9 + $0x260] sm:$0xff] }
 0x168   :  { %v984_v24 = vld [vmem:[#allocation9 + $0x640] sm:$0xff]  ;;  %v6387_v25 = vcombine.high %v856_v22, %v860_v23  ;;  %v6386_v28 = vcombine.low %v856_v22, %v860_v23 }
 0x169   :  { %v6514_v31 = vcombine.low %v984_v24, %v988_v26 }
 0x16a   :  { %2375 = vmatpush1.bf16.msra.mxu1 %v6322_v32  ;;  %2416 = vmatpush1.bf16.msra.mxu0 %v6450_v33  ;;  %v6515_v32 = vcombine.high %v984_v24, %v988_v26  ;;  %v848_v33 = vld [vmem:[#allocation9 + $0x200] sm:$0xff]  ;;  %v817_v26 = vld [vmem:[#allocation9 + $0x108] sm:$0xff] }
 0x16b   :  { %2376 = vmatprep.subr.bf16.mxu1 %v6315_v34  ;;  %2417 = vmatprep.subr.bf16.mxu0 %v6443_v35  ;;  %v852_v34 = vld [vmem:[#allocation9 + $0x220] sm:$0xff] }
 0x16c   :  { %v976_v35 = vld [vmem:[#allocation9 + $0x600] sm:$0xff]  ;;  %v6379_v36 = vcombine.high %v848_v33, %v852_v34  ;;  %v6378_v38 = vcombine.low %v848_v33, %v852_v34 }
 0x16d   :  { %v6506_v39 = vcombine.low %v976_v35, %v980_v37 }
 0x16e   :  { %2377 = vmatpush1.bf16.msra.mxu1 %v6314_v40  ;;  %2418 = vmatpush1.bf16.msra.mxu0 %v6442_v41  ;;  %v6507_v40 = vcombine.high %v976_v35, %v980_v37  ;;  %v841_v41 = vld [vmem:[#allocation9 + $0x1c8] sm:$0xff] }
 0x16f   :  { %2378 = vmatprep.subr.bf16.mxu1 %v6435_v42  ;;  %2419 = vmatprep.subr.bf16.mxu0 %v6563_v43  ;;  %v845_v42 = vld [vmem:[#allocation9 + $0x1e8] sm:$0xff] }
 0x170   :  { %v969_v43 = vld [vmem:[#allocation9 + $0x5c8] sm:$0xff]  ;;  %v6373_v44 = vcombine.high %v841_v41, %v845_v42  ;;  %v6372_v46 = vcombine.low %v841_v41, %v845_v42 }
 0x171   :  { %v6500_v47 = vcombine.low %v969_v43, %v973_v45  ;;  %v809_v37 = vld [vmem:[#allocation9 + $0xc8] sm:$0xff] }
 0x172   :  { %2379 = vmatpush2.bf16.msra.mxu1 %v6434_v48  ;;  %2420 = vmatpush2.bf16.msra.mxu0 %v6562_v49  ;;  %v6501_v48 = vcombine.high %v969_v43, %v973_v45  ;;  %v8173_v49 = vsub.s32 2, %v8162_v27  ;;  %v801_v45 = vld [vmem:[#allocation9 + $0x88] sm:$0xff] }
 0x173   :  { %2380 = vmatprep.subr.bf16.mxu1 %v6427_v50  ;;  %2421 = vmatprep.subr.bf16.mxu0 %v6555_v51  ;;  %v352_v50 = vld [vmem:[#allocation7] sm:$0xf]  ;;  %v8176_v51 = vsub.s32 3, %v8162_v27 }
 0x174   :  { %v357_v52 = vrot.slane %v352_v50, %v8165_v29  ;;  %v365_v53 = vrot.slane %v352_v50, %v8173_v49  ;;  %v361_v54 = vrot.slane %v352_v50, %v8168_v30 }
 0x175   :  { %v369_v55 = vrot.slane %v352_v50, %v8176_v51 }
 0x176   :  { %2381 = vmatpush2.bf16.msra.mxu1 %v6426_v56  ;;  %2422 = vmatpush2.bf16.msra.mxu0 %v6554_v57 }
 0x177   :  { %2382 = vmatprep.subr.bf16.mxu1 %v6419_v58  ;;  %2423 = vmatprep.subr.bf16.mxu0 %v6547_v59 }
 0x17a   :  { %2383 = vmatpush2.bf16.msra.mxu1 %v6418_v0  ;;  %2424 = vmatpush2.bf16.msra.mxu0 %v6546_v1 }
 0x17b   :  { %2384 = vmatprep.subr.bf16.mxu1 %v6411_v2  ;;  %2425 = vmatprep.subr.bf16.mxu0 %v6539_v3 }
 0x17e   :  { %2385 = vmatpush2.bf16.msra.mxu1 %v6410_v8  ;;  %2426 = vmatpush2.bf16.msra.mxu0 %v6538_v9  ;;  %v837_v9 = vld [vmem:[#allocation9 + $0x1a8] sm:$0xff] }
 0x17f   :  { %2386 = vmatprep.subr.bf16.mxu1 %v6403_v10  ;;  %2427 = vmatprep.subr.bf16.mxu0 %v6531_v11  ;;  %v961_v10 = vld [vmem:[#allocation9 + $0x588] sm:$0xff]  ;;  %v6364_v22 = vcombine.low %v833_v6, %v837_v9 }
 0x180   :  { %v965_v11 = vld [vmem:[#allocation9 + $0x5a8] sm:$0xff] }
 0x181   :  { %v6492_v23 = vcombine.low %v961_v10, %v965_v11 }
 0x182   :  { %2387 = vmatpush2.bf16.msra.mxu1 %v6402_v16  ;;  %2428 = vmatpush2.bf16.msra.mxu0 %v6530_v17  ;;  %v825_v16 = vld [vmem:[#allocation9 + $0x148] sm:$0xff]  ;;  %v6365_v17 = vcombine.high %v833_v6, %v837_v9 }
 0x183   :  { %2388 = vmatprep.subr.bf16.mxu1 %v6395_v18  ;;  %2429 = vmatprep.subr.bf16.mxu0 %v6523_v19  ;;  %v6493_v18 = vcombine.high %v961_v10, %v965_v11  ;;  %v829_v19 = vld [vmem:[#allocation9 + $0x168] sm:$0xff] }
 0x184   :  { %v6357_v24 = vcombine.high %v825_v16, %v829_v19  ;;  %v6356_v33 = vcombine.low %v825_v16, %v829_v19  ;;  %v1033_v9 = vld [vmem:[#allocation9 + $0x7c8] sm:$0xff] }
 0x185   :  { %v1037_v10 = vld [vmem:[#allocation9 + $0x7e8] sm:$0xff] }
 0x186   :  { %2389 = vmatpush2.bf16.msra.mxu1 %v6394_v20  ;;  %2430 = vmatpush2.bf16.msra.mxu0 %v6522_v21  ;;  %v953_v20 = vld [vmem:[#allocation9 + $0x548] sm:$0xff] }
 0x187   :  { %2390 = vmatprep.subr.bf16.mxu1 %v6387_v25  ;;  %2431 = vmatprep.subr.bf16.mxu0 %v6515_v32  ;;  %v957_v21 = vld [vmem:[#allocation9 + $0x568] sm:$0xff] }
 0x188   :  { %v6485_v25 = vcombine.high %v953_v20, %v957_v21  ;;  %v949_v32 = vld [vmem:[#allocation9 + $0x528] sm:$0xff]  ;;  %v6484_v34 = vcombine.low %v953_v20, %v957_v21 }
 0x189   :  { %v897_v19 = vld [vmem:[#allocation9 + $0x388] sm:$0xff] }
 0x18a   :  { %2391 = vmatpush2.bf16.msra.mxu1 %v6386_v28  ;;  %2432 = vmatpush2.bf16.msra.mxu0 %v6514_v31  ;;  %v821_v28 = vld [vmem:[#allocation9 + $0x128] sm:$0xff] }
 0x18b   :  { %2392 = vmatprep.subr.bf16.mxu1 %v6379_v36  ;;  %2433 = vmatprep.subr.bf16.mxu0 %v6507_v40  ;;  %v945_v31 = vld [vmem:[#allocation9 + $0x508] sm:$0xff]  ;;  %v6349_v35 = vcombine.high %v817_v26, %v821_v28  ;;  %v6348_v41 = vcombine.low %v817_v26, %v821_v28 }
 0x18c   :  { %v6477_v36 = vcombine.high %v945_v31, %v949_v32  ;;  %v941_v40 = vld [vmem:[#allocation9 + $0x4e8] sm:$0xff]  ;;  %v6476_v42 = vcombine.low %v945_v31, %v949_v32 }
 0x18d   :  { %v901_v20 = vld [vmem:[#allocation9 + $0x3a8] sm:$0xff] }
 0x18e   :  { %2393 = vmatpush2.bf16.msra.mxu1 %v6378_v38  ;;  %2434 = vmatpush2.bf16.msra.mxu0 %v6506_v39  ;;  %v813_v38 = vld [vmem:[#allocation9 + $0xe8] sm:$0xff] }
 0x18f   :  { %2444 = vmatprep.subr.bf16.mxu1 %v6373_v44  ;;  %2485 = vmatprep.subr.bf16.mxu0 %v6501_v48  ;;  %v937_v39 = vld [vmem:[#allocation9 + $0x4c8] sm:$0xff]  ;;  %v6341_v43 = vcombine.high %v809_v37, %v813_v38  ;;  %v6340_v50 = vcombine.low %v809_v37, %v813_v38 }
 0x190   :  { %v6469_v44 = vcombine.high %v937_v39, %v941_v40  ;;  %v933_v48 = vld [vmem:[#allocation9 + $0x4a8] sm:$0xff] }
 0x191   :  { %v1025_v21 = vld [vmem:[#allocation9 + $0x788] sm:$0xff] }
 0x192   :  { %v889_v28 = vld [vmem:[#allocation9 + $0x348] sm:$0xff] }
 0x193   :  { %v893_v31 = vld [vmem:[#allocation9 + $0x368] sm:$0xff] }
 0x194   :  { %v1017_v32 = vld [vmem:[#allocation9 + $0x748] sm:$0xff] }
 0x195   :  { %v881_v38 = vld [vmem:[#allocation9 + $0x308] sm:$0xff] }
 0x211   :  { %v728_v56 = vpop.f32.mrf.mxu1  ;;  %v769_v57 = vpop.f32.mrf.mxu0 }
 0x212   :  { %v729_v58 = vadd.f32 %v728_v56, %v357_v52  ;;  %v770_v59 = vadd.f32 %v769_v57, %v365_v53  ;;  %v6468_v52 = vcombine.low %v937_v39, %v941_v40  ;;  %v797_v56 = vld [vmem:[#allocation9 + $0x68] sm:$0xff] }
 0x213   :  { %v730_v60 = vpop.f32.mrf.mxu1  ;;  %v771_v61 = vpop.f32.mrf.mxu0  ;;  %v921_v57 = vld [vmem:[#allocation9 + $0x448] sm:$0xff] }
 0x214   :  { %v731_v62 = vadd.f32 %v730_v60, %v361_v54  ;;  %v772_v63 = vadd.f32 %v771_v61, %v369_v55  ;;  %v776_v0 = vmax.f32 %v729_v58, 0.0  ;;  %v778_v1 = vmax.f32 %v770_v59, 0.0  ;;  %v793_v55 = vld [vmem:[#allocation9 + $0x48] sm:$0xff] }
 0x215   :  { %v732_v2 = vpop.f32.mrf.mxu1  ;;  %v773_v3 = vpop.f32.mrf.mxu0  ;;  %v925_v58 = vld [vmem:[#allocation9 + $0x468] sm:$0xff]  ;;  %v6325_v61 = vcombine.high %v793_v55, %v797_v56 }
 0x216   :  { %v777_v4 = vmax.f32 %v731_v62, 0.0  ;;  %v779_v5 = vmax.f32 %v772_v63, 0.0  ;;  %v8186_v14 = vpack.c.bf16 %v776_v0, %v776_v0  ;;  %v8188_v15 = vpack.c.bf16 %v778_v1, %v778_v1  ;;  %v785_v63 = vld [vmem:[#allocation9 + $0x8] sm:$0xff] }
 0x217   :  { %v733_v7 = vpop.f32.mrf.mxu1  ;;  %v774_v8 = vpop.f32.mrf.mxu0  ;;  %v6453_v62 = vcombine.high %v921_v57, %v925_v58  ;;  %v789_v0 = vld [vmem:[#allocation9 + $0x28] sm:$0xff]  ;;  %v6324_v3 = vcombine.low %v793_v55, %v797_v56 }
 0x218   :  { %v8182_v12 = vpack.c.bf16 %v777_v4, %v777_v4  ;;  %v8184_v13 = vpack.c.bf16 %v779_v5, %v779_v5  ;;  %v913_v1 = vld [vmem:[#allocation9 + $0x408] sm:$0xff]  ;;  %v6452_v4 = vcombine.low %v921_v57, %v925_v58  ;;  %v6317_v5 = vcombine.high %v785_v63, %v789_v0 }
 0x219   :  { %v917_v2 = vld [vmem:[#allocation9 + $0x428] sm:$0xff]  ;;  %v6316_v11 = vcombine.low %v785_v63, %v789_v0 }
 0x21a   :  { %2394 = vmatprep.mubr.bf16.mxu1 %v8182_v12  ;;  %2435 = vmatprep.mubr.bf16.mxu0 %v8184_v13  ;;  %v6445_v6 = vcombine.high %v913_v1, %v917_v2  ;;  %v905_v7 = vld [vmem:[#allocation9 + $0x3c8] sm:$0xff]  ;;  %v6444_v16 = vcombine.low %v913_v1, %v917_v2 }
 0x21b   :  { %2395 = vmatmul.mubr.bf16.vlgmr.msra.gmra.mxu1 %v8186_v14  ;;  %2436 = vmatmul.mubr.bf16.vlgmr.msra.gmra.mxu0 %v8188_v15  ;;  %v909_v8 = vld [vmem:[#allocation9 + $0x3e8] sm:$0xff] }
 0x21c   :  { %2445 = vmatpush1.bf16.msra.mxu1 %v6372_v46  ;;  %2486 = vmatpush1.bf16.msra.mxu0 %v6500_v47  ;;  %v805_v46 = vld [vmem:[#allocation9 + $0xa8] sm:$0xff] }
 0x21d   :  { %2476 = vmatprep.mubr.bf16.mxu1 %v8182_v12  ;;  %2517 = vmatprep.mubr.bf16.mxu0 %v8184_v13  ;;  %v929_v47 = vld [vmem:[#allocation9 + $0x488] sm:$0xff]  ;;  %v6333_v53 = vcombine.high %v801_v45, %v805_v46  ;;  %v6332_v59 = vcombine.low %v801_v45, %v805_v46 }
 0x21e   :  { %2446 = vmatprep.subr.bf16.mxu1 %v6365_v17  ;;  %2487 = vmatprep.subr.bf16.mxu0 %v6493_v18  ;;  %v6461_v54 = vcombine.high %v929_v47, %v933_v48  ;;  %v6460_v60 = vcombine.low %v929_v47, %v933_v48  ;;  %v6437_v17 = vcombine.high %v905_v7, %v909_v8  ;;  %v885_v39 = vld [vmem:[#allocation9 + $0x328] sm:$0xff] }
 0x21f   :  { %v6565_v18 = vcombine.high %v1033_v9, %v1037_v10  ;;  %v1009_v40 = vld [vmem:[#allocation9 + $0x708] sm:$0xff] }
 0x220   :  { %2447 = vmatpush1.bf16.msra.mxu1 %v6364_v22  ;;  %2488 = vmatpush1.bf16.msra.mxu0 %v6492_v23  ;;  %v1029_v22 = vld [vmem:[#allocation9 + $0x7a8] sm:$0xff]  ;;  %v6436_v23 = vcombine.low %v905_v7, %v909_v8 }
 0x221   :  { %2448 = vmatprep.subr.bf16.mxu1 %v6357_v24  ;;  %2489 = vmatprep.subr.bf16.mxu0 %v6485_v25  ;;  %v6564_v24 = vcombine.low %v1033_v9, %v1037_v10  ;;  %v6429_v25 = vcombine.high %v897_v19, %v901_v20  ;;  %v6557_v26 = vcombine.high %v1025_v21, %v1029_v22  ;;  %v873_v46 = vld [vmem:[#allocation9 + $0x2c8] sm:$0xff] }
 0x222   :  { %v877_v47 = vld [vmem:[#allocation9 + $0x2e8] sm:$0xff] }
 0x223   :  { %v1001_v48 = vld [vmem:[#allocation9 + $0x6c8] sm:$0xff] }
 0x224   :  { %2449 = vmatpush1.bf16.msra.mxu1 %v6356_v33  ;;  %2490 = vmatpush1.bf16.msra.mxu0 %v6484_v34  ;;  %v1021_v33 = vld [vmem:[#allocation9 + $0x768] sm:$0xff]  ;;  %v6428_v34 = vcombine.low %v897_v19, %v901_v20  ;;  %v842_v20 = vld [vmem:[#allocation9 + $0x1d0] sm:$0xff] }
 0x225   :  { %2450 = vmatprep.subr.bf16.mxu1 %v6349_v35  ;;  %2491 = vmatprep.subr.bf16.mxu0 %v6477_v36  ;;  %v6556_v35 = vcombine.low %v1025_v21, %v1029_v22  ;;  %v6421_v36 = vcombine.high %v889_v28, %v893_v31  ;;  %v6549_v37 = vcombine.high %v1017_v32, %v1021_v33  ;;  %v865_v56 = vld [vmem:[#allocation9 + $0x288] sm:$0xff]  ;;  %v846_v21 = vld [vmem:[#allocation9 + $0x1f0] sm:$0xff] }
 0x226   :  { %v869_v57 = vld [vmem:[#allocation9 + $0x2a8] sm:$0xff]  ;;  %v970_v22 = vld [vmem:[#allocation9 + $0x5d0] sm:$0xff] }
 0x227   :  { %v993_v58 = vld [vmem:[#allocation9 + $0x688] sm:$0xff] }
 0x228   :  { %2451 = vmatpush1.bf16.msra.mxu1 %v6348_v41  ;;  %2492 = vmatpush1.bf16.msra.mxu0 %v6476_v42  ;;  %v1013_v41 = vld [vmem:[#allocation9 + $0x728] sm:$0xff]  ;;  %v6420_v42 = vcombine.low %v889_v28, %v893_v31  ;;  %v834_v31 = vld [vmem:[#allocation9 + $0x190] sm:$0xff] }
 0x229   :  { %2452 = vmatprep.subr.bf16.mxu1 %v6341_v43  ;;  %2493 = vmatprep.subr.bf16.mxu0 %v6469_v44  ;;  %v6548_v43 = vcombine.low %v1017_v32, %v1021_v33  ;;  %v6413_v44 = vcombine.high %v881_v38, %v885_v39  ;;  %v6541_v45 = vcombine.high %v1009_v40, %v1013_v41  ;;  %v857_v0 = vld [vmem:[#allocation9 + $0x248] sm:$0xff]  ;;  %v838_v32 = vld [vmem:[#allocation9 + $0x1b0] sm:$0xff] }
 0x22a   :  { %v861_v1 = vld [vmem:[#allocation9 + $0x268] sm:$0xff]  ;;  %v962_v33 = vld [vmem:[#allocation9 + $0x590] sm:$0xff] }
 0x22b   :  { %v985_v2 = vld [vmem:[#allocation9 + $0x648] sm:$0xff] }
 0x22c   :  { %2453 = vmatpush1.bf16.msra.mxu1 %v6340_v50  ;;  %2494 = vmatpush1.bf16.msra.mxu0 %v6468_v52  ;;  %v1005_v50 = vld [vmem:[#allocation9 + $0x6e8] sm:$0xff]  ;;  %v6412_v52 = vcombine.low %v881_v38, %v885_v39  ;;  %v826_v39 = vld [vmem:[#allocation9 + $0x150] sm:$0xff] }
 0x22d   :  { %2454 = vmatprep.subr.bf16.mxu1 %v6333_v53  ;;  %2495 = vmatprep.subr.bf16.mxu0 %v6461_v54  ;;  %v6540_v53 = vcombine.low %v1009_v40, %v1013_v41  ;;  %v6405_v54 = vcombine.high %v873_v46, %v877_v47  ;;  %v6533_v55 = vcombine.high %v1001_v48, %v1005_v50  ;;  %v849_v8 = vld [vmem:[#allocation9 + $0x208] sm:$0xff]  ;;  %v830_v40 = vld [vmem:[#allocation9 + $0x170] sm:$0xff] }
 0x22e   :  { %v853_v9 = vld [vmem:[#allocation9 + $0x228] sm:$0xff]  ;;  %v954_v41 = vld [vmem:[#allocation9 + $0x550] sm:$0xff] }
 0x22f   :  { %v977_v10 = vld [vmem:[#allocation9 + $0x608] sm:$0xff] }
 0x230   :  { %2455 = vmatpush1.bf16.msra.mxu1 %v6332_v59  ;;  %2496 = vmatpush1.bf16.msra.mxu0 %v6460_v60  ;;  %v997_v59 = vld [vmem:[#allocation9 + $0x6a8] sm:$0xff]  ;;  %v6404_v60 = vcombine.low %v873_v46, %v877_v47  ;;  %v818_v47 = vld [vmem:[#allocation9 + $0x110] sm:$0xff] }
 0x231   :  { %2456 = vmatprep.subr.bf16.mxu1 %v6325_v61  ;;  %2497 = vmatprep.subr.bf16.mxu0 %v6453_v62  ;;  %v6532_v61 = vcombine.low %v1001_v48, %v1005_v50  ;;  %v6397_v62 = vcombine.high %v865_v56, %v869_v57  ;;  %v6525_v63 = vcombine.high %v993_v58, %v997_v59  ;;  %v822_v48 = vld [vmem:[#allocation9 + $0x130] sm:$0xff] }
 0x232   :  { %v946_v50 = vld [vmem:[#allocation9 + $0x510] sm:$0xff] }
 0x234   :  { %2457 = vmatpush1.bf16.msra.mxu1 %v6324_v3  ;;  %2498 = vmatpush1.bf16.msra.mxu0 %v6452_v4  ;;  %v989_v3 = vld [vmem:[#allocation9 + $0x668] sm:$0xff]  ;;  %v6396_v4 = vcombine.low %v865_v56, %v869_v57  ;;  %v810_v57 = vld [vmem:[#allocation9 + $0xd0] sm:$0xff] }
 0x235   :  { %2458 = vmatprep.subr.bf16.mxu1 %v6317_v5  ;;  %2499 = vmatprep.subr.bf16.mxu0 %v6445_v6  ;;  %v6524_v5 = vcombine.low %v993_v58, %v997_v59  ;;  %v6389_v6 = vcombine.high %v857_v0, %v861_v1  ;;  %v6517_v7 = vcombine.high %v985_v2, %v989_v3  ;;  %v814_v58 = vld [vmem:[#allocation9 + $0xf0] sm:$0xff] }
 0x236   :  { %v938_v59 = vld [vmem:[#allocation9 + $0x4d0] sm:$0xff] }
 0x238   :  { %2459 = vmatpush1.bf16.msra.mxu1 %v6316_v11  ;;  %2500 = vmatpush1.bf16.msra.mxu0 %v6444_v16  ;;  %v981_v11 = vld [vmem:[#allocation9 + $0x628] sm:$0xff]  ;;  %v6388_v16 = vcombine.low %v857_v0, %v861_v1  ;;  %v802_v1 = vld [vmem:[#allocation9 + $0x90] sm:$0xff] }
 0x239   :  { %2460 = vmatprep.subr.bf16.mxu1 %v6437_v17  ;;  %2501 = vmatprep.subr.bf16.mxu0 %v6565_v18  ;;  %v6516_v17 = vcombine.low %v985_v2, %v989_v3  ;;  %v6381_v18 = vcombine.high %v849_v8, %v853_v9  ;;  %v6509_v19 = vcombine.high %v977_v10, %v981_v11  ;;  %v806_v2 = vld [vmem:[#allocation9 + $0xb0] sm:$0xff] }
 0x23a   :  { %v930_v3 = vld [vmem:[#allocation9 + $0x490] sm:$0xff] }
 0x23c   :  { %2461 = vmatpush2.bf16.msra.mxu1 %v6436_v23  ;;  %2502 = vmatpush2.bf16.msra.mxu0 %v6564_v24  ;;  %v974_v23 = vld [vmem:[#allocation9 + $0x5f0] sm:$0xff]  ;;  %v6380_v24 = vcombine.low %v849_v8, %v853_v9 }
 0x23d   :  { %2462 = vmatprep.subr.bf16.mxu1 %v6429_v25  ;;  %2503 = vmatprep.subr.bf16.mxu0 %v6557_v26  ;;  %v6508_v25 = vcombine.low %v977_v10, %v981_v11  ;;  %v6375_v26 = vcombine.high %v842_v20, %v846_v21  ;;  %v6503_v28 = vcombine.high %v970_v22, %v974_v23  ;;  %v794_v9 = vld [vmem:[#allocation9 + $0x50] sm:$0xff] }
 0x23e   :  { %v798_v10 = vld [vmem:[#allocation9 + $0x70] sm:$0xff] }
 0x23f   :  { %v922_v11 = vld [vmem:[#allocation9 + $0x450] sm:$0xff] }
 0x240   :  { %2463 = vmatpush2.bf16.msra.mxu1 %v6428_v34  ;;  %2504 = vmatpush2.bf16.msra.mxu0 %v6556_v35  ;;  %v966_v34 = vld [vmem:[#allocation9 + $0x5b0] sm:$0xff]  ;;  %v6374_v35 = vcombine.low %v842_v20, %v846_v21 }
 0x241   :  { %2464 = vmatprep.subr.bf16.mxu1 %v6421_v36  ;;  %2505 = vmatprep.subr.bf16.mxu0 %v6549_v37  ;;  %v6502_v36 = vcombine.low %v970_v22, %v974_v23  ;;  %v6367_v37 = vcombine.high %v834_v31, %v838_v32  ;;  %v6495_v38 = vcombine.high %v962_v33, %v966_v34  ;;  %v786_v21 = vld [vmem:[#allocation9 + $0x10] sm:$0xff] }
 0x242   :  { %v790_v22 = vld [vmem:[#allocation9 + $0x30] sm:$0xff] }
 0x243   :  { %v914_v23 = vld [vmem:[#allocation9 + $0x410] sm:$0xff] }
 0x244   :  { %2465 = vmatpush2.bf16.msra.mxu1 %v6420_v42  ;;  %2506 = vmatpush2.bf16.msra.mxu0 %v6548_v43  ;;  %v958_v42 = vld [vmem:[#allocation9 + $0x570] sm:$0xff]  ;;  %v6366_v43 = vcombine.low %v834_v31, %v838_v32 }
 0x245   :  { %2466 = vmatprep.subr.bf16.mxu1 %v6413_v44  ;;  %2507 = vmatprep.subr.bf16.mxu0 %v6541_v45  ;;  %v6494_v44 = vcombine.low %v962_v33, %v966_v34  ;;  %v6359_v45 = vcombine.high %v826_v39, %v830_v40  ;;  %v6487_v46 = vcombine.high %v954_v41, %v958_v42  ;;  %v906_v32 = vld [vmem:[#allocation9 + $0x3d0] sm:$0xff] }
 0x246   :  { %v910_v33 = vld [vmem:[#allocation9 + $0x3f0] sm:$0xff] }
 0x247   :  { %v1034_v34 = vld [vmem:[#allocation9 + $0x7d0] sm:$0xff] }
 0x248   :  { %2467 = vmatpush2.bf16.msra.mxu1 %v6412_v52  ;;  %2508 = vmatpush2.bf16.msra.mxu0 %v6540_v53  ;;  %v950_v52 = vld [vmem:[#allocation9 + $0x530] sm:$0xff]  ;;  %v6358_v53 = vcombine.low %v826_v39, %v830_v40 }
 0x249   :  { %2468 = vmatprep.subr.bf16.mxu1 %v6405_v54  ;;  %2509 = vmatprep.subr.bf16.mxu0 %v6533_v55  ;;  %v6486_v54 = vcombine.low %v954_v41, %v958_v42  ;;  %v6351_v55 = vcombine.high %v818_v47, %v822_v48  ;;  %v6479_v56 = vcombine.high %v946_v50, %v950_v52  ;;  %v898_v40 = vld [vmem:[#allocation9 + $0x390] sm:$0xff] }
 0x24a   :  { %v902_v41 = vld [vmem:[#allocation9 + $0x3b0] sm:$0xff] }
 0x24b   :  { %v1026_v42 = vld [vmem:[#allocation9 + $0x790] sm:$0xff] }
 0x24c   :  { %2469 = vmatpush2.bf16.msra.mxu1 %v6404_v60  ;;  %2510 = vmatpush2.bf16.msra.mxu0 %v6532_v61  ;;  %v942_v60 = vld [vmem:[#allocation9 + $0x4f0] sm:$0xff]  ;;  %v6350_v61 = vcombine.low %v818_v47, %v822_v48 }
 0x24d   :  { %2470 = vmatprep.subr.bf16.mxu1 %v6397_v62  ;;  %2511 = vmatprep.subr.bf16.mxu0 %v6525_v63  ;;  %v6478_v62 = vcombine.low %v946_v50, %v950_v52  ;;  %v6343_v63 = vcombine.high %v810_v57, %v814_v58  ;;  %v6471_v0 = vcombine.high %v938_v59, %v942_v60  ;;  %v890_v48 = vld [vmem:[#allocation9 + $0x350] sm:$0xff] }
 0x24e   :  { %v894_v50 = vld [vmem:[#allocation9 + $0x370] sm:$0xff] }
 0x24f   :  { %v1018_v52 = vld [vmem:[#allocation9 + $0x750] sm:$0xff] }
 0x250   :  { %2471 = vmatpush2.bf16.msra.mxu1 %v6396_v4  ;;  %2512 = vmatpush2.bf16.msra.mxu0 %v6524_v5  ;;  %v934_v4 = vld [vmem:[#allocation9 + $0x4b0] sm:$0xff]  ;;  %v6342_v5 = vcombine.low %v810_v57, %v814_v58 }
 0x251   :  { %2472 = vmatprep.subr.bf16.mxu1 %v6389_v6  ;;  %2513 = vmatprep.subr.bf16.mxu0 %v6517_v7  ;;  %v6470_v6 = vcombine.low %v938_v59, %v942_v60  ;;  %v6335_v7 = vcombine.high %v802_v1, %v806_v2  ;;  %v6463_v8 = vcombine.high %v930_v3, %v934_v4  ;;  %v882_v58 = vld [vmem:[#allocation9 + $0x310] sm:$0xff] }
 0x252   :  { %v886_v59 = vld [vmem:[#allocation9 + $0x330] sm:$0xff] }
 0x253   :  { %v1010_v60 = vld [vmem:[#allocation9 + $0x710] sm:$0xff] }
 0x254   :  { %2473 = vmatpush2.bf16.msra.mxu1 %v6388_v16  ;;  %2514 = vmatpush2.bf16.msra.mxu0 %v6516_v17  ;;  %v926_v16 = vld [vmem:[#allocation9 + $0x470] sm:$0xff]  ;;  %v6334_v17 = vcombine.low %v802_v1, %v806_v2 }
 0x255   :  { %2474 = vmatprep.subr.bf16.mxu1 %v6381_v18  ;;  %2515 = vmatprep.subr.bf16.mxu0 %v6509_v19  ;;  %v6462_v18 = vcombine.low %v930_v3, %v934_v4  ;;  %v6327_v19 = vcombine.high %v794_v9, %v798_v10  ;;  %v6455_v20 = vcombine.high %v922_v11, %v926_v16  ;;  %v874_v2 = vld [vmem:[#allocation9 + $0x2d0] sm:$0xff] }
 0x256   :  { %v878_v3 = vld [vmem:[#allocation9 + $0x2f0] sm:$0xff] }
 0x257   :  { %v1002_v4 = vld [vmem:[#allocation9 + $0x6d0] sm:$0xff] }
 0x258   :  { %2475 = vmatpush2.bf16.msra.mxu1 %v6380_v24  ;;  %2516 = vmatpush2.bf16.msra.mxu0 %v6508_v25  ;;  %v918_v24 = vld [vmem:[#allocation9 + $0x430] sm:$0xff]  ;;  %v6326_v25 = vcombine.low %v794_v9, %v798_v10 }
 0x259   :  { %2526 = vmatprep.subr.bf16.mxu1 %v6375_v26  ;;  %2567 = vmatprep.subr.bf16.mxu0 %v6503_v28  ;;  %v6454_v26 = vcombine.low %v922_v11, %v926_v16  ;;  %v6319_v28 = vcombine.high %v786_v21, %v790_v22  ;;  %v6447_v31 = vcombine.high %v914_v23, %v918_v24  ;;  %v866_v10 = vld [vmem:[#allocation9 + $0x290] sm:$0xff] }
 0x25a   :  { %v870_v11 = vld [vmem:[#allocation9 + $0x2b0] sm:$0xff] }
 0x25b   :  { %2477 = vmatmul.mubr.bf16.vlgmr.msra.gmra.mxu1 %v8186_v14  ;;  %2518 = vmatmul.mubr.bf16.vlgmr.msra.gmra.mxu0 %v8188_v15  ;;  %v994_v16 = vld [vmem:[#allocation9 + $0x690] sm:$0xff] }
 0x25c   :  { %2527 = vmatpush1.bf16.msra.mxu1 %v6374_v35  ;;  %2558 = vmatprep.mubr.bf16.mxu1 %v8182_v12  ;;  %v1038_v35 = vld [vmem:[#allocation9 + $0x7f0] sm:$0xff] }
 0x25d   :  { %2568 = vmatpush1.bf16.msra.mxu0 %v6502_v36  ;;  %2599 = vmatprep.mubr.bf16.mxu0 %v8184_v13  ;;  %v6318_v36 = vcombine.low %v786_v21, %v790_v22  ;;  %v6567_v39 = vcombine.high %v1034_v34, %v1038_v35  ;;  %v858_v22 = vld [vmem:[#allocation9 + $0x250] sm:$0xff] }
 0x25e   :  { %2528 = vmatprep.subr.bf16.mxu1 %v6367_v37  ;;  %2569 = vmatprep.subr.bf16.mxu0 %v6495_v38  ;;  %v6446_v37 = vcombine.low %v914_v23, %v918_v24  ;;  %v6439_v38 = vcombine.high %v906_v32, %v910_v33  ;;  %v862_v23 = vld [vmem:[#allocation9 + $0x270] sm:$0xff] }
 0x25f   :  { %v986_v24 = vld [vmem:[#allocation9 + $0x650] sm:$0xff] }
 0x260   :  { %2529 = vmatpush1.bf16.msra.mxu1 %v6366_v43  ;;  %v1030_v43 = vld [vmem:[#allocation9 + $0x7b0] sm:$0xff] }
 0x261   :  { %2570 = vmatpush1.bf16.msra.mxu0 %v6494_v44  ;;  %2530 = vmatprep.subr.bf16.mxu1 %v6359_v45  ;;  %v6438_v44 = vcombine.low %v906_v32, %v910_v33  ;;  %v6566_v45 = vcombine.low %v1034_v34, %v1038_v35  ;;  %v6559_v47 = vcombine.high %v1026_v42, %v1030_v43  ;;  %v850_v33 = vld [vmem:[#allocation9 + $0x210] sm:$0xff] }
 0x262   :  { %2571 = vmatprep.subr.bf16.mxu0 %v6487_v46  ;;  %v6431_v46 = vcombine.high %v898_v40, %v902_v41  ;;  %v854_v34 = vld [vmem:[#allocation9 + $0x230] sm:$0xff] }
 0x263   :  { %v978_v35 = vld [vmem:[#allocation9 + $0x610] sm:$0xff] }
 0x264   :  { %2531 = vmatpush1.bf16.msra.mxu1 %v6358_v53  ;;  %v1022_v53 = vld [vmem:[#allocation9 + $0x770] sm:$0xff] }
 0x265   :  { %2572 = vmatpush1.bf16.msra.mxu0 %v6486_v54  ;;  %2532 = vmatprep.subr.bf16.mxu1 %v6351_v55  ;;  %v6430_v54 = vcombine.low %v898_v40, %v902_v41  ;;  %v6558_v55 = vcombine.low %v1026_v42, %v1030_v43  ;;  %v6551_v57 = vcombine.high %v1018_v52, %v1022_v53  ;;  %v843_v41 = vld [vmem:[#allocation9 + $0x1d8] sm:$0xff] }
 0x266   :  { %2573 = vmatprep.subr.bf16.mxu0 %v6479_v56  ;;  %v6423_v56 = vcombine.high %v890_v48, %v894_v50  ;;  %v847_v42 = vld [vmem:[#allocation9 + $0x1f8] sm:$0xff] }
 0x267   :  { %v971_v43 = vld [vmem:[#allocation9 + $0x5d8] sm:$0xff] }
 0x268   :  { %2533 = vmatpush1.bf16.msra.mxu1 %v6350_v61  ;;  %v1014_v61 = vld [vmem:[#allocation9 + $0x730] sm:$0xff] }
 0x269   :  { %2574 = vmatpush1.bf16.msra.mxu0 %v6478_v62  ;;  %2534 = vmatprep.subr.bf16.mxu1 %v6343_v63  ;;  %v6422_v62 = vcombine.low %v890_v48, %v894_v50  ;;  %v6550_v63 = vcombine.low %v1018_v52, %v1022_v53  ;;  %v6543_v1 = vcombine.high %v1010_v60, %v1014_v61  ;;  %v835_v50 = vld [vmem:[#allocation9 + $0x198] sm:$0xff] }
 0x26a   :  { %2575 = vmatprep.subr.bf16.mxu0 %v6471_v0  ;;  %v6415_v0 = vcombine.high %v882_v58, %v886_v59  ;;  %v839_v52 = vld [vmem:[#allocation9 + $0x1b8] sm:$0xff]  ;;  %v6376_v53 = vcombine.low %v843_v41, %v847_v42 }
 0x26c   :  { %2535 = vmatpush1.bf16.msra.mxu1 %v6342_v5  ;;  %v1006_v5 = vld [vmem:[#allocation9 + $0x6f0] sm:$0xff] }
 0x26d   :  { %2576 = vmatpush1.bf16.msra.mxu0 %v6470_v6  ;;  %2536 = vmatprep.subr.bf16.mxu1 %v6335_v7  ;;  %v6414_v6 = vcombine.low %v882_v58, %v886_v59  ;;  %v6542_v7 = vcombine.low %v1010_v60, %v1014_v61  ;;  %v6535_v9 = vcombine.high %v1002_v4, %v1006_v5  ;;  %v827_v58 = vld [vmem:[#allocation9 + $0x158] sm:$0xff] }
 0x26e   :  { %2577 = vmatprep.subr.bf16.mxu0 %v6463_v8  ;;  %v6407_v8 = vcombine.high %v874_v2, %v878_v3  ;;  %v831_v59 = vld [vmem:[#allocation9 + $0x178] sm:$0xff] }
 0x26f   :  { %v955_v61 = vld [vmem:[#allocation9 + $0x558] sm:$0xff] }
 0x270   :  { %2537 = vmatpush1.bf16.msra.mxu1 %v6334_v17  ;;  %v998_v17 = vld [vmem:[#allocation9 + $0x6b0] sm:$0xff] }
 0x271   :  { %2578 = vmatpush1.bf16.msra.mxu0 %v6462_v18  ;;  %2538 = vmatprep.subr.bf16.mxu1 %v6327_v19  ;;  %v6406_v18 = vcombine.low %v874_v2, %v878_v3  ;;  %v6534_v19 = vcombine.low %v1002_v4, %v1006_v5  ;;  %v6527_v21 = vcombine.high %v994_v16, %v998_v17  ;;  %v819_v3 = vld [vmem:[#allocation9 + $0x118] sm:$0xff] }
 0x272   :  { %2579 = vmatprep.subr.bf16.mxu0 %v6455_v20  ;;  %v6399_v20 = vcombine.high %v866_v10, %v870_v11  ;;  %v823_v4 = vld [vmem:[#allocation9 + $0x138] sm:$0xff] }
 0x273   :  { %v947_v5 = vld [vmem:[#allocation9 + $0x518] sm:$0xff] }
 0x274   :  { %2539 = vmatpush1.bf16.msra.mxu1 %v6326_v25  ;;  %v990_v25 = vld [vmem:[#allocation9 + $0x670] sm:$0xff] }
 0x275   :  { %2580 = vmatpush1.bf16.msra.mxu0 %v6454_v26  ;;  %2540 = vmatprep.subr.bf16.mxu1 %v6319_v28  ;;  %v6398_v26 = vcombine.low %v866_v10, %v870_v11  ;;  %v6526_v28 = vcombine.low %v994_v16, %v998_v17  ;;  %v6519_v32 = vcombine.high %v986_v24, %v990_v25  ;;  %v811_v10 = vld [vmem:[#allocation9 + $0xd8] sm:$0xff] }
 0x276   :  { %2581 = vmatprep.subr.bf16.mxu0 %v6447_v31  ;;  %v6391_v31 = vcombine.high %v858_v22, %v862_v23  ;;  %v815_v11 = vld [vmem:[#allocation9 + $0xf8] sm:$0xff] }
 0x277   :  { %v939_v16 = vld [vmem:[#allocation9 + $0x4d8] sm:$0xff] }
 0x278   :  { %2541 = vmatpush1.bf16.msra.mxu1 %v6318_v36  ;;  %v982_v36 = vld [vmem:[#allocation9 + $0x630] sm:$0xff]  ;;  %v943_v17 = vld [vmem:[#allocation9 + $0x4f8] sm:$0xff] }
 0x279   :  { %2582 = vmatpush1.bf16.msra.mxu0 %v6446_v37  ;;  %2542 = vmatprep.subr.bf16.mxu1 %v6439_v38  ;;  %v6390_v37 = vcombine.low %v858_v22, %v862_v23  ;;  %v6518_v38 = vcombine.low %v986_v24, %v990_v25  ;;  %v6511_v40 = vcombine.high %v978_v35, %v982_v36  ;;  %v807_v22 = vld [vmem:[#allocation9 + $0xb8] sm:$0xff] }
 0x27a   :  { %2583 = vmatprep.subr.bf16.mxu0 %v6567_v39  ;;  %v6383_v39 = vcombine.high %v850_v33, %v854_v34  ;;  %v931_v23 = vld [vmem:[#allocation9 + $0x498] sm:$0xff]  ;;  %v6344_v25 = vcombine.low %v811_v10, %v815_v11 }
 0x27b   :  { %v935_v24 = vld [vmem:[#allocation9 + $0x4b8] sm:$0xff] }
 0x27c   :  { %2543 = vmatpush2.bf16.msra.mxu1 %v6438_v44  ;;  %v975_v44 = vld [vmem:[#allocation9 + $0x5f8] sm:$0xff] }
 0x27d   :  { %2584 = vmatpush2.bf16.msra.mxu0 %v6566_v45  ;;  %2544 = vmatprep.subr.bf16.mxu1 %v6431_v46  ;;  %v6382_v45 = vcombine.low %v850_v33, %v854_v34  ;;  %v6510_v46 = vcombine.low %v978_v35, %v982_v36  ;;  %v6505_v48 = vcombine.high %v971_v43, %v975_v44  ;;  %v799_v33 = vld [vmem:[#allocation9 + $0x78] sm:$0xff] }
 0x27e   :  { %2585 = vmatprep.subr.bf16.mxu0 %v6559_v47  ;;  %v6377_v47 = vcombine.high %v843_v41, %v847_v42  ;;  %v923_v34 = vld [vmem:[#allocation9 + $0x458] sm:$0xff] }
 0x27f   :  { %v927_v35 = vld [vmem:[#allocation9 + $0x478] sm:$0xff] }
 0x280   :  { %2545 = vmatpush2.bf16.msra.mxu1 %v6430_v54  ;;  %v963_v54 = vld [vmem:[#allocation9 + $0x598] sm:$0xff] }
 0x281   :  { %2586 = vmatpush2.bf16.msra.mxu0 %v6558_v55  ;;  %2546 = vmatprep.subr.bf16.mxu1 %v6423_v56  ;;  %v967_v55 = vld [vmem:[#allocation9 + $0x5b8] sm:$0xff]  ;;  %v6504_v56 = vcombine.low %v971_v43, %v975_v44 }
 0x282   :  { %2587 = vmatprep.subr.bf16.mxu0 %v6551_v57  ;;  %v6369_v57 = vcombine.high %v835_v50, %v839_v52  ;;  %v6497_v60 = vcombine.high %v963_v54, %v967_v55  ;;  %v791_v41 = vld [vmem:[#allocation9 + $0x38] sm:$0xff] }
 0x283   :  { %v915_v42 = vld [vmem:[#allocation9 + $0x418] sm:$0xff] }
 0x284   :  { %2547 = vmatpush2.bf16.msra.mxu1 %v6422_v62  ;;  %v959_v62 = vld [vmem:[#allocation9 + $0x578] sm:$0xff] }
 0x285   :  { %2588 = vmatpush2.bf16.msra.mxu0 %v6550_v63  ;;  %2548 = vmatprep.subr.bf16.mxu1 %v6415_v0  ;;  %v6368_v63 = vcombine.low %v835_v50, %v839_v52  ;;  %v6496_v0 = vcombine.low %v963_v54, %v967_v55  ;;  %v6489_v2 = vcombine.high %v955_v61, %v959_v62  ;;  %v919_v43 = vld [vmem:[#allocation9 + $0x438] sm:$0xff] }
 0x286   :  { %2589 = vmatprep.subr.bf16.mxu0 %v6543_v1  ;;  %v6361_v1 = vcombine.high %v827_v58, %v831_v59  ;;  %v911_v50 = vld [vmem:[#allocation9 + $0x3f8] sm:$0xff]  ;;  %v6448_v55 = vcombine.low %v915_v42, %v919_v43 }
 0x287   :  { %v1035_v52 = vld [vmem:[#allocation9 + $0x7d8] sm:$0xff] }
 0x288   :  { %2549 = vmatpush2.bf16.msra.mxu1 %v6414_v6  ;;  %v951_v6 = vld [vmem:[#allocation9 + $0x538] sm:$0xff] }
 0x289   :  { %2590 = vmatpush2.bf16.msra.mxu0 %v6542_v7  ;;  %2550 = vmatprep.subr.bf16.mxu1 %v6407_v8  ;;  %v6360_v7 = vcombine.low %v827_v58, %v831_v59  ;;  %v6488_v8 = vcombine.low %v955_v61, %v959_v62  ;;  %v899_v58 = vld [vmem:[#allocation9 + $0x398] sm:$0xff] }
 0x28a   :  { %2591 = vmatprep.subr.bf16.mxu0 %v6535_v9  ;;  %v6353_v9 = vcombine.high %v819_v3, %v823_v4  ;;  %v903_v59 = vld [vmem:[#allocation9 + $0x3b8] sm:$0xff] }
 0x28b   :  { %v1031_v61 = vld [vmem:[#allocation9 + $0x7b8] sm:$0xff] }
 0x28c   :  { %2551 = vmatpush2.bf16.msra.mxu1 %v6406_v18  ;;  %v6480_v18 = vcombine.low %v947_v5, %v951_v6 }
 0x28d   :  { %2592 = vmatpush2.bf16.msra.mxu0 %v6534_v19  ;;  %2552 = vmatprep.subr.bf16.mxu1 %v6399_v20  ;;  %v6345_v19 = vcombine.high %v811_v10, %v815_v11  ;;  %v6473_v20 = vcombine.high %v939_v16, %v943_v17  ;;  %v887_v10 = vld [vmem:[#allocation9 + $0x338] sm:$0xff] }
 0x28e   :  { %2593 = vmatprep.subr.bf16.mxu0 %v6527_v21  ;;  %v803_v21 = vld [vmem:[#allocation9 + $0x98] sm:$0xff] }
 0x28f   :  { %v6336_v36 = vcombine.low %v803_v21, %v807_v22  ;;  %v1011_v11 = vld [vmem:[#allocation9 + $0x718] sm:$0xff] }
 0x290   :  { %2553 = vmatpush2.bf16.msra.mxu1 %v6398_v26  ;;  %v6472_v26 = vcombine.low %v939_v16, %v943_v17  ;;  %v1015_v16 = vld [vmem:[#allocation9 + $0x738] sm:$0xff] }
 0x291   :  { %2594 = vmatpush2.bf16.msra.mxu0 %v6526_v28  ;;  %2554 = vmatprep.subr.bf16.mxu1 %v6391_v31  ;;  %v6337_v28 = vcombine.high %v803_v21, %v807_v22  ;;  %v6465_v31 = vcombine.high %v931_v23, %v935_v24  ;;  %v879_v21 = vld [vmem:[#allocation9 + $0x2f8] sm:$0xff] }
 0x292   :  { %2595 = vmatprep.subr.bf16.mxu0 %v6519_v32  ;;  %v795_v32 = vld [vmem:[#allocation9 + $0x58] sm:$0xff] }
 0x293   :  { %v6328_v44 = vcombine.low %v795_v32, %v799_v33  ;;  %v1003_v22 = vld [vmem:[#allocation9 + $0x6d8] sm:$0xff] }
 0x294   :  { %2555 = vmatpush2.bf16.msra.mxu1 %v6390_v37  ;;  %v6464_v37 = vcombine.low %v931_v23, %v935_v24  ;;  %v1007_v23 = vld [vmem:[#allocation9 + $0x6f8] sm:$0xff] }
 0x295   :  { %2596 = vmatpush2.bf16.msra.mxu0 %v6518_v38  ;;  %2556 = vmatprep.subr.bf16.mxu1 %v6383_v39  ;;  %v6329_v38 = vcombine.high %v795_v32, %v799_v33  ;;  %v6457_v39 = vcombine.high %v923_v34, %v927_v35  ;;  %v871_v32 = vld [vmem:[#allocation9 + $0x2b8] sm:$0xff] }
 0x296   :  { %2597 = vmatprep.subr.bf16.mxu0 %v6511_v40  ;;  %v787_v40 = vld [vmem:[#allocation9 + $0x18] sm:$0xff] }
 0x297   :  { %v6320_v54 = vcombine.low %v787_v40, %v791_v41  ;;  %v995_v33 = vld [vmem:[#allocation9 + $0x698] sm:$0xff] }
 0x298   :  { %2557 = vmatpush2.bf16.msra.mxu1 %v6382_v45  ;;  %v6456_v45 = vcombine.low %v923_v34, %v927_v35  ;;  %v999_v34 = vld [vmem:[#allocation9 + $0x6b8] sm:$0xff] }
 0x299   :  { %2598 = vmatpush2.bf16.msra.mxu0 %v6510_v46  ;;  %2608 = vmatprep.subr.bf16.mxu1 %v6377_v47  ;;  %v6321_v46 = vcombine.high %v787_v40, %v791_v41  ;;  %v6449_v47 = vcombine.high %v915_v42, %v919_v43  ;;  %v863_v40 = vld [vmem:[#allocation9 + $0x278] sm:$0xff] }
 0x29a   :  { %2649 = vmatprep.subr.bf16.mxu0 %v6505_v48  ;;  %v907_v48 = vld [vmem:[#allocation9 + $0x3d8] sm:$0xff] }
 0x29b   :  { %2559 = vmatmul.mubr.bf16.vlgmr.msra.gmra.mxu1 %v8186_v14  ;;  %v6440_v62 = vcombine.low %v907_v48, %v911_v50  ;;  %v987_v41 = vld [vmem:[#allocation9 + $0x658] sm:$0xff] }
 0x29c   :  { %2600 = vmatmul.mubr.bf16.vlgmr.msra.gmra.mxu0 %v8188_v15  ;;  %2609 = vmatpush1.bf16.msra.mxu1 %v6376_v53  ;;  %v1039_v53 = vld [vmem:[#allocation9 + $0x7f8] sm:$0xff] }
 0x29d   :  { %2640 = vmatprep.mubr.bf16.mxu1 %v8182_v12  ;;  %2650 = vmatpush1.bf16.msra.mxu0 %v6504_v56  ;;  %v6481_v12 = vcombine.high %v947_v5, %v951_v6  ;;  %v6441_v56 = vcombine.high %v907_v48, %v911_v50  ;;  %v1023_v5 = vld [vmem:[#allocation9 + $0x778] sm:$0xff]  ;;  %v6432_v6 = vcombine.low %v899_v58, %v903_v59 }
 0x29e   :  { %2681 = vmatprep.mubr.bf16.mxu0 %v8184_v13  ;;  %2610 = vmatprep.subr.bf16.mxu1 %v6369_v57  ;;  %v6352_v13 = vcombine.low %v819_v3, %v823_v4  ;;  %v6569_v57 = vcombine.high %v1035_v52, %v1039_v53  ;;  %v895_v3 = vld [vmem:[#allocation9 + $0x378] sm:$0xff] }
 0x29f   :  { %2651 = vmatprep.subr.bf16.mxu0 %v6497_v60  ;;  %v1027_v60 = vld [vmem:[#allocation9 + $0x798] sm:$0xff] }
 0x2a0   :  { %2611 = vmatpush1.bf16.msra.mxu1 %v6368_v63  ;;  %v6568_v63 = vcombine.low %v1035_v52, %v1039_v53  ;;  %v1019_v4 = vld [vmem:[#allocation9 + $0x758] sm:$0xff] }
 0x2a1   :  { %2652 = vmatpush1.bf16.msra.mxu0 %v6496_v0  ;;  %2612 = vmatprep.subr.bf16.mxu1 %v6361_v1  ;;  %v6433_v0 = vcombine.high %v899_v58, %v903_v59  ;;  %v6561_v1 = vcombine.high %v1027_v60, %v1031_v61  ;;  %v991_v42 = vld [vmem:[#allocation9 + $0x678] sm:$0xff]  ;;  %v7245_v59 = vld [vmem:[#allocation12 + $0x18c] ss:$28 sps:$4 sm:$0xff]  }
 0x2a2   :  { %2653 = vmatprep.subr.bf16.mxu0 %v6489_v2  ;;  %v891_v2 = vld [vmem:[#allocation9 + $0x358] sm:$0xff] }
 0x2a3   :  { %v6424_v17 = vcombine.low %v891_v2, %v895_v3  ;;  %v855_v48 = vld [vmem:[#allocation9 + $0x238] sm:$0xff] }
 0x2a4   :  { %2613 = vmatpush1.bf16.msra.mxu1 %v6360_v7  ;;  %v6560_v7 = vcombine.low %v1027_v60, %v1031_v61  ;;  %v979_v50 = vld [vmem:[#allocation9 + $0x618] sm:$0xff]  ;;  %v7257_v60 = vld [vmem:[#allocation12 + $0x50c] ss:$28 sps:$4 sm:$0xff]  }
 0x2a5   :  { %2654 = vmatpush1.bf16.msra.mxu0 %v6488_v8  ;;  %2614 = vmatprep.subr.bf16.mxu1 %v6353_v9  ;;  %v6425_v8 = vcombine.high %v891_v2, %v895_v3  ;;  %v6553_v9 = vcombine.high %v1019_v4, %v1023_v5  ;;  %v983_v52 = vld [vmem:[#allocation9 + $0x638] sm:$0xff]  ;;  %v7243_v61 = vld [vmem:[#allocation12 + $0x188] ss:$28 sps:$4 sm:$0xff]  }
 0x2a6   :  { %2655 = vmatprep.subr.bf16.mxu0 %v6481_v12  ;;  %v883_v12 = vld [vmem:[#allocation9 + $0x318] sm:$0xff]  ;;  %v6512_v58 = vcombine.low %v979_v50, %v983_v52 }
 0x2a7   :  { %v6416_v24 = vcombine.low %v883_v12, %v887_v10  ;;  %v7263_v2 = vld [vmem:[#allocation12 + $0x4d4] ss:$28 sps:$4 sm:$0xff]  }
 0x2a8   :  { %2615 = vmatpush1.bf16.msra.mxu1 %v6352_v13  ;;  %v6552_v13 = vcombine.low %v1019_v4, %v1023_v5  ;;  %v7246_v5 = vld [vmem:[#allocation12 + $0x150] ss:$28 sps:$4 sm:$0xff]  }
 0x2a9   :  { %2656 = vmatpush1.bf16.msra.mxu0 %v6480_v18  ;;  %2616 = vmatprep.subr.bf16.mxu1 %v6345_v19  ;;  %v6417_v18 = vcombine.high %v883_v12, %v887_v10  ;;  %v6545_v19 = vcombine.high %v1011_v11, %v1015_v16  ;;  %v7269_v10 = vld [vmem:[#allocation12 + $0x49c] ss:$28 sps:$4 sm:$0xff]  }
 0x2aa   :  { %2657 = vmatprep.subr.bf16.mxu0 %v6473_v20  ;;  %v875_v20 = vld [vmem:[#allocation9 + $0x2d8] sm:$0xff] }
 0x2ab   :  { %v6408_v35 = vcombine.low %v875_v20, %v879_v21 }
 0x2ac   :  { %2617 = vmatpush1.bf16.msra.mxu1 %v6344_v25  ;;  %v6544_v25 = vcombine.low %v1011_v11, %v1015_v16 }
 0x2ad   :  { %2658 = vmatpush1.bf16.msra.mxu0 %v6472_v26  ;;  %2618 = vmatprep.subr.bf16.mxu1 %v6337_v28  ;;  %v6409_v26 = vcombine.high %v875_v20, %v879_v21  ;;  %v6537_v28 = vcombine.high %v1003_v22, %v1007_v23  ;;  %v7275_v21 = vld [vmem:[#allocation12 + $0x464] ss:$28 sps:$4 sm:$0xff]  }
 0x2ae   :  { %2659 = vmatprep.subr.bf16.mxu0 %v6465_v31  ;;  %v867_v31 = vld [vmem:[#allocation9 + $0x298] sm:$0xff] }
 0x2af   :  { %v6400_v43 = vcombine.low %v867_v31, %v871_v32 }
 0x2b0   :  { %2619 = vmatpush1.bf16.msra.mxu1 %v6336_v36  ;;  %v6536_v36 = vcombine.low %v1003_v22, %v1007_v23  ;;  %v7252_v23 = vld [vmem:[#allocation12 + $0xe0] ss:$28 sps:$4 sm:$0xff]  }
 0x2b1   :  { %2660 = vmatpush1.bf16.msra.mxu0 %v6464_v37  ;;  %2620 = vmatprep.subr.bf16.mxu1 %v6329_v38  ;;  %v6401_v37 = vcombine.high %v867_v31, %v871_v32  ;;  %v6529_v38 = vcombine.high %v995_v33, %v999_v34  ;;  %v7266_v31 = vld [vmem:[#allocation12 + $0x74] ss:$28 sps:$4 sm:$0xff]   ;;  %v7279_v32 = vld [vmem:[#allocation12 + $0x428] ss:$28 sps:$4 sm:$0xff]  }
 0x2b2   :  { %2661 = vmatprep.subr.bf16.mxu0 %v6457_v39  ;;  %v859_v39 = vld [vmem:[#allocation9 + $0x258] sm:$0xff] }
 0x2b3   :  { %v6392_v53 = vcombine.low %v859_v39, %v863_v40 }
 0x2b4   :  { %2621 = vmatpush1.bf16.msra.mxu1 %v6328_v44  ;;  %v6528_v44 = vcombine.low %v995_v33, %v999_v34  ;;  %v7287_v33 = vld [vmem:[#allocation12 + $0x3f4] ss:$28 sps:$4 sm:$0xff]  }
 0x2b5   :  { %2662 = vmatpush1.bf16.msra.mxu0 %v6456_v45  ;;  %2622 = vmatprep.subr.bf16.mxu1 %v6321_v46  ;;  %v6393_v45 = vcombine.high %v859_v39, %v863_v40  ;;  %v6521_v46 = vcombine.high %v987_v41, %v991_v42  ;;  %v7264_v34 = vld [vmem:[#allocation12 + $0x70] ss:$28 sps:$4 sm:$0xff]   ;;  %v7278_v39 = vld [vmem:[#allocation12 + $0x4] ss:$28 sps:$4 sm:$0xff]   ;;  %v7291_v40 = vld [vmem:[#allocation12 + $0x3b8] ss:$28 sps:$4 sm:$0xff]  }
 0x2b6   :  { %2663 = vmatprep.subr.bf16.mxu0 %v6449_v47  ;;  %v851_v47 = vld [vmem:[#allocation9 + $0x218] sm:$0xff] }
 0x2b8   :  { %2623 = vmatpush1.bf16.msra.mxu1 %v6320_v54  ;;  %v6520_v54 = vcombine.low %v987_v41, %v991_v42  ;;  %v7299_v41 = vld [vmem:[#allocation12 + $0x384] ss:$28 sps:$4 sm:$0xff]  }
 0x2b9   :  { %2664 = vmatpush1.bf16.msra.mxu0 %v6448_v55  ;;  %2624 = vmatprep.subr.bf16.mxu1 %v6441_v56  ;;  %v6385_v55 = vcombine.high %v851_v47, %v855_v48  ;;  %v6513_v56 = vcombine.high %v979_v50, %v983_v52  ;;  %v7276_v42 = vld [vmem:[#allocation12] ss:$28 sps:$4 sm:$0xff]   ;;  %v7311_v50 = vld [vmem:[#allocation12 + $0x694] ss:$28 sps:$4 sm:$0xff]  }
 0x2ba   :  { %2665 = vmatprep.subr.bf16.mxu0 %v6569_v57  ;;  %v6384_v57 = vcombine.low %v851_v47, %v855_v48  ;;  %v7290_v47 = vld [vmem:[#allocation12 + $0x314] ss:$28 sps:$4 sm:$0xff]   ;;  %v7303_v48 = vld [vmem:[#allocation12 + $0x6c8] ss:$28 sps:$4 sm:$0xff]  }
 0x2bb   :  { %v7288_v52 = vld [vmem:[#allocation12 + $0x310] ss:$28 sps:$4 sm:$0xff]  }
 0x2bc   :  { %2625 = vmatpush2.bf16.msra.mxu1 %v6440_v62  ;;  %v8204_v62 = vld [vmem:[#allocation10] sm:$0xff] }
 0x2bd   :  { %2666 = vmatpush2.bf16.msra.mxu0 %v6568_v63  ;;  %2626 = vmatprep.subr.bf16.mxu1 %v6433_v0  ;;  %v7248_v63 = vld [vmem:[#allocation12 + $0x154] ss:$28 sps:$4 sm:$0xff]   ;;  %v7255_v0 = vld [vmem:[#allocation12 + $0x508] ss:$28 sps:$4 sm:$0xff]  }
 0x2be   :  { %2667 = vmatprep.subr.bf16.mxu0 %v6561_v1  ;;  %v1049_v1 = vrot.slane %v8204_v62, %v8168_v30 }
 0x2c0   :  { %2627 = vmatpush2.bf16.msra.mxu1 %v6432_v6 }
 0x2c1   :  { %2668 = vmatpush2.bf16.msra.mxu0 %v6560_v7  ;;  %2628 = vmatprep.subr.bf16.mxu1 %v6425_v8  ;;  %v7251_v8 = vld [vmem:[#allocation12 + $0x11c] ss:$28 sps:$4 sm:$0xff]  }
 0x2c2   :  { %2669 = vmatprep.subr.bf16.mxu0 %v6553_v9  ;;  %v7261_v9 = vld [vmem:[#allocation12 + $0x4d0] ss:$28 sps:$4 sm:$0xff]  }
 0x2c4   :  { %2629 = vmatpush2.bf16.msra.mxu1 %v6424_v17  ;;  %v7249_v17 = vld [vmem:[#allocation12 + $0x118] ss:$28 sps:$4 sm:$0xff]  }
 0x2c5   :  { %2670 = vmatpush2.bf16.msra.mxu0 %v6552_v13  ;;  %2630 = vmatprep.subr.bf16.mxu1 %v6417_v18 }
 0x2c6   :  { %2671 = vmatprep.subr.bf16.mxu0 %v6545_v19  ;;  %v7267_v19 = vld [vmem:[#allocation12 + $0x498] ss:$28 sps:$4 sm:$0xff]  }
 0x2c8   :  { %2631 = vmatpush2.bf16.msra.mxu1 %v6416_v24  ;;  %v7260_v24 = vld [vmem:[#allocation12 + $0xac] ss:$28 sps:$4 sm:$0xff]  }
 0x2c9   :  { %2672 = vmatpush2.bf16.msra.mxu0 %v6544_v25  ;;  %2632 = vmatprep.subr.bf16.mxu1 %v6409_v26  ;;  %v7273_v25 = vld [vmem:[#allocation12 + $0x460] ss:$28 sps:$4 sm:$0xff]   ;;  %v7281_v26 = vld [vmem:[#allocation12 + $0x42c] ss:$28 sps:$4 sm:$0xff]  }
 0x2ca   :  { %2673 = vmatprep.subr.bf16.mxu0 %v6537_v28  ;;  %v7258_v28 = vld [vmem:[#allocation12 + $0xa8] ss:$28 sps:$4 sm:$0xff]  }
 0x2cc   :  { %2633 = vmatpush2.bf16.msra.mxu1 %v6408_v35  ;;  %v7272_v35 = vld [vmem:[#allocation12 + $0x3c] ss:$28 sps:$4 sm:$0xff]  }
 0x2cd   :  { %2674 = vmatpush2.bf16.msra.mxu0 %v6536_v36  ;;  %2634 = vmatprep.subr.bf16.mxu1 %v6401_v37  ;;  %v7285_v36 = vld [vmem:[#allocation12 + $0x3f0] ss:$28 sps:$4 sm:$0xff]   ;;  %v7293_v37 = vld [vmem:[#allocation12 + $0x3bc] ss:$28 sps:$4 sm:$0xff]  }
 0x2ce   :  { %2675 = vmatprep.subr.bf16.mxu0 %v6529_v38  ;;  %v7270_v38 = vld [vmem:[#allocation12 + $0x38] ss:$28 sps:$4 sm:$0xff]  }
 0x2d0   :  { %2635 = vmatpush2.bf16.msra.mxu1 %v6400_v43  ;;  %v7284_v43 = vld [vmem:[#allocation12 + $0x34c] ss:$28 sps:$4 sm:$0xff]  }
 0x2d1   :  { %2676 = vmatpush2.bf16.msra.mxu0 %v6528_v44  ;;  %2636 = vmatprep.subr.bf16.mxu1 %v6393_v45  ;;  %v7297_v44 = vld [vmem:[#allocation12 + $0x380] ss:$28 sps:$4 sm:$0xff]   ;;  %v7305_v45 = vld [vmem:[#allocation12 + $0x6cc] ss:$28 sps:$4 sm:$0xff]  }
 0x2d2   :  { %2677 = vmatprep.subr.bf16.mxu0 %v6521_v46  ;;  %v7282_v46 = vld [vmem:[#allocation12 + $0x348] ss:$28 sps:$4 sm:$0xff]  }
 0x2d4   :  { %2637 = vmatpush2.bf16.msra.mxu1 %v6392_v53  ;;  %v7296_v53 = vld [vmem:[#allocation12 + $0x2dc] ss:$28 sps:$4 sm:$0xff]  }
 0x2d5   :  { %2678 = vmatpush2.bf16.msra.mxu0 %v6520_v54  ;;  %2638 = vmatprep.subr.bf16.mxu1 %v6385_v55  ;;  %v7309_v54 = vld [vmem:[#allocation12 + $0x690] ss:$28 sps:$4 sm:$0xff]   ;;  %v7317_v55 = vld [vmem:[#allocation12 + $0x65c] ss:$28 sps:$4 sm:$0xff]  }
 0x2d6   :  { %2679 = vmatprep.subr.bf16.mxu0 %v6513_v56  ;;  %v7294_v56 = vld [vmem:[#allocation12 + $0x2d8] ss:$28 sps:$4 sm:$0xff]  }
 0x2d8   :  { %2639 = vmatpush2.bf16.msra.mxu1 %v6384_v57  ;;  %v7302_v57 = vld [vmem:[#allocation12 + $0x2a4] ss:$28 sps:$4 sm:$0xff]  }
 0x2d9   :  { %2680 = vmatpush2.bf16.msra.mxu0 %v6512_v58  ;;  %5559 = vmatprep.subr.bf16.mxu1 %v7245_v59  ;;  %v7315_v58 = vld [vmem:[#allocation12 + $0x658] ss:$28 sps:$4 sm:$0xff]   ;;  %v7323_v59 = vld [vmem:[#allocation12 + $0x624] ss:$28 sps:$4 sm:$0xff]  }
 0x2da   :  { %5600 = vmatprep.subr.bf16.mxu0 %v7257_v60  ;;  %v7300_v60 = vld [vmem:[#allocation12 + $0x2a0] ss:$28 sps:$4 sm:$0xff]  }
 0x2db   :  { %2641 = vmatmul.mubr.bf16.vlgmr.msra.gmra.mxu1 %v8186_v14  ;;  %v8209_v3 = vpop.f32.mrf.mxu1  ;;  %v8211_v4 = vpop.f32.mrf.mxu0 }
 0x2dc   :  { %2682 = vmatmul.mubr.bf16.vlgmr.msra.gmra.mxu0 %v8188_v15  ;;  %5560 = vmatpush1.bf16.msra.mxu1 %v7243_v61  ;;  %v7254_v15 = vld [vmem:[#allocation12 + $0xe4] ss:$28 sps:$4 sm:$0xff]   ;;  %v7308_v61 = vld [vmem:[#allocation12 + $0x26c] ss:$28 sps:$4 sm:$0xff]  }
 0x2dd   :  { %v2398_v6 = vpop.f32.mrf.mxu1  ;;  %v2439_v7 = vpop.f32.mrf.mxu0  ;;  %5561 = vmatprep.subr.bf16.mxu1 %v7248_v63  ;;  %5601 = vmatpush1.bf16.msra.mxu0 %v7255_v0  ;;  %v7321_v63 = vld [vmem:[#allocation12 + $0x620] ss:$28 sps:$4 sm:$0xff]   ;;  %v7329_v0 = vld [vmem:[#allocation12 + $0x5ec] ss:$28 sps:$4 sm:$0xff]  }
 0x2de   :  { %v2399_v12 = vadd.f32 %v2398_v6, %v1049_v1  ;;  %5602 = vmatprep.subr.bf16.mxu0 %v7263_v2  ;;  %v7306_v1 = vld [vmem:[#allocation12 + $0x268] ss:$28 sps:$4 sm:$0xff]   ;;  %v1045_v2 = vrot.slane %v8204_v62, %v8165_v29 }
 0x2df   :  { %v2400_v11 = vpop.f32.mrf.mxu1  ;;  %v2441_v16 = vpop.f32.mrf.mxu0  ;;  %v7327_v6 = vld [vmem:[#allocation12 + $0x5e8] ss:$28 sps:$4 sm:$0xff]  }
 0x2e0   :  { %v2440_v14 = vadd.f32 %v2439_v7, %v2399_v12  ;;  %5562 = vmatpush1.bf16.msra.mxu1 %v7246_v5  ;;  %v7314_v5 = vld [vmem:[#allocation12 + $0x234] ss:$28 sps:$4 sm:$0xff]   ;;  %v7320_v12 = vld [vmem:[#allocation12 + $0x1fc] ss:$28 sps:$4 sm:$0xff]  }
 0x2e1   :  { %v2401_v13 = vpop.f32.mrf.mxu1  ;;  %v2442_v18 = vpop.f32.mrf.mxu0  ;;  %5563 = vmatprep.subr.bf16.mxu1 %v7251_v8  ;;  %5603 = vmatpush1.bf16.msra.mxu0 %v7261_v9  ;;  %v7332_v7 = vld [vmem:[#allocation12 + $0x5b4] ss:$28 sps:$4 sm:$0xff]   ;;  %v2397_v9 = vadd.f32 %v8209_v3, %v1045_v2  ;;  %v7335_v11 = vld [vmem:[#allocation12 + $0x57c] ss:$28 sps:$4 sm:$0xff]  }
 0x2e2   :  { %v2691_v20 = vmax.f32 %v2440_v14, 0.0  ;;  %5604 = vmatprep.subr.bf16.mxu0 %v7269_v10  ;;  %v7312_v8 = vld [vmem:[#allocation12 + $0x230] ss:$28 sps:$4 sm:$0xff]   ;;  %v7318_v16 = vld [vmem:[#allocation12 + $0x1f8] ss:$28 sps:$4 sm:$0xff]  }
 0x2e3   :  { %v7330_v10 = vld [vmem:[#allocation12 + $0x5b0] ss:$28 sps:$4 sm:$0xff]   ;;  %v2438_v14 = vadd.f32 %v8211_v4, %v2397_v9  ;;  %v7333_v13 = vld [vmem:[#allocation12 + $0x578] ss:$28 sps:$4 sm:$0xff]   ;;  %v7338_v18 = vld [vmem:[#allocation12 + $0x544] ss:$28 sps:$4 sm:$0xff]  }
 0x2e4   :  { %v8214_v22 = vpack.c.bf16 %v2691_v20, %v2691_v20  ;;  %5564 = vmatpush1.bf16.msra.mxu1 %v7249_v17  ;;  %v7326_v17 = vld [vmem:[#allocation12 + $0x1c4] ss:$28 sps:$4 sm:$0xff]   ;;  %v7341_v20 = vld [vmem:[#allocation12 + $0x88c] ss:$28 sps:$4 sm:$0xff]  }
 0x2e5   :  { %5565 = vmatprep.subr.bf16.mxu1 %v7254_v15  ;;  %5605 = vmatpush1.bf16.msra.mxu0 %v7267_v19  ;;  %v7324_v15 = vld [vmem:[#allocation12 + $0x1c0] ss:$28 sps:$4 sm:$0xff]   ;;  %v2690_v19 = vmax.f32 %v2438_v14, 0.0  ;;  %v7339_v4 = vld [vmem:[#allocation12 + $0x888] ss:$28 sps:$4 sm:$0xff]  }
 0x2e6   :  { %5591 = vmatprep.mubr.bf16.mxu1 %v8214_v22  ;;  %5606 = vmatprep.subr.bf16.mxu0 %v7275_v21  ;;  %v7336_v3 = vld [vmem:[#allocation12 + $0x540] ss:$28 sps:$4 sm:$0xff]   ;;  %v7389_v21 = vld [vmem:[#allocation12 + $0xc0c] ss:$28 sps:$4 sm:$0xff]  }
 0x2e7   :  { %v7405_v2 = vld [vmem:[#allocation12 + $0xb60] ss:$28 sps:$4 sm:$0xff]   ;;  %v7365_v9 = vld [vmem:[#allocation12 + $0xa4c] ss:$28 sps:$4 sm:$0xff]  }
 0x2e8   :  { %5566 = vmatpush1.bf16.msra.mxu1 %v7252_v23  ;;  %v1053_v23 = vrot.slane %v8204_v62, %v8173_v49  ;;  %v7425_v14 = vld [vmem:[#allocation12 + $0xabc] ss:$28 sps:$4 sm:$0xff]  }
 0x2e9   :  { %5567 = vmatprep.subr.bf16.mxu1 %v7260_v24  ;;  %5607 = vmatpush1.bf16.msra.mxu0 %v7273_v25  ;;  %v8223_v24 = vpack.c.bf16 %v2690_v19, %v2690_v19  ;;  %v7344_v25 = vld [vmem:[#allocation12 + $0x854] ss:$28 sps:$4 sm:$0xff]  }
 0x2ea   :  { %5608 = vmatprep.subr.bf16.mxu0 %v7281_v26  ;;  %v1057_v26 = vrot.slane %v8204_v62, %v8176_v51  ;;  %v7369_v19 = vld [vmem:[#allocation12 + $0x9d8] ss:$28 sps:$4 sm:$0xff]  }
 0x2ec   :  { %5568 = vmatpush1.bf16.msra.mxu1 %v7258_v28 }
 0x2ed   :  { %5569 = vmatprep.subr.bf16.mxu1 %v7266_v31  ;;  %5609 = vmatpush1.bf16.msra.mxu0 %v7279_v32 }
 0x2ee   :  { %5610 = vmatprep.subr.bf16.mxu0 %v7287_v33  ;;  %v7342_v33 = vld [vmem:[#allocation12 + $0x850] ss:$28 sps:$4 sm:$0xff]  }
 0x2f0   :  { %5570 = vmatpush1.bf16.msra.mxu1 %v7264_v34 }
 0x2f1   :  { %5571 = vmatprep.subr.bf16.mxu1 %v7272_v35  ;;  %5611 = vmatpush1.bf16.msra.mxu0 %v7285_v36  ;;  %v7347_v36 = vld [vmem:[#allocation12 + $0x81c] ss:$28 sps:$4 sm:$0xff]  }
 0x2f2   :  { %5612 = vmatprep.subr.bf16.mxu0 %v7293_v37 }
 0x2f4   :  { %5572 = vmatpush1.bf16.msra.mxu1 %v7270_v38 }
 0x2f5   :  { %5573 = vmatprep.subr.bf16.mxu1 %v7278_v39  ;;  %5613 = vmatpush1.bf16.msra.mxu0 %v7291_v40 }
 0x2f6   :  { %5614 = vmatprep.subr.bf16.mxu0 %v7299_v41 }
 0x2f8   :  { %5574 = vmatpush1.bf16.msra.mxu1 %v7276_v42  ;;  %v7345_v42 = vld [vmem:[#allocation12 + $0x818] ss:$28 sps:$4 sm:$0xff]  }
 0x2f9   :  { %5575 = vmatprep.subr.bf16.mxu1 %v7284_v43  ;;  %5615 = vmatpush1.bf16.msra.mxu0 %v7297_v44 }
 0x2fa   :  { %5616 = vmatprep.subr.bf16.mxu0 %v7305_v45 }
 0x2fc   :  { %5576 = vmatpush2.bf16.msra.mxu1 %v7282_v46  ;;  %v7350_v46 = vld [vmem:[#allocation12 + $0x7e4] ss:$28 sps:$4 sm:$0xff]  }
 0x2fd   :  { %5577 = vmatprep.subr.bf16.mxu1 %v7290_v47  ;;  %5617 = vmatpush2.bf16.msra.mxu0 %v7303_v48 }
 0x2fe   :  { %5618 = vmatprep.subr.bf16.mxu0 %v7311_v50  ;;  %v7348_v50 = vld [vmem:[#allocation12 + $0x7e0] ss:$28 sps:$4 sm:$0xff]  }
 0x300   :  { %5578 = vmatpush2.bf16.msra.mxu1 %v7288_v52  ;;  %v7387_v52 = vld [vmem:[#allocation12 + $0xc08] ss:$28 sps:$4 sm:$0xff]  }
 0x301   :  { %5579 = vmatprep.subr.bf16.mxu1 %v7296_v53  ;;  %5619 = vmatpush2.bf16.msra.mxu0 %v7309_v54  ;;  %v7353_v54 = vld [vmem:[#allocation12 + $0x7ac] ss:$28 sps:$4 sm:$0xff]  }
 0x302   :  { %5620 = vmatprep.subr.bf16.mxu0 %v7317_v55  ;;  %v7395_v55 = vld [vmem:[#allocation12 + $0xbd4] ss:$28 sps:$4 sm:$0xff]  }
 0x304   :  { %5580 = vmatpush2.bf16.msra.mxu1 %v7294_v56  ;;  %v7351_v56 = vld [vmem:[#allocation12 + $0x7a8] ss:$28 sps:$4 sm:$0xff]  }
 0x305   :  { %5581 = vmatprep.subr.bf16.mxu1 %v7302_v57  ;;  %5621 = vmatpush2.bf16.msra.mxu0 %v7315_v58  ;;  %v7393_v57 = vld [vmem:[#allocation12 + $0xbd0] ss:$28 sps:$4 sm:$0xff]  }
 0x306   :  { %5622 = vmatprep.subr.bf16.mxu0 %v7323_v59  ;;  %v7356_v58 = vld [vmem:[#allocation12 + $0x774] ss:$28 sps:$4 sm:$0xff]   ;;  %v7401_v59 = vld [vmem:[#allocation12 + $0xb9c] ss:$28 sps:$4 sm:$0xff]  }
 0x308   :  { %5582 = vmatpush2.bf16.msra.mxu1 %v7300_v60  ;;  %v7354_v60 = vld [vmem:[#allocation12 + $0x770] ss:$28 sps:$4 sm:$0xff]  }
 0x309   :  { %5583 = vmatprep.subr.bf16.mxu1 %v7308_v61  ;;  %5623 = vmatpush2.bf16.msra.mxu0 %v7321_v63  ;;  %v7399_v61 = vld [vmem:[#allocation12 + $0xb98] ss:$28 sps:$4 sm:$0xff]  }
 0x30a   :  { %5624 = vmatprep.subr.bf16.mxu0 %v7329_v0  ;;  %v7359_v63 = vld [vmem:[#allocation12 + $0x73c] ss:$28 sps:$4 sm:$0xff]   ;;  %v7407_v0 = vld [vmem:[#allocation12 + $0xb64] ss:$28 sps:$4 sm:$0xff]  }
 0x30c   :  { %5584 = vmatpush2.bf16.msra.mxu1 %v7306_v1  ;;  %v7357_v1 = vld [vmem:[#allocation12 + $0x738] ss:$28 sps:$4 sm:$0xff]  }
 0x30d   :  { %5585 = vmatprep.subr.bf16.mxu1 %v7314_v5  ;;  %5625 = vmatpush2.bf16.msra.mxu0 %v7327_v6  ;;  %v7362_v5 = vld [vmem:[#allocation12 + $0x704] ss:$28 sps:$4 sm:$0xff]   ;;  %v7413_v6 = vld [vmem:[#allocation12 + $0xb2c] ss:$28 sps:$4 sm:$0xff]  }
 0x30e   :  { %5626 = vmatprep.subr.bf16.mxu0 %v7332_v7  ;;  %v7360_v7 = vld [vmem:[#allocation12 + $0x700] ss:$28 sps:$4 sm:$0xff]  }
 0x310   :  { %5586 = vmatpush2.bf16.msra.mxu1 %v7312_v8  ;;  %v7411_v8 = vld [vmem:[#allocation12 + $0xb28] ss:$28 sps:$4 sm:$0xff]  }
 0x311   :  { %5587 = vmatprep.subr.bf16.mxu1 %v7320_v12  ;;  %5627 = vmatpush2.bf16.msra.mxu0 %v7330_v10  ;;  %v7419_v12 = vld [vmem:[#allocation12 + $0xaf4] ss:$28 sps:$4 sm:$0xff]   ;;  %v7363_v10 = vld [vmem:[#allocation12 + $0xa48] ss:$28 sps:$4 sm:$0xff]  }
 0x312   :  { %5628 = vmatprep.subr.bf16.mxu0 %v7335_v11  ;;  %v7417_v11 = vld [vmem:[#allocation12 + $0xaf0] ss:$28 sps:$4 sm:$0xff]  }
 0x314   :  { %5588 = vmatpush2.bf16.msra.mxu1 %v7318_v16  ;;  %v7368_v16 = vld [vmem:[#allocation12 + $0xa14] ss:$28 sps:$4 sm:$0xff]  }
 0x315   :  { %5589 = vmatprep.subr.bf16.mxu1 %v7326_v17  ;;  %5629 = vmatpush2.bf16.msra.mxu0 %v7333_v13  ;;  %v7366_v17 = vld [vmem:[#allocation12 + $0xa10] ss:$28 sps:$4 sm:$0xff]   ;;  %v7423_v13 = vld [vmem:[#allocation12 + $0xab8] ss:$28 sps:$4 sm:$0xff]  }
 0x316   :  { %5630 = vmatprep.subr.bf16.mxu0 %v7338_v18  ;;  %v7371_v18 = vld [vmem:[#allocation12 + $0x9dc] ss:$28 sps:$4 sm:$0xff]  }
 0x318   :  { %5590 = vmatpush2.bf16.msra.mxu1 %v7324_v15  ;;  %v7431_v15 = vld [vmem:[#allocation12 + $0xa84] ss:$28 sps:$4 sm:$0xff]  }
 0x319   :  { %5631 = vmatpush2.bf16.msra.mxu0 %v7336_v3  ;;  %5641 = vmatprep.subr.bf16.mxu1 %v7341_v20  ;;  %v7429_v3 = vld [vmem:[#allocation12 + $0xa80] ss:$28 sps:$4 sm:$0xff]  }
 0x31a   :  { %5682 = vmatprep.subr.bf16.mxu0 %v7389_v21  ;;  %v7374_v20 = vld [vmem:[#allocation12 + $0x9a4] ss:$28 sps:$4 sm:$0xff]   ;;  %v7437_v21 = vld [vmem:[#allocation12 + $0xdcc] ss:$28 sps:$4 sm:$0xff]  }
 0x31b   :  { %v2478_v28 = vpop.f32.mrf.mxu1  ;;  %v2519_v31 = vpop.f32.mrf.mxu0  ;;  %5592 = vmatmul.mubr.bf16.vlgmr.msra.gmra.mxu1 %v8223_v24 }
 0x31c   :  { %v2479_v32 = vadd.f32 %v2478_v28, %v1053_v23  ;;  %5642 = vmatpush1.bf16.msra.mxu1 %v7339_v4  ;;  %v7372_v23 = vld [vmem:[#allocation12 + $0x9a0] ss:$28 sps:$4 sm:$0xff]   ;;  %v7435_v4 = vld [vmem:[#allocation12 + $0xdc8] ss:$28 sps:$4 sm:$0xff]  }
 0x31d   :  { %v2480_v34 = vpop.f32.mrf.mxu1  ;;  %v2521_v35 = vpop.f32.mrf.mxu0  ;;  %5643 = vmatprep.subr.bf16.mxu1 %v7344_v25  ;;  %v7377_v25 = vld [vmem:[#allocation12 + $0x96c] ss:$28 sps:$4 sm:$0xff]  }
 0x31e   :  { %v2520_v37 = vadd.f32 %v2519_v31, %v2479_v32  ;;  %v2481_v38 = vadd.f32 %v2480_v34, %v1057_v26  ;;  %v7443_v26 = vld [vmem:[#allocation12 + $0xd94] ss:$28 sps:$4 sm:$0xff]   ;;  %v7375_v28 = vld [vmem:[#allocation12 + $0x968] ss:$28 sps:$4 sm:$0xff]  }
 0x31f   :  { %v2482_v39 = vpop.f32.mrf.mxu1  ;;  %v2523_v40 = vpop.f32.mrf.mxu0  ;;  %v7441_v31 = vld [vmem:[#allocation12 + $0xd90] ss:$28 sps:$4 sm:$0xff]  }
 0x320   :  { %v2522_v41 = vadd.f32 %v2521_v35, %v2481_v38  ;;  %5644 = vmatpush1.bf16.msra.mxu1 %v7342_v33  ;;  %v2692_v43 = vmax.f32 %v2520_v37, 0.0  ;;  %v7380_v32 = vld [vmem:[#allocation12 + $0x934] ss:$28 sps:$4 sm:$0xff]   ;;  %v7449_v33 = vld [vmem:[#allocation12 + $0xd5c] ss:$28 sps:$4 sm:$0xff]  }
 0x321   :  { %v2483_v44 = vpop.f32.mrf.mxu1  ;;  %v2524_v45 = vpop.f32.mrf.mxu0  ;;  %5645 = vmatprep.subr.bf16.mxu1 %v7347_v36  ;;  %v7378_v34 = vld [vmem:[#allocation12 + $0x930] ss:$28 sps:$4 sm:$0xff]   ;;  %v7447_v35 = vld [vmem:[#allocation12 + $0xd58] ss:$28 sps:$4 sm:$0xff]   ;;  %v7455_v37 = vld [vmem:[#allocation12 + $0xd24] ss:$28 sps:$4 sm:$0xff]  }
 0x322   :  { %v2693_v47 = vmax.f32 %v2522_v41, 0.0  ;;  %v8230_v53 = vpack.c.bf16 %v2692_v43, %v2692_v43  ;;  %v7383_v36 = vld [vmem:[#allocation12 + $0x8fc] ss:$28 sps:$4 sm:$0xff]   ;;  %v7386_v40 = vld [vmem:[#allocation12 + $0x8c4] ss:$28 sps:$4 sm:$0xff]  }
 0x323   :  { %v7381_v38 = vld [vmem:[#allocation12 + $0x8f8] ss:$28 sps:$4 sm:$0xff]   ;;  %v7453_v39 = vld [vmem:[#allocation12 + $0xd20] ss:$28 sps:$4 sm:$0xff]   ;;  %v7461_v41 = vld [vmem:[#allocation12 + $0xcec] ss:$28 sps:$4 sm:$0xff]  }
 0x324   :  { %v8228_v48 = vpack.c.bf16 %v2693_v47, %v2693_v47  ;;  %5646 = vmatpush1.bf16.msra.mxu1 %v7345_v42  ;;  %v1060_v42 = vsub.s32 4, %v8162_v27  ;;  %v7384_v43 = vld [vmem:[#allocation12 + $0x8c0] ss:$28 sps:$4 sm:$0xff]   ;;  %v7459_v44 = vld [vmem:[#allocation12 + $0xce8] ss:$28 sps:$4 sm:$0xff]   ;;  %v1064_v47 = vsub.s32 5, %v8162_v27 }
 0x325   :  { %5647 = vmatprep.subr.bf16.mxu1 %v7350_v46  ;;  %v7392_v45 = vld [vmem:[#allocation12 + $0x194] ss:$28 sps:$4 sm:$0xff]  }
 0x326   :  { %5632 = vmatprep.mubr.bf16.mxu0 %v8228_v48  ;;  %v7467_v46 = vld [vmem:[#allocation12 + $0xcb4] ss:$28 sps:$4 sm:$0xff]  }
 0x327   :  { %5633 = vmatmul.mubr.bf16.vlgmr.msra.gmra.mxu0 %v8230_v53 }
 0x328   :  { %5648 = vmatpush1.bf16.msra.mxu1 %v7348_v50  ;;  %5683 = vmatpush1.bf16.msra.mxu0 %v7387_v52  ;;  %v1061_v50 = vrot.slane %v8204_v62, %v1060_v42  ;;  %v7465_v52 = vld [vmem:[#allocation12 + $0xcb0] ss:$28 sps:$4 sm:$0xff]  }
 0x329   :  { %5649 = vmatprep.subr.bf16.mxu1 %v7353_v54  ;;  %5684 = vmatprep.subr.bf16.mxu0 %v7395_v55  ;;  %v7473_v54 = vld [vmem:[#allocation12 + $0xc7c] ss:$28 sps:$4 sm:$0xff]   ;;  %v1065_v55 = vrot.slane %v8204_v62, %v1064_v47 }
 0x32c   :  { %5650 = vmatpush1.bf16.msra.mxu1 %v7351_v56  ;;  %5685 = vmatpush1.bf16.msra.mxu0 %v7393_v57 }
 0x32d   :  { %5651 = vmatprep.subr.bf16.mxu1 %v7356_v58  ;;  %5686 = vmatprep.subr.bf16.mxu0 %v7401_v59  ;;  %v7471_v59 = vld [vmem:[#allocation12 + $0xc78] ss:$28 sps:$4 sm:$0xff]  }
 0x330   :  { %5652 = vmatpush1.bf16.msra.mxu1 %v7354_v60  ;;  %5687 = vmatpush1.bf16.msra.mxu0 %v7399_v61  ;;  %v7479_v61 = vld [vmem:[#allocation12 + $0xc44] ss:$28 sps:$4 sm:$0xff]  }
 0x331   :  { %5653 = vmatprep.subr.bf16.mxu1 %v7359_v63  ;;  %5688 = vmatprep.subr.bf16.mxu0 %v7407_v0 }
 0x334   :  { %5654 = vmatpush1.bf16.msra.mxu1 %v7357_v1  ;;  %5689 = vmatpush1.bf16.msra.mxu0 %v7405_v2 }
 0x335   :  { %5655 = vmatprep.subr.bf16.mxu1 %v7362_v5  ;;  %5690 = vmatprep.subr.bf16.mxu0 %v7413_v6 }
 0x338   :  { %5656 = vmatpush1.bf16.msra.mxu1 %v7360_v7  ;;  %5691 = vmatpush1.bf16.msra.mxu0 %v7411_v8  ;;  %v7477_v7 = vld [vmem:[#allocation12 + $0xc40] ss:$28 sps:$4 sm:$0xff]  }
 0x339   :  { %5657 = vmatprep.subr.bf16.mxu1 %v7365_v9  ;;  %5692 = vmatprep.subr.bf16.mxu0 %v7419_v12  ;;  %v7485_v12 = vld [vmem:[#allocation12 + $0x514] ss:$28 sps:$4 sm:$0xff]  }
 0x33c   :  { %5658 = vmatpush2.bf16.msra.mxu1 %v7363_v10  ;;  %5693 = vmatpush1.bf16.msra.mxu0 %v7417_v11 }
 0x33d   :  { %5659 = vmatprep.subr.bf16.mxu1 %v7368_v16  ;;  %5694 = vmatprep.subr.bf16.mxu0 %v7425_v14  ;;  %v7390_v14 = vld [vmem:[#allocation12 + $0x190] ss:$28 sps:$4 sm:$0xff]  }
 0x340   :  { %5660 = vmatpush2.bf16.msra.mxu1 %v7366_v17  ;;  %5695 = vmatpush1.bf16.msra.mxu0 %v7423_v13  ;;  %v7398_v13 = vld [vmem:[#allocation12 + $0x15c] ss:$28 sps:$4 sm:$0xff]  }
 0x341   :  { %5661 = vmatprep.subr.bf16.mxu1 %v7371_v18  ;;  %5696 = vmatprep.subr.bf16.mxu0 %v7431_v15  ;;  %v7396_v18 = vld [vmem:[#allocation12 + $0x158] ss:$28 sps:$4 sm:$0xff]   ;;  %v7404_v15 = vld [vmem:[#allocation12 + $0x124] ss:$28 sps:$4 sm:$0xff]  }
 0x344   :  { %5662 = vmatpush2.bf16.msra.mxu1 %v7369_v19  ;;  %5697 = vmatpush1.bf16.msra.mxu0 %v7429_v3  ;;  %v7402_v19 = vld [vmem:[#allocation12 + $0x120] ss:$28 sps:$4 sm:$0xff]   ;;  %v7410_v3 = vld [vmem:[#allocation12 + $0xec] ss:$28 sps:$4 sm:$0xff]  }
 0x345   :  { %5663 = vmatprep.subr.bf16.mxu1 %v7374_v20  ;;  %5698 = vmatprep.subr.bf16.mxu0 %v7437_v21  ;;  %v7408_v20 = vld [vmem:[#allocation12 + $0xe8] ss:$28 sps:$4 sm:$0xff]   ;;  %v7416_v21 = vld [vmem:[#allocation12 + $0xb4] ss:$28 sps:$4 sm:$0xff]  }
 0x348   :  { %5664 = vmatpush2.bf16.msra.mxu1 %v7372_v23  ;;  %5699 = vmatpush2.bf16.msra.mxu0 %v7435_v4  ;;  %v7414_v23 = vld [vmem:[#allocation12 + $0xb0] ss:$28 sps:$4 sm:$0xff]   ;;  %v7422_v4 = vld [vmem:[#allocation12 + $0x7c] ss:$28 sps:$4 sm:$0xff]  }
 0x349   :  { %5665 = vmatprep.subr.bf16.mxu1 %v7377_v25  ;;  %5700 = vmatprep.subr.bf16.mxu0 %v7443_v26  ;;  %v7420_v25 = vld [vmem:[#allocation12 + $0x78] ss:$28 sps:$4 sm:$0xff]   ;;  %v7428_v26 = vld [vmem:[#allocation12 + $0x44] ss:$28 sps:$4 sm:$0xff]  }
 0x34c   :  { %5666 = vmatpush2.bf16.msra.mxu1 %v7375_v28  ;;  %5701 = vmatpush2.bf16.msra.mxu0 %v7441_v31  ;;  %v7426_v28 = vld [vmem:[#allocation12 + $0x40] ss:$28 sps:$4 sm:$0xff]   ;;  %v7434_v31 = vld [vmem:[#allocation12 + $0xc] ss:$28 sps:$4 sm:$0xff]  }
 0x34d   :  { %5667 = vmatprep.subr.bf16.mxu1 %v7380_v32  ;;  %5702 = vmatprep.subr.bf16.mxu0 %v7449_v33  ;;  %v7432_v32 = vld [vmem:[#allocation12 + $0x8] ss:$28 sps:$4 sm:$0xff]   ;;  %v7440_v33 = vld [vmem:[#allocation12 + $0x354] ss:$28 sps:$4 sm:$0xff]  }
 0x350   :  { %5668 = vmatpush2.bf16.msra.mxu1 %v7378_v34  ;;  %5703 = vmatpush2.bf16.msra.mxu0 %v7447_v35  ;;  %v7438_v34 = vld [vmem:[#allocation12 + $0x350] ss:$28 sps:$4 sm:$0xff]   ;;  %v7446_v35 = vld [vmem:[#allocation12 + $0x31c] ss:$28 sps:$4 sm:$0xff]  }
 0x351   :  { %5669 = vmatprep.subr.bf16.mxu1 %v7383_v36  ;;  %5704 = vmatprep.subr.bf16.mxu0 %v7455_v37  ;;  %v7444_v36 = vld [vmem:[#allocation12 + $0x318] ss:$28 sps:$4 sm:$0xff]   ;;  %v7452_v37 = vld [vmem:[#allocation12 + $0x2e4] ss:$28 sps:$4 sm:$0xff]  }
 0x354   :  { %5670 = vmatpush2.bf16.msra.mxu1 %v7381_v38  ;;  %5705 = vmatpush2.bf16.msra.mxu0 %v7453_v39  ;;  %v7450_v38 = vld [vmem:[#allocation12 + $0x2e0] ss:$28 sps:$4 sm:$0xff]   ;;  %v7458_v39 = vld [vmem:[#allocation12 + $0x2ac] ss:$28 sps:$4 sm:$0xff]  }
 0x355   :  { %5671 = vmatprep.subr.bf16.mxu1 %v7386_v40  ;;  %5706 = vmatprep.subr.bf16.mxu0 %v7461_v41  ;;  %v7456_v40 = vld [vmem:[#allocation12 + $0x2a8] ss:$28 sps:$4 sm:$0xff]   ;;  %v7464_v41 = vld [vmem:[#allocation12 + $0x274] ss:$28 sps:$4 sm:$0xff]  }
 0x358   :  { %5672 = vmatpush2.bf16.msra.mxu1 %v7384_v43  ;;  %5707 = vmatpush2.bf16.msra.mxu0 %v7459_v44  ;;  %v7462_v43 = vld [vmem:[#allocation12 + $0x270] ss:$28 sps:$4 sm:$0xff]   ;;  %v1068_v44 = vsub.s32 6, %v8162_v27 }
 0x359   :  { %5723 = vmatprep.subr.bf16.mxu1 %v7392_v45  ;;  %5708 = vmatprep.subr.bf16.mxu0 %v7467_v46  ;;  %v7470_v45 = vld [vmem:[#allocation12 + $0x23c] ss:$28 sps:$4 sm:$0xff]   ;;  %v1072_v46 = vsub.s32 7, %v8162_v27 }
 0x35b   :  { %v2560_v56 = vpop.f32.mrf.mxu1 }
 0x35c   :  { %v2561_v57 = vadd.f32 %v2560_v56, %v1061_v50  ;;  %v2601_v58 = vpop.f32.mrf.mxu0  ;;  %5709 = vmatpush2.bf16.msra.mxu0 %v7465_v52  ;;  %v7468_v50 = vld [vmem:[#allocation12 + $0x238] ss:$28 sps:$4 sm:$0xff]   ;;  %v1069_v52 = vrot.slane %v8204_v62, %v1068_v44 }
 0x35d   :  { %v2562_v60 = vpop.f32.mrf.mxu1  ;;  %5710 = vmatprep.subr.bf16.mxu0 %v7473_v54  ;;  %v7476_v54 = vld [vmem:[#allocation12 + $0x204] ss:$28 sps:$4 sm:$0xff]  }
 0x35e   :  { %v2602_v63 = vadd.f32 %v2601_v58, %v2561_v57  ;;  %v2563_v0 = vadd.f32 %v2562_v60, %v1065_v55  ;;  %v2603_v1 = vpop.f32.mrf.mxu0  ;;  %v1073_v55 = vrot.slane %v8204_v62, %v1072_v46  ;;  %v7488_v62 = vld [vmem:[#allocation12 + $0x894] ss:$28 sps:$4 sm:$0xff]   ;;  %v7522_v46 = vld [vmem:[#allocation12 + $0x740] ss:$28 sps:$4 sm:$0xff]  }
 0x35f   :  { %v2564_v2 = vpop.f32.mrf.mxu1 }
 0x360   :  { %v2604_v5 = vadd.f32 %v2603_v1, %v2563_v0  ;;  %v2605_v6 = vpop.f32.mrf.mxu0  ;;  %5711 = vmatpush2.bf16.msra.mxu0 %v7471_v59  ;;  %v2694_v8 = vmax.f32 %v2602_v63, 0.0  ;;  %v7474_v59 = vld [vmem:[#allocation12 + $0x200] ss:$28 sps:$4 sm:$0xff]  }
 0x361   :  { %v2565_v9 = vpop.f32.mrf.mxu1  ;;  %5712 = vmatprep.subr.bf16.mxu0 %v7479_v61  ;;  %v7482_v61 = vld [vmem:[#allocation12 + $0x1cc] ss:$28 sps:$4 sm:$0xff]  }
 0x362   :  { %v2695_v10 = vmax.f32 %v2604_v5, 0.0  ;;  %v2606_v11 = vpop.f32.mrf.mxu0  ;;  %v8244_v17 = vpack.c.bf16 %v2694_v8, %v2694_v8 }
 0x364   :  { %v8242_v16 = vpack.c.bf16 %v2695_v10, %v2695_v10  ;;  %5713 = vmatpush2.bf16.msra.mxu0 %v7477_v7  ;;  %v7480_v7 = vld [vmem:[#allocation12 + $0x1c8] ss:$28 sps:$4 sm:$0xff]  }
 0x365   :  { %5764 = vmatprep.subr.bf16.mxu0 %v7485_v12 }
 0x366   :  { %5673 = vmatprep.mubr.bf16.mxu1 %v8242_v16 }
 0x367   :  { %5674 = vmatmul.mubr.bf16.vlgmr.msra.gmra.mxu1 %v8244_v17 }
 0x368   :  { %5724 = vmatpush1.bf16.msra.mxu1 %v7390_v14  ;;  %5755 = vmatprep.mubr.bf16.mxu1 %v8214_v22  ;;  %v7483_v14 = vld [vmem:[#allocation12 + $0x510] ss:$28 sps:$4 sm:$0xff]  }
 0x369   :  { %5725 = vmatprep.subr.bf16.mxu1 %v7398_v13  ;;  %v7486_v13 = vld [vmem:[#allocation12 + $0x890] ss:$28 sps:$4 sm:$0xff]  }
 0x36c   :  { %5726 = vmatpush1.bf16.msra.mxu1 %v7396_v18 }
 0x36d   :  { %5727 = vmatprep.subr.bf16.mxu1 %v7404_v15  ;;  %v7491_v15 = vld [vmem:[#allocation12 + $0x4dc] ss:$28 sps:$4 sm:$0xff]  }
 0x370   :  { %5728 = vmatpush1.bf16.msra.mxu1 %v7402_v19  ;;  %v7494_v19 = vld [vmem:[#allocation12 + $0x85c] ss:$28 sps:$4 sm:$0xff]  }
 0x371   :  { %5729 = vmatprep.subr.bf16.mxu1 %v7410_v3  ;;  %v7489_v3 = vld [vmem:[#allocation12 + $0x4d8] ss:$28 sps:$4 sm:$0xff]  }
 0x374   :  { %5730 = vmatpush1.bf16.msra.mxu1 %v7408_v20  ;;  %v7492_v20 = vld [vmem:[#allocation12 + $0x858] ss:$28 sps:$4 sm:$0xff]  }
 0x375   :  { %5731 = vmatprep.subr.bf16.mxu1 %v7416_v21  ;;  %v7497_v21 = vld [vmem:[#allocation12 + $0x4a4] ss:$28 sps:$4 sm:$0xff]  }
 0x378   :  { %5732 = vmatpush1.bf16.msra.mxu1 %v7414_v23  ;;  %v7500_v23 = vld [vmem:[#allocation12 + $0x824] ss:$28 sps:$4 sm:$0xff]  }
 0x379   :  { %5733 = vmatprep.subr.bf16.mxu1 %v7422_v4  ;;  %v7495_v4 = vld [vmem:[#allocation12 + $0x4a0] ss:$28 sps:$4 sm:$0xff]  }
 0x37c   :  { %5734 = vmatpush1.bf16.msra.mxu1 %v7420_v25  ;;  %v7498_v25 = vld [vmem:[#allocation12 + $0x820] ss:$28 sps:$4 sm:$0xff]  }
 0x37d   :  { %5735 = vmatprep.subr.bf16.mxu1 %v7428_v26  ;;  %v7503_v26 = vld [vmem:[#allocation12 + $0x46c] ss:$28 sps:$4 sm:$0xff]  }
 0x380   :  { %5736 = vmatpush1.bf16.msra.mxu1 %v7426_v28  ;;  %v7506_v28 = vld [vmem:[#allocation12 + $0x7ec] ss:$28 sps:$4 sm:$0xff]  }
 0x381   :  { %5737 = vmatprep.subr.bf16.mxu1 %v7434_v31  ;;  %v7501_v31 = vld [vmem:[#allocation12 + $0x468] ss:$28 sps:$4 sm:$0xff]  }
 0x384   :  { %5738 = vmatpush1.bf16.msra.mxu1 %v7432_v32  ;;  %v7504_v32 = vld [vmem:[#allocation12 + $0x7e8] ss:$28 sps:$4 sm:$0xff]  }
 0x385   :  { %5739 = vmatprep.subr.bf16.mxu1 %v7440_v33  ;;  %v7509_v33 = vld [vmem:[#allocation12 + $0x434] ss:$28 sps:$4 sm:$0xff]  }
 0x388   :  { %5740 = vmatpush2.bf16.msra.mxu1 %v7438_v34  ;;  %v7512_v34 = vld [vmem:[#allocation12 + $0x7b4] ss:$28 sps:$4 sm:$0xff]  }
 0x389   :  { %5741 = vmatprep.subr.bf16.mxu1 %v7446_v35  ;;  %v7507_v35 = vld [vmem:[#allocation12 + $0x430] ss:$28 sps:$4 sm:$0xff]  }
 0x38c   :  { %5742 = vmatpush2.bf16.msra.mxu1 %v7444_v36  ;;  %v7510_v36 = vld [vmem:[#allocation12 + $0x7b0] ss:$28 sps:$4 sm:$0xff]  }
 0x38d   :  { %5743 = vmatprep.subr.bf16.mxu1 %v7452_v37  ;;  %v7515_v37 = vld [vmem:[#allocation12 + $0x3fc] ss:$28 sps:$4 sm:$0xff]  }
 0x390   :  { %5744 = vmatpush2.bf16.msra.mxu1 %v7450_v38  ;;  %v7518_v38 = vld [vmem:[#allocation12 + $0x77c] ss:$28 sps:$4 sm:$0xff]  }
 0x391   :  { %5745 = vmatprep.subr.bf16.mxu1 %v7458_v39  ;;  %v7513_v39 = vld [vmem:[#allocation12 + $0x3f8] ss:$28 sps:$4 sm:$0xff]  }
 0x394   :  { %5746 = vmatpush2.bf16.msra.mxu1 %v7456_v40  ;;  %v7516_v40 = vld [vmem:[#allocation12 + $0x778] ss:$28 sps:$4 sm:$0xff]  }
 0x395   :  { %5747 = vmatprep.subr.bf16.mxu1 %v7464_v41  ;;  %v7521_v41 = vld [vmem:[#allocation12 + $0x3c4] ss:$28 sps:$4 sm:$0xff]  }
 0x398   :  { %5748 = vmatpush2.bf16.msra.mxu1 %v7462_v43  ;;  %v7524_v43 = vld [vmem:[#allocation12 + $0x744] ss:$28 sps:$4 sm:$0xff]  }
 0x399   :  { %5749 = vmatprep.subr.bf16.mxu1 %v7470_v45  ;;  %v7519_v45 = vld [vmem:[#allocation12 + $0x3c0] ss:$28 sps:$4 sm:$0xff]  }
 0x39b   :  { %v2642_v56 = vpop.f32.mrf.mxu1 }
 0x39c   :  { %v2643_v57 = vadd.f32 %v2642_v56, %v1069_v52  ;;  %v2683_v58 = vpop.f32.mrf.mxu0  ;;  %5750 = vmatpush2.bf16.msra.mxu1 %v7468_v50  ;;  %v7527_v50 = vld [vmem:[#allocation12 + $0x38c] ss:$28 sps:$4 sm:$0xff]   ;;  %v7533_v56 = vld [vmem:[#allocation12 + $0x6d4] ss:$28 sps:$4 sm:$0xff]  }
 0x39d   :  { %v2644_v60 = vpop.f32.mrf.mxu1  ;;  %5751 = vmatprep.subr.bf16.mxu1 %v7476_v54  ;;  %v7530_v52 = vld [vmem:[#allocation12 + $0x70c] ss:$28 sps:$4 sm:$0xff]  }
 0x39e   :  { %v2684_v63 = vadd.f32 %v2683_v58, %v2643_v57  ;;  %v2645_v0 = vadd.f32 %v2644_v60, %v1073_v55  ;;  %v2685_v1 = vpop.f32.mrf.mxu0  ;;  %v7525_v54 = vld [vmem:[#allocation12 + $0x388] ss:$28 sps:$4 sm:$0xff]   ;;  %v7536_v57 = vld [vmem:[#allocation12 + $0xa54] ss:$28 sps:$4 sm:$0xff]   ;;  %v7539_v60 = vld [vmem:[#allocation12 + $0x69c] ss:$28 sps:$4 sm:$0xff]  }
 0x39f   :  { %v2646_v2 = vpop.f32.mrf.mxu1  ;;  %v7528_v55 = vld [vmem:[#allocation12 + $0x708] ss:$28 sps:$4 sm:$0xff]   ;;  %v7531_v58 = vld [vmem:[#allocation12 + $0x6d0] ss:$28 sps:$4 sm:$0xff]  }
 0x3a0   :  { %v2686_v5 = vadd.f32 %v2685_v1, %v2645_v0  ;;  %v2687_v6 = vpop.f32.mrf.mxu0  ;;  %5752 = vmatpush2.bf16.msra.mxu1 %v7474_v59  ;;  %v2696_v8 = vmax.f32 %v2684_v63, 0.0  ;;  %v7534_v59 = vld [vmem:[#allocation12 + $0xa50] ss:$28 sps:$4 sm:$0xff]   ;;  %v7537_v63 = vld [vmem:[#allocation12 + $0x698] ss:$28 sps:$4 sm:$0xff]  }
 0x3a1   :  { %v2647_v9 = vpop.f32.mrf.mxu1  ;;  %5753 = vmatprep.subr.bf16.mxu1 %v7482_v61  ;;  %v7542_v61 = vld [vmem:[#allocation12 + $0xa1c] ss:$28 sps:$4 sm:$0xff]   ;;  %v7545_v1 = vld [vmem:[#allocation12 + $0x664] ss:$28 sps:$4 sm:$0xff]  }
 0x3a2   :  { %v2697_v12 = vmax.f32 %v2686_v5, 0.0  ;;  %v2688_v10 = vpop.f32.mrf.mxu0  ;;  %v8257_v18 = vpack.c.bf16 %v2696_v8, %v2696_v8  ;;  %v7540_v0 = vld [vmem:[#allocation12 + $0xa18] ss:$28 sps:$4 sm:$0xff]   ;;  %v7548_v2 = vld [vmem:[#allocation12 + $0x9e4] ss:$28 sps:$4 sm:$0xff]  }
 0x3a3   :  { %v7543_v5 = vld [vmem:[#allocation12 + $0x660] ss:$28 sps:$4 sm:$0xff]   ;;  %v7554_v8 = vld [vmem:[#allocation12 + $0x9ac] ss:$28 sps:$4 sm:$0xff]   ;;  %v7560_v10 = vld [vmem:[#allocation12 + $0x974] ss:$28 sps:$4 sm:$0xff]  }
 0x3a4   :  { %v8255_v11 = vpack.c.bf16 %v2697_v12, %v2697_v12  ;;  %5754 = vmatpush2.bf16.msra.mxu1 %v7480_v7  ;;  %v7546_v6 = vld [vmem:[#allocation12 + $0x9e0] ss:$28 sps:$4 sm:$0xff]   ;;  %v7551_v7 = vld [vmem:[#allocation12 + $0x62c] ss:$28 sps:$4 sm:$0xff]   ;;  %v7557_v12 = vld [vmem:[#allocation12 + $0x5f4] ss:$28 sps:$4 sm:$0xff]  }
 0x3a5   :  { %5805 = vmatprep.subr.bf16.mxu1 %v7488_v62  ;;  %v7549_v9 = vld [vmem:[#allocation12 + $0x628] ss:$28 sps:$4 sm:$0xff]  }
 0x3a6   :  { %5714 = vmatprep.mubr.bf16.mxu0 %v8255_v11  ;;  %v7552_v62 = vld [vmem:[#allocation12 + $0x9a8] ss:$28 sps:$4 sm:$0xff]  }
 0x3a7   :  { %5756 = vmatmul.mubr.bf16.vlgmr.msra.gmra.mxu1 %v8223_v24  ;;  %5715 = vmatmul.mubr.bf16.vlgmr.msra.gmra.mxu0 %v8257_v18 }
 0x3a8   :  { %5765 = vmatpush1.bf16.msra.mxu0 %v7483_v14  ;;  %5806 = vmatpush1.bf16.msra.mxu1 %v7486_v13  ;;  %v7555_v14 = vld [vmem:[#allocation12 + $0x5f0] ss:$28 sps:$4 sm:$0xff]  }
 0x3a9   :  { %5837 = vmatprep.mubr.bf16.mxu1 %v8242_v16  ;;  %5796 = vmatprep.mubr.bf16.mxu0 %v8228_v48  ;;  %v7558_v13 = vld [vmem:[#allocation12 + $0x970] ss:$28 sps:$4 sm:$0xff]  }
 0x3aa   :  { %5766 = vmatprep.subr.bf16.mxu0 %v7491_v15  ;;  %5807 = vmatprep.subr.bf16.mxu1 %v7494_v19  ;;  %v7563_v15 = vld [vmem:[#allocation12 + $0x5bc] ss:$28 sps:$4 sm:$0xff]  }
 0x3ab   :  { %v7566_v19 = vld [vmem:[#allocation12 + $0x93c] ss:$28 sps:$4 sm:$0xff]  }
 0x3ac   :  { %5767 = vmatpush1.bf16.msra.mxu0 %v7489_v3  ;;  %5808 = vmatpush1.bf16.msra.mxu1 %v7492_v20  ;;  %v7561_v3 = vld [vmem:[#allocation12 + $0x5b8] ss:$28 sps:$4 sm:$0xff]  }
 0x3ad   :  { %5768 = vmatprep.subr.bf16.mxu0 %v7497_v21  ;;  %5809 = vmatprep.subr.bf16.mxu1 %v7500_v23  ;;  %v7564_v20 = vld [vmem:[#allocation12 + $0x938] ss:$28 sps:$4 sm:$0xff]   ;;  %v7569_v21 = vld [vmem:[#allocation12 + $0x584] ss:$28 sps:$4 sm:$0xff]  }
 0x3ae   :  { %v7572_v23 = vld [vmem:[#allocation12 + $0x904] ss:$28 sps:$4 sm:$0xff]  }
 0x3b0   :  { %5769 = vmatpush1.bf16.msra.mxu0 %v7495_v4  ;;  %5810 = vmatpush1.bf16.msra.mxu1 %v7498_v25  ;;  %v7567_v25 = vld [vmem:[#allocation12 + $0x580] ss:$28 sps:$4 sm:$0xff]  }
 0x3b1   :  { %5770 = vmatprep.subr.bf16.mxu0 %v7503_v26  ;;  %5811 = vmatprep.subr.bf16.mxu1 %v7506_v28  ;;  %v7570_v26 = vld [vmem:[#allocation12 + $0x900] ss:$28 sps:$4 sm:$0xff]  }
 0x3b4   :  { %5771 = vmatpush1.bf16.msra.mxu0 %v7501_v31  ;;  %5812 = vmatpush1.bf16.msra.mxu1 %v7504_v32  ;;  %v7575_v31 = vld [vmem:[#allocation12 + $0x54c] ss:$28 sps:$4 sm:$0xff]  }
 0x3b5   :  { %5772 = vmatprep.subr.bf16.mxu0 %v7509_v33  ;;  %5813 = vmatprep.subr.bf16.mxu1 %v7512_v34  ;;  %v7578_v32 = vld [vmem:[#allocation12 + $0x8cc] ss:$28 sps:$4 sm:$0xff]   ;;  %v8264_v33 = vld [vmem:[#allocation13] sm:$0xff] }
 0x3b8   :  { %5773 = vmatpush1.bf16.msra.mxu0 %v7507_v35  ;;  %5814 = vmatpush1.bf16.msra.mxu1 %v7510_v36  ;;  %v7573_v35 = vld [vmem:[#allocation12 + $0x548] ss:$28 sps:$4 sm:$0xff]  }
 0x3b9   :  { %5774 = vmatprep.subr.bf16.mxu0 %v7515_v37  ;;  %5815 = vmatprep.subr.bf16.mxu1 %v7518_v38  ;;  %v7576_v36 = vld [vmem:[#allocation12 + $0x8c8] ss:$28 sps:$4 sm:$0xff]   ;;  %v7581_v38 = vld [vmem:[#allocation12 + $0xc14] ss:$28 sps:$4 sm:$0xff]  }
 0x3bc   :  { %5775 = vmatpush1.bf16.msra.mxu0 %v7513_v39  ;;  %5816 = vmatpush1.bf16.msra.mxu1 %v7516_v40  ;;  %v7584_v39 = vld [vmem:[#allocation12 + $0x19c] ss:$28 sps:$4 sm:$0xff]   ;;  %v3223_v40 = vrot.slane %v8264_v33, %v8165_v29 }
 0x3bd   :  { %5776 = vmatprep.subr.bf16.mxu0 %v7521_v41  ;;  %5817 = vmatprep.subr.bf16.mxu1 %v7524_v43  ;;  %v3227_v41 = vrot.slane %v8264_v33, %v8168_v30  ;;  %v7579_v43 = vld [vmem:[#allocation12 + $0xc10] ss:$28 sps:$4 sm:$0xff]   ;;  %v7585_v29 = vld [vmem:[#allocation12 + $0xbd8] ss:$28 sps:$4 sm:$0xff]  }
 0x3c0   :  { %5777 = vmatpush1.bf16.msra.mxu0 %v7519_v45  ;;  %5818 = vmatpush1.bf16.msra.mxu1 %v7522_v46  ;;  %v7582_v45 = vld [vmem:[#allocation12 + $0x198] ss:$28 sps:$4 sm:$0xff]  }
 0x3c1   :  { %5778 = vmatprep.subr.bf16.mxu0 %v7527_v50  ;;  %5819 = vmatprep.subr.bf16.mxu1 %v7530_v52  ;;  %v7587_v50 = vld [vmem:[#allocation12 + $0xbdc] ss:$28 sps:$4 sm:$0xff]   ;;  %v7590_v52 = vld [vmem:[#allocation12 + $0x164] ss:$28 sps:$4 sm:$0xff]  }
 0x3c4   :  { %5779 = vmatpush1.bf16.msra.mxu0 %v7525_v54  ;;  %5820 = vmatpush1.bf16.msra.mxu1 %v7528_v55 }
 0x3c5   :  { %5780 = vmatprep.subr.bf16.mxu0 %v7533_v56  ;;  %5821 = vmatprep.subr.bf16.mxu1 %v7536_v57  ;;  %v7588_v57 = vld [vmem:[#allocation12 + $0x160] ss:$28 sps:$4 sm:$0xff]  }
 0x3c8   :  { %5781 = vmatpush2.bf16.msra.mxu0 %v7531_v58  ;;  %5822 = vmatpush2.bf16.msra.mxu1 %v7534_v59  ;;  %v7593_v58 = vld [vmem:[#allocation12 + $0xba4] ss:$28 sps:$4 sm:$0xff]  }
 0x3c9   :  { %5782 = vmatprep.subr.bf16.mxu0 %v7539_v60  ;;  %5823 = vmatprep.subr.bf16.mxu1 %v7542_v61  ;;  %v7596_v60 = vld [vmem:[#allocation12 + $0x12c] ss:$28 sps:$4 sm:$0xff]  }
 0x3cc   :  { %5783 = vmatpush2.bf16.msra.mxu0 %v7537_v63  ;;  %5824 = vmatpush2.bf16.msra.mxu1 %v7540_v0  ;;  %v7591_v63 = vld [vmem:[#allocation12 + $0xba0] ss:$28 sps:$4 sm:$0xff]  }
 0x3cd   :  { %5784 = vmatprep.subr.bf16.mxu0 %v7545_v1  ;;  %5825 = vmatprep.subr.bf16.mxu1 %v7548_v2  ;;  %v7594_v1 = vld [vmem:[#allocation12 + $0x128] ss:$28 sps:$4 sm:$0xff]  }
 0x3ce   :  { %v7599_v2 = vld [vmem:[#allocation12 + $0xb6c] ss:$28 sps:$4 sm:$0xff]  }
 0x3d0   :  { %5785 = vmatpush2.bf16.msra.mxu0 %v7543_v5  ;;  %5826 = vmatpush2.bf16.msra.mxu1 %v7546_v6  ;;  %v7602_v5 = vld [vmem:[#allocation12 + $0xf4] ss:$28 sps:$4 sm:$0xff]   ;;  %v7597_v6 = vld [vmem:[#allocation12 + $0xb68] ss:$28 sps:$4 sm:$0xff]  }
 0x3d1   :  { %5786 = vmatprep.subr.bf16.mxu0 %v7551_v7  ;;  %5827 = vmatprep.subr.bf16.mxu1 %v7554_v8  ;;  %v7600_v7 = vld [vmem:[#allocation12 + $0xf0] ss:$28 sps:$4 sm:$0xff]  }
 0x3d2   :  { %v7605_v8 = vld [vmem:[#allocation12 + $0xb34] ss:$28 sps:$4 sm:$0xff]  }
 0x3d4   :  { %5787 = vmatpush2.bf16.msra.mxu0 %v7549_v9  ;;  %5828 = vmatpush2.bf16.msra.mxu1 %v7552_v62  ;;  %v7608_v9 = vld [vmem:[#allocation12 + $0xbc] ss:$28 sps:$4 sm:$0xff]   ;;  %v7603_v62 = vld [vmem:[#allocation12 + $0xb30] ss:$28 sps:$4 sm:$0xff]  }
 0x3d5   :  { %5788 = vmatprep.subr.bf16.mxu0 %v7557_v12  ;;  %5829 = vmatprep.subr.bf16.mxu1 %v7560_v10  ;;  %v7606_v12 = vld [vmem:[#allocation12 + $0xb8] ss:$28 sps:$4 sm:$0xff]  }
 0x3d6   :  { %v7611_v10 = vld [vmem:[#allocation12 + $0xafc] ss:$28 sps:$4 sm:$0xff]  }
 0x3d8   :  { %5789 = vmatpush2.bf16.msra.mxu0 %v7555_v14  ;;  %5830 = vmatpush2.bf16.msra.mxu1 %v7558_v13  ;;  %v7614_v14 = vld [vmem:[#allocation12 + $0x84] ss:$28 sps:$4 sm:$0xff]   ;;  %v7609_v13 = vld [vmem:[#allocation12 + $0xaf8] ss:$28 sps:$4 sm:$0xff]  }
 0x3d9   :  { %5790 = vmatprep.subr.bf16.mxu0 %v7563_v15  ;;  %5831 = vmatprep.subr.bf16.mxu1 %v7566_v19  ;;  %v7612_v15 = vld [vmem:[#allocation12 + $0x80] ss:$28 sps:$4 sm:$0xff]  }
 0x3da   :  { %v7617_v19 = vld [vmem:[#allocation12 + $0xac4] ss:$28 sps:$4 sm:$0xff]  }
 0x3db   :  { %v5593_v4 = vpop.f32.mrf.mxu1 }
 0x3dc   :  { %5791 = vmatpush2.bf16.msra.mxu0 %v7561_v3  ;;  %5832 = vmatpush2.bf16.msra.mxu1 %v7564_v20  ;;  %v5594_v46 = vadd.f32 %v5593_v4, %v3223_v40  ;;  %v7620_v3 = vld [vmem:[#allocation12 + $0x4c] ss:$28 sps:$4 sm:$0xff]   ;;  %v7615_v20 = vld [vmem:[#allocation12 + $0xac0] ss:$28 sps:$4 sm:$0xff]   ;;  %v7626_v4 = vld [vmem:[#allocation12 + $0x14] ss:$28 sps:$4 sm:$0xff]  }
 0x3dd   :  { %v5595_v28 = vpop.f32.mrf.mxu1  ;;  %5792 = vmatprep.subr.bf16.mxu0 %v7569_v21  ;;  %5833 = vmatprep.subr.bf16.mxu1 %v7572_v23  ;;  %v7618_v21 = vld [vmem:[#allocation12 + $0x48] ss:$28 sps:$4 sm:$0xff]  }
 0x3de   :  { %v5596_v55 = vadd.f32 %v5595_v28, %v3227_v41  ;;  %v7623_v23 = vld [vmem:[#allocation12 + $0xa8c] ss:$28 sps:$4 sm:$0xff]   ;;  %v7629_v28 = vld [vmem:[#allocation12 + $0xdd4] ss:$28 sps:$4 sm:$0xff]   ;;  %v7639_v41 = vld [vmem:[#allocation12 + $0xd60] ss:$28 sps:$4 sm:$0xff]  }
 0x3df   :  { %v5597_v34 = vpop.f32.mrf.mxu1  ;;  %v7644_v40 = vld [vmem:[#allocation12 + $0x2ec] ss:$28 sps:$4 sm:$0xff]  }
 0x3e0   :  { %5793 = vmatpush2.bf16.msra.mxu0 %v7567_v25  ;;  %5834 = vmatpush2.bf16.msra.mxu1 %v7570_v26  ;;  %v7621_v25 = vld [vmem:[#allocation12 + $0xa88] ss:$28 sps:$4 sm:$0xff]   ;;  %v7624_v26 = vld [vmem:[#allocation12 + $0x10] ss:$28 sps:$4 sm:$0xff]   ;;  %v7630_v34 = vld [vmem:[#allocation12 + $0x358] ss:$28 sps:$4 sm:$0xff]  }
 0x3e1   :  { %v5598_v37 = vpop.f32.mrf.mxu1  ;;  %5794 = vmatprep.subr.bf16.mxu0 %v7575_v31  ;;  %5835 = vmatprep.subr.bf16.mxu1 %v7578_v32  ;;  %v7632_v31 = vld [vmem:[#allocation12 + $0x35c] ss:$28 sps:$4 sm:$0xff]   ;;  %v7627_v32 = vld [vmem:[#allocation12 + $0xdd0] ss:$28 sps:$4 sm:$0xff]  }
 0x3e2   :  { %v7633_v37 = vld [vmem:[#allocation12 + $0xd98] ss:$28 sps:$4 sm:$0xff]  }
 0x3e4   :  { %5795 = vmatpush2.bf16.msra.mxu0 %v7573_v35  ;;  %5836 = vmatpush2.bf16.msra.mxu1 %v7576_v36  ;;  %v7635_v35 = vld [vmem:[#allocation12 + $0xd9c] ss:$28 sps:$4 sm:$0xff]   ;;  %v7638_v36 = vld [vmem:[#allocation12 + $0x324] ss:$28 sps:$4 sm:$0xff]  }
 0x3e5   :  { %5846 = vmatprep.subr.bf16.mxu0 %v7581_v38  ;;  %5887 = vmatprep.subr.bf16.mxu1 %v7584_v39  ;;  %v7636_v38 = vld [vmem:[#allocation12 + $0x320] ss:$28 sps:$4 sm:$0xff]  }
 0x3e6   :  { %v7641_v39 = vld [vmem:[#allocation12 + $0xd64] ss:$28 sps:$4 sm:$0xff]  }
 0x3e7   :  { %5797 = vmatmul.mubr.bf16.vlgmr.msra.gmra.mxu0 %v8230_v53  ;;  %5838 = vmatmul.mubr.bf16.vlgmr.msra.gmra.mxu1 %v8244_v17  ;;  %v5634_v54 = vpop.f32.mrf.mxu0 }
 0x3e8   :  { %v8272_v56 = vadd.f32 %v5634_v54, %v5594_v46  ;;  %5847 = vmatpush1.bf16.msra.mxu0 %v7579_v43  ;;  %5878 = vmatprep.mubr.bf16.mxu0 %v8255_v11  ;;  %v7642_v43 = vld [vmem:[#allocation12 + $0x2e8] ss:$28 sps:$4 sm:$0xff]   ;;  %v7650_v46 = vld [vmem:[#allocation12 + $0x2b4] ss:$28 sps:$4 sm:$0xff]  }
 0x3e9   :  { %5888 = vmatpush1.bf16.msra.mxu1 %v7582_v45  ;;  %5919 = vmatprep.mubr.bf16.mxu1 %v8214_v22  ;;  %v5636_v30 = vpop.f32.mrf.mxu0  ;;  %v7647_v45 = vld [vmem:[#allocation12 + $0xd2c] ss:$28 sps:$4 sm:$0xff]   ;;  %v7653_v54 = vld [vmem:[#allocation12 + $0xcf4] ss:$28 sps:$4 sm:$0xff]  }
 0x3ea   :  { %v8276_v59 = vadd.f32 %v5636_v30, %v5596_v55  ;;  %5848 = vmatprep.subr.bf16.mxu0 %v7587_v50  ;;  %5889 = vmatprep.subr.bf16.mxu1 %v7590_v52  ;;  %v7645_v50 = vld [vmem:[#allocation12 + $0xd28] ss:$28 sps:$4 sm:$0xff]   ;;  %v7648_v52 = vld [vmem:[#allocation12 + $0x2b0] ss:$28 sps:$4 sm:$0xff]   ;;  %v7656_v55 = vld [vmem:[#allocation12 + $0x27c] ss:$28 sps:$4 sm:$0xff]  }
 0x3eb   :  { %v5638_v61 = vpop.f32.mrf.mxu0  ;;  %v7654_v30 = vld [vmem:[#allocation12 + $0x278] ss:$28 sps:$4 sm:$0xff]  }
 0x3ec   :  { %5849 = vmatpush1.bf16.msra.mxu0 %v7585_v29  ;;  %v7651_v29 = vld [vmem:[#allocation12 + $0xcf0] ss:$28 sps:$4 sm:$0xff]   ;;  %v7660_v61 = vld [vmem:[#allocation12 + $0x240] ss:$28 sps:$4 sm:$0xff]  }
 0x3ed   :  { %5890 = vmatpush1.bf16.msra.mxu1 %v7588_v57  ;;  %v5639_v0 = vpop.f32.mrf.mxu0  ;;  %5850 = vmatprep.subr.bf16.mxu0 %v7593_v58  ;;  %v7659_v57 = vld [vmem:[#allocation12 + $0xcbc] ss:$28 sps:$4 sm:$0xff]   ;;  %v7662_v58 = vld [vmem:[#allocation12 + $0x244] ss:$28 sps:$4 sm:$0xff]  }
 0x3ee   :  { %5891 = vmatprep.subr.bf16.mxu1 %v7596_v60  ;;  %v7657_v60 = vld [vmem:[#allocation12 + $0xcb8] ss:$28 sps:$4 sm:$0xff]   ;;  %v7668_v0 = vld [vmem:[#allocation12 + $0x20c] ss:$28 sps:$4 sm:$0xff]  }
 0x3f0   :  { %5851 = vmatpush1.bf16.msra.mxu0 %v7591_v63  ;;  %v7665_v63 = vld [vmem:[#allocation12 + $0xc84] ss:$28 sps:$4 sm:$0xff]  }
 0x3f1   :  { %5892 = vmatpush1.bf16.msra.mxu1 %v7594_v1  ;;  %5852 = vmatprep.subr.bf16.mxu0 %v7599_v2  ;;  %v7663_v1 = vld [vmem:[#allocation12 + $0xc80] ss:$28 sps:$4 sm:$0xff]   ;;  %v7666_v2 = vld [vmem:[#allocation12 + $0x208] ss:$28 sps:$4 sm:$0xff]  }
 0x3f2   :  { %5893 = vmatprep.subr.bf16.mxu1 %v7602_v5  ;;  %v7671_v5 = vld [vmem:[#allocation12 + $0xc4c] ss:$28 sps:$4 sm:$0xff]  }
 0x3f4   :  { %5853 = vmatpush1.bf16.msra.mxu0 %v7597_v6  ;;  %v7674_v6 = vld [vmem:[#allocation12 + $0x1d4] ss:$28 sps:$4 sm:$0xff]  }
 0x3f5   :  { %5894 = vmatpush1.bf16.msra.mxu1 %v7600_v7  ;;  %5854 = vmatprep.subr.bf16.mxu0 %v7605_v8  ;;  %v7669_v7 = vld [vmem:[#allocation12 + $0xc48] ss:$28 sps:$4 sm:$0xff]   ;;  %v7672_v8 = vld [vmem:[#allocation12 + $0x1d0] ss:$28 sps:$4 sm:$0xff]  }
 0x3f6   :  { %5895 = vmatprep.subr.bf16.mxu1 %v7608_v9  ;;  %v7677_v9 = vld [vmem:[#allocation12 + $0x51c] ss:$28 sps:$4 sm:$0xff]  }
 0x3f8   :  { %5855 = vmatpush1.bf16.msra.mxu0 %v7603_v62  ;;  %v7680_v62 = vld [vmem:[#allocation12 + $0x89c] ss:$28 sps:$4 sm:$0xff]  }
 0x3f9   :  { %5896 = vmatpush1.bf16.msra.mxu1 %v7606_v12  ;;  %5856 = vmatprep.subr.bf16.mxu0 %v7611_v10  ;;  %v7675_v12 = vld [vmem:[#allocation12 + $0x518] ss:$28 sps:$4 sm:$0xff]  }
 0x3fa   :  { %5897 = vmatprep.subr.bf16.mxu1 %v7614_v14  ;;  %v7678_v10 = vld [vmem:[#allocation12 + $0x898] ss:$28 sps:$4 sm:$0xff]   ;;  %v7683_v14 = vld [vmem:[#allocation12 + $0x4e4] ss:$28 sps:$4 sm:$0xff]  }
 0x3fc   :  { %5857 = vmatpush1.bf16.msra.mxu0 %v7609_v13 }
 0x3fd   :  { %5898 = vmatpush1.bf16.msra.mxu1 %v7612_v15  ;;  %5858 = vmatprep.subr.bf16.mxu0 %v7617_v19  ;;  %v7686_v15 = vld [vmem:[#allocation12 + $0x864] ss:$28 sps:$4 sm:$0xff]  }
 0x3fe   :  { %5899 = vmatprep.subr.bf16.mxu1 %v7620_v3  ;;  %v7681_v19 = vld [vmem:[#allocation12 + $0x4e0] ss:$28 sps:$4 sm:$0xff]  }
 0x400   :  { %5859 = vmatpush1.bf16.msra.mxu0 %v7615_v20  ;;  %v7684_v20 = vld [vmem:[#allocation12 + $0x860] ss:$28 sps:$4 sm:$0xff]  }
 0x401   :  { %5900 = vmatpush1.bf16.msra.mxu1 %v7618_v21  ;;  %5860 = vmatprep.subr.bf16.mxu0 %v7623_v23  ;;  %v7689_v21 = vld [vmem:[#allocation12 + $0x4ac] ss:$28 sps:$4 sm:$0xff]  }
 0x402   :  { %5901 = vmatprep.subr.bf16.mxu1 %v7626_v4  ;;  %v7692_v23 = vld [vmem:[#allocation12 + $0x82c] ss:$28 sps:$4 sm:$0xff]  }
 0x404   :  { %5861 = vmatpush1.bf16.msra.mxu0 %v7621_v25  ;;  %v7687_v25 = vld [vmem:[#allocation12 + $0x4a8] ss:$28 sps:$4 sm:$0xff]  }
 0x405   :  { %5902 = vmatpush1.bf16.msra.mxu1 %v7624_v26  ;;  %5862 = vmatprep.subr.bf16.mxu0 %v7629_v28  ;;  %v7690_v28 = vld [vmem:[#allocation12 + $0x828] ss:$28 sps:$4 sm:$0xff]  }
 0x406   :  { %5903 = vmatprep.subr.bf16.mxu1 %v7632_v31  ;;  %v7695_v31 = vld [vmem:[#allocation12 + $0x474] ss:$28 sps:$4 sm:$0xff]  }
 0x408   :  { %5863 = vmatpush2.bf16.msra.mxu0 %v7627_v32  ;;  %v7698_v32 = vld [vmem:[#allocation12 + $0x7f4] ss:$28 sps:$4 sm:$0xff]  }
 0x409   :  { %5904 = vmatpush2.bf16.msra.mxu1 %v7630_v34  ;;  %5864 = vmatprep.subr.bf16.mxu0 %v7635_v35  ;;  %v7693_v34 = vld [vmem:[#allocation12 + $0x470] ss:$28 sps:$4 sm:$0xff]  }
 0x40a   :  { %5905 = vmatprep.subr.bf16.mxu1 %v7638_v36  ;;  %v7696_v35 = vld [vmem:[#allocation12 + $0x7f0] ss:$28 sps:$4 sm:$0xff]   ;;  %v7701_v36 = vld [vmem:[#allocation12 + $0x43c] ss:$28 sps:$4 sm:$0xff]  }
 0x40c   :  { %5865 = vmatpush2.bf16.msra.mxu0 %v7633_v37  ;;  %v7704_v37 = vld [vmem:[#allocation12 + $0x7bc] ss:$28 sps:$4 sm:$0xff]  }
 0x40d   :  { %5906 = vmatpush2.bf16.msra.mxu1 %v7636_v38  ;;  %5866 = vmatprep.subr.bf16.mxu0 %v7641_v39  ;;  %v7699_v38 = vld [vmem:[#allocation12 + $0x438] ss:$28 sps:$4 sm:$0xff]  }
 0x40e   :  { %5907 = vmatprep.subr.bf16.mxu1 %v7644_v40  ;;  %v7702_v39 = vld [vmem:[#allocation12 + $0x7b8] ss:$28 sps:$4 sm:$0xff]   ;;  %v7707_v40 = vld [vmem:[#allocation12 + $0x404] ss:$28 sps:$4 sm:$0xff]  }
 0x410   :  { %5867 = vmatpush2.bf16.msra.mxu0 %v7639_v41  ;;  %v7710_v41 = vld [vmem:[#allocation12 + $0x784] ss:$28 sps:$4 sm:$0xff]  }
 0x411   :  { %5908 = vmatpush2.bf16.msra.mxu1 %v7642_v43  ;;  %5868 = vmatprep.subr.bf16.mxu0 %v7647_v45  ;;  %v7705_v43 = vld [vmem:[#allocation12 + $0x400] ss:$28 sps:$4 sm:$0xff]  }
 0x412   :  { %5909 = vmatprep.subr.bf16.mxu1 %v7650_v46  ;;  %v7708_v45 = vld [vmem:[#allocation12 + $0x780] ss:$28 sps:$4 sm:$0xff]   ;;  %v7713_v46 = vld [vmem:[#allocation12 + $0x3cc] ss:$28 sps:$4 sm:$0xff]  }
 0x414   :  { %5869 = vmatpush2.bf16.msra.mxu0 %v7645_v50  ;;  %v7716_v50 = vld [vmem:[#allocation12 + $0x74c] ss:$28 sps:$4 sm:$0xff]  }
 0x415   :  { %5910 = vmatpush2.bf16.msra.mxu1 %v7648_v52  ;;  %5870 = vmatprep.subr.bf16.mxu0 %v7653_v54  ;;  %v7711_v52 = vld [vmem:[#allocation12 + $0x3c8] ss:$28 sps:$4 sm:$0xff]  }
 0x416   :  { %5911 = vmatprep.subr.bf16.mxu1 %v7656_v55  ;;  %v7714_v54 = vld [vmem:[#allocation12 + $0x748] ss:$28 sps:$4 sm:$0xff]   ;;  %v7719_v55 = vld [vmem:[#allocation12 + $0x394] ss:$28 sps:$4 sm:$0xff]  }
 0x418   :  { %5871 = vmatpush2.bf16.msra.mxu0 %v7651_v29  ;;  %v7722_v29 = vld [vmem:[#allocation12 + $0x714] ss:$28 sps:$4 sm:$0xff]  }
 0x419   :  { %5912 = vmatpush2.bf16.msra.mxu1 %v7654_v30  ;;  %5872 = vmatprep.subr.bf16.mxu0 %v7659_v57  ;;  %v7717_v30 = vld [vmem:[#allocation12 + $0x390] ss:$28 sps:$4 sm:$0xff]  }
 0x41a   :  { %5913 = vmatprep.subr.bf16.mxu1 %v7662_v58  ;;  %v7720_v57 = vld [vmem:[#allocation12 + $0x710] ss:$28 sps:$4 sm:$0xff]   ;;  %v7725_v58 = vld [vmem:[#allocation12 + $0x6dc] ss:$28 sps:$4 sm:$0xff]  }
 0x41c   :  { %5873 = vmatpush2.bf16.msra.mxu0 %v7657_v60  ;;  %v7728_v60 = vld [vmem:[#allocation12 + $0xa5c] ss:$28 sps:$4 sm:$0xff]  }
 0x41d   :  { %5914 = vmatpush2.bf16.msra.mxu1 %v7660_v61  ;;  %5874 = vmatprep.subr.bf16.mxu0 %v7665_v63  ;;  %v7723_v61 = vld [vmem:[#allocation12 + $0x6d8] ss:$28 sps:$4 sm:$0xff]  }
 0x41e   :  { %5915 = vmatprep.subr.bf16.mxu1 %v7668_v0  ;;  %v7726_v63 = vld [vmem:[#allocation12 + $0xa58] ss:$28 sps:$4 sm:$0xff]   ;;  %v7731_v0 = vld [vmem:[#allocation12 + $0x6a4] ss:$28 sps:$4 sm:$0xff]  }
 0x420   :  { %5875 = vmatpush2.bf16.msra.mxu0 %v7663_v1  ;;  %v7734_v1 = vld [vmem:[#allocation12 + $0xa24] ss:$28 sps:$4 sm:$0xff]  }
 0x421   :  { %5916 = vmatpush2.bf16.msra.mxu1 %v7666_v2  ;;  %5876 = vmatprep.subr.bf16.mxu0 %v7671_v5  ;;  %v7729_v2 = vld [vmem:[#allocation12 + $0x6a0] ss:$28 sps:$4 sm:$0xff]  }
 0x422   :  { %5917 = vmatprep.subr.bf16.mxu1 %v7674_v6  ;;  %v7732_v5 = vld [vmem:[#allocation12 + $0xa20] ss:$28 sps:$4 sm:$0xff]   ;;  %v7737_v6 = vld [vmem:[#allocation12 + $0x66c] ss:$28 sps:$4 sm:$0xff]  }
 0x424   :  { %5877 = vmatpush2.bf16.msra.mxu0 %v7669_v7  ;;  %v7740_v7 = vld [vmem:[#allocation12 + $0x9ec] ss:$28 sps:$4 sm:$0xff]  }
 0x425   :  { %5918 = vmatpush2.bf16.msra.mxu1 %v7672_v8  ;;  %5928 = vmatprep.subr.bf16.mxu0 %v7677_v9  ;;  %v7735_v8 = vld [vmem:[#allocation12 + $0x668] ss:$28 sps:$4 sm:$0xff]  }
 0x426   :  { %5969 = vmatprep.subr.bf16.mxu1 %v7680_v62  ;;  %v7738_v9 = vld [vmem:[#allocation12 + $0x9e8] ss:$28 sps:$4 sm:$0xff]   ;;  %v7743_v62 = vld [vmem:[#allocation12 + $0x634] ss:$28 sps:$4 sm:$0xff]  }
 0x427   :  { %5879 = vmatmul.mubr.bf16.vlgmr.msra.gmra.mxu0 %v8257_v18  ;;  %v8279_v13 = vpop.f32.mrf.mxu1 }
 0x428   :  { %5920 = vmatmul.mubr.bf16.vlgmr.msra.gmra.mxu1 %v8223_v24  ;;  %5929 = vmatpush1.bf16.msra.mxu0 %v7675_v12  ;;  %v7746_v12 = vld [vmem:[#allocation12 + $0x9b4] ss:$28 sps:$4 sm:$0xff]  }
 0x429   :  { %5960 = vmatprep.mubr.bf16.mxu0 %v8228_v48  ;;  %5970 = vmatpush1.bf16.msra.mxu1 %v7678_v10  ;;  %v8283_v3 = vpop.f32.mrf.mxu1  ;;  %v7741_v10 = vld [vmem:[#allocation12 + $0x630] ss:$28 sps:$4 sm:$0xff]  }
 0x42a   :  { %6001 = vmatprep.mubr.bf16.mxu1 %v8242_v16  ;;  %5930 = vmatprep.subr.bf16.mxu0 %v7683_v14  ;;  %v7744_v14 = vld [vmem:[#allocation12 + $0x9b0] ss:$28 sps:$4 sm:$0xff]  }
 0x42b   :  { %5971 = vmatprep.subr.bf16.mxu1 %v7686_v15  ;;  %v5679_v4 = vpop.f32.mrf.mxu1  ;;  %v7749_v15 = vld [vmem:[#allocation12 + $0x5fc] ss:$28 sps:$4 sm:$0xff]  }
 0x42c   :  { %5931 = vmatpush1.bf16.msra.mxu0 %v7681_v19  ;;  %v7752_v19 = vld [vmem:[#allocation12 + $0x97c] ss:$28 sps:$4 sm:$0xff]   ;;  %v7758_v4 = vld [vmem:[#allocation12 + $0x944] ss:$28 sps:$4 sm:$0xff]  }
 0x42d   :  { %5972 = vmatpush1.bf16.msra.mxu1 %v7684_v20  ;;  %v5680_v26 = vpop.f32.mrf.mxu1  ;;  %5932 = vmatprep.subr.bf16.mxu0 %v7689_v21  ;;  %v7747_v20 = vld [vmem:[#allocation12 + $0x5f8] ss:$28 sps:$4 sm:$0xff]  }
 0x42e   :  { %5973 = vmatprep.subr.bf16.mxu1 %v7692_v23  ;;  %v7750_v21 = vld [vmem:[#allocation12 + $0x978] ss:$28 sps:$4 sm:$0xff]   ;;  %v7755_v23 = vld [vmem:[#allocation12 + $0x5c4] ss:$28 sps:$4 sm:$0xff]  }
 0x42f   :  { %v7756_v26 = vld [vmem:[#allocation12 + $0x940] ss:$28 sps:$4 sm:$0xff]  }
 0x430   :  { %5933 = vmatpush1.bf16.msra.mxu0 %v7687_v25  ;;  %v7753_v25 = vld [vmem:[#allocation12 + $0x5c0] ss:$28 sps:$4 sm:$0xff]  }
 0x431   :  { %5974 = vmatpush1.bf16.msra.mxu1 %v7690_v28  ;;  %5934 = vmatprep.subr.bf16.mxu0 %v7695_v31  ;;  %v7761_v28 = vld [vmem:[#allocation12 + $0x58c] ss:$28 sps:$4 sm:$0xff]  }
 0x432   :  { %5975 = vmatprep.subr.bf16.mxu1 %v7698_v32  ;;  %v7764_v31 = vld [vmem:[#allocation12 + $0x90c] ss:$28 sps:$4 sm:$0xff]  }
 0x433   :  { %v7759_v32 = vld [vmem:[#allocation12 + $0x588] ss:$28 sps:$4 sm:$0xff]  }
 0x434   :  { %5935 = vmatpush1.bf16.msra.mxu0 %v7693_v34  ;;  %v7762_v34 = vld [vmem:[#allocation12 + $0x908] ss:$28 sps:$4 sm:$0xff]  }
 0x435   :  { %5976 = vmatpush1.bf16.msra.mxu1 %v7696_v35  ;;  %5936 = vmatprep.subr.bf16.mxu0 %v7701_v36  ;;  %v7767_v35 = vld [vmem:[#allocation12 + $0x554] ss:$28 sps:$4 sm:$0xff]  }
 0x436   :  { %5977 = vmatprep.subr.bf16.mxu1 %v7704_v37  ;;  %v7770_v36 = vld [vmem:[#allocation12 + $0x8d4] ss:$28 sps:$4 sm:$0xff]  }
 0x437   :  { %v7765_v37 = vld [vmem:[#allocation12 + $0x550] ss:$28 sps:$4 sm:$0xff]  }
 0x438   :  { %5937 = vmatpush1.bf16.msra.mxu0 %v7699_v38  ;;  %v7768_v38 = vld [vmem:[#allocation12 + $0x8d0] ss:$28 sps:$4 sm:$0xff]  }
 0x439   :  { %5978 = vmatpush1.bf16.msra.mxu1 %v7702_v39  ;;  %5938 = vmatprep.subr.bf16.mxu0 %v7707_v40  ;;  %v7773_v39 = vld [vmem:[#allocation12 + $0xc1c] ss:$28 sps:$4 sm:$0xff]  }
 0x43a   :  { %5979 = vmatprep.subr.bf16.mxu1 %v7710_v41  ;;  %v7774_v40 = vld [vmem:[#allocation12 + $0x360] ss:$28 sps:$4 sm:$0xff]   ;;  %v7771_v41 = vld [vmem:[#allocation12 + $0xc18] ss:$28 sps:$4 sm:$0xff]  }
 0x43c   :  { %5939 = vmatpush1.bf16.msra.mxu0 %v7705_v43  ;;  %v7775_v43 = vld [vmem:[#allocation12 + $0x1a0] ss:$28 sps:$4 sm:$0xff]  }
 0x43d   :  { %5980 = vmatpush1.bf16.msra.mxu1 %v7708_v45  ;;  %5940 = vmatprep.subr.bf16.mxu0 %v7713_v46  ;;  %v5676_v45 = vadd.f32 %v8279_v13, %v8272_v56  ;;  %v7778_v46 = vld [vmem:[#allocation12 + $0xbe4] ss:$28 sps:$4 sm:$0xff]  }
 0x43e   :  { %5981 = vmatprep.subr.bf16.mxu1 %v7716_v50 }
 0x440   :  { %5941 = vmatpush1.bf16.msra.mxu0 %v7711_v52 }
 0x441   :  { %5982 = vmatpush1.bf16.msra.mxu1 %v7714_v54  ;;  %5942 = vmatprep.subr.bf16.mxu0 %v7719_v55  ;;  %v7779_v54 = vld [vmem:[#allocation12 + $0x328] ss:$28 sps:$4 sm:$0xff]   ;;  %v5678_v55 = vadd.f32 %v8283_v3, %v8276_v59 }
 0x442   :  { %5983 = vmatprep.subr.bf16.mxu1 %v7722_v29 }
 0x444   :  { %5943 = vmatpush1.bf16.msra.mxu0 %v7717_v30  ;;  %v7776_v30 = vld [vmem:[#allocation12 + $0xbe0] ss:$28 sps:$4 sm:$0xff]  }
 0x445   :  { %5984 = vmatpush1.bf16.msra.mxu1 %v7720_v57  ;;  %5944 = vmatprep.subr.bf16.mxu0 %v7725_v58  ;;  %v7780_v57 = vld [vmem:[#allocation12 + $0x168] ss:$28 sps:$4 sm:$0xff]  }
 0x446   :  { %5985 = vmatprep.subr.bf16.mxu1 %v7728_v60  ;;  %v7783_v58 = vld [vmem:[#allocation12 + $0xbac] ss:$28 sps:$4 sm:$0xff]  }
 0x448   :  { %5945 = vmatpush2.bf16.msra.mxu0 %v7723_v61  ;;  %v7784_v61 = vld [vmem:[#allocation12 + $0x2f0] ss:$28 sps:$4 sm:$0xff]  }
 0x449   :  { %5986 = vmatpush2.bf16.msra.mxu1 %v7726_v63  ;;  %5946 = vmatprep.subr.bf16.mxu0 %v7731_v0  ;;  %v7781_v63 = vld [vmem:[#allocation12 + $0xba8] ss:$28 sps:$4 sm:$0xff]  }
 0x44a   :  { %5987 = vmatprep.subr.bf16.mxu1 %v7734_v1 }
 0x44c   :  { %5947 = vmatpush2.bf16.msra.mxu0 %v7729_v2  ;;  %v7785_v2 = vld [vmem:[#allocation12 + $0x130] ss:$28 sps:$4 sm:$0xff]  }
 0x44d   :  { %5988 = vmatpush2.bf16.msra.mxu1 %v7732_v5  ;;  %5948 = vmatprep.subr.bf16.mxu0 %v7737_v6  ;;  %v7788_v5 = vld [vmem:[#allocation12 + $0xb74] ss:$28 sps:$4 sm:$0xff]  }
 0x44e   :  { %5989 = vmatprep.subr.bf16.mxu1 %v7740_v7  ;;  %v7789_v6 = vld [vmem:[#allocation12 + $0x2b8] ss:$28 sps:$4 sm:$0xff]   ;;  %v7786_v7 = vld [vmem:[#allocation12 + $0xb70] ss:$28 sps:$4 sm:$0xff]  }
 0x450   :  { %5949 = vmatpush2.bf16.msra.mxu0 %v7735_v8  ;;  %v7793_v8 = vld [vmem:[#allocation12 + $0xb3c] ss:$28 sps:$4 sm:$0xff]  }
 0x451   :  { %5990 = vmatpush2.bf16.msra.mxu1 %v7738_v9  ;;  %5950 = vmatprep.subr.bf16.mxu0 %v7743_v62  ;;  %v7794_v9 = vld [vmem:[#allocation12 + $0x280] ss:$28 sps:$4 sm:$0xff]   ;;  %v7791_v62 = vld [vmem:[#allocation12 + $0xb38] ss:$28 sps:$4 sm:$0xff]  }
 0x452   :  { %5991 = vmatprep.subr.bf16.mxu1 %v7746_v12  ;;  %v7795_v12 = vld [vmem:[#allocation12 + $0xc0] ss:$28 sps:$4 sm:$0xff]  }
 0x454   :  { %5951 = vmatpush2.bf16.msra.mxu0 %v7741_v10  ;;  %v7798_v10 = vld [vmem:[#allocation12 + $0xb04] ss:$28 sps:$4 sm:$0xff]  }
 0x455   :  { %5992 = vmatpush2.bf16.msra.mxu1 %v7744_v14  ;;  %5952 = vmatprep.subr.bf16.mxu0 %v7749_v15  ;;  %v7799_v14 = vld [vmem:[#allocation12 + $0x248] ss:$28 sps:$4 sm:$0xff]  }
 0x456   :  { %5993 = vmatprep.subr.bf16.mxu1 %v7752_v19  ;;  %v7796_v19 = vld [vmem:[#allocation12 + $0xb00] ss:$28 sps:$4 sm:$0xff]  }
 0x458   :  { %5953 = vmatpush2.bf16.msra.mxu0 %v7747_v20 }
 0x459   :  { %5994 = vmatpush2.bf16.msra.mxu1 %v7750_v21  ;;  %5954 = vmatprep.subr.bf16.mxu0 %v7755_v23  ;;  %v7800_v21 = vld [vmem:[#allocation12 + $0x88] ss:$28 sps:$4 sm:$0xff]  }
 0x45a   :  { %5995 = vmatprep.subr.bf16.mxu1 %v7758_v4  ;;  %v7803_v23 = vld [vmem:[#allocation12 + $0xacc] ss:$28 sps:$4 sm:$0xff]  }
 0x45b   :  { %v7804_v4 = vld [vmem:[#allocation12 + $0x210] ss:$28 sps:$4 sm:$0xff]  }
 0x45c   :  { %5955 = vmatpush2.bf16.msra.mxu0 %v7753_v25  ;;  %v7801_v25 = vld [vmem:[#allocation12 + $0xac8] ss:$28 sps:$4 sm:$0xff]  }
 0x45d   :  { %5996 = vmatpush2.bf16.msra.mxu1 %v7756_v26  ;;  %5956 = vmatprep.subr.bf16.mxu0 %v7761_v28  ;;  %v7805_v26 = vld [vmem:[#allocation12 + $0x50] ss:$28 sps:$4 sm:$0xff]  }
 0x45e   :  { %5997 = vmatprep.subr.bf16.mxu1 %v7764_v31  ;;  %v7808_v28 = vld [vmem:[#allocation12 + $0xa94] ss:$28 sps:$4 sm:$0xff]  }
 0x45f   :  { %v7809_v31 = vld [vmem:[#allocation12 + $0x1d8] ss:$28 sps:$4 sm:$0xff]  }
 0x460   :  { %5957 = vmatpush2.bf16.msra.mxu0 %v7759_v32  ;;  %v7806_v32 = vld [vmem:[#allocation12 + $0xa90] ss:$28 sps:$4 sm:$0xff]  }
 0x461   :  { %5998 = vmatpush2.bf16.msra.mxu1 %v7762_v34  ;;  %5958 = vmatprep.subr.bf16.mxu0 %v7767_v35  ;;  %v7810_v34 = vld [vmem:[#allocation12 + $0x18] ss:$28 sps:$4 sm:$0xff]  }
 0x462   :  { %5999 = vmatprep.subr.bf16.mxu1 %v7770_v36  ;;  %v7813_v35 = vld [vmem:[#allocation12 + $0xddc] ss:$28 sps:$4 sm:$0xff]  }
 0x463   :  { %v7814_v36 = vld [vmem:[#allocation12 + $0xa60] ss:$28 sps:$4 sm:$0xff]  }
 0x464   :  { %5959 = vmatpush2.bf16.msra.mxu0 %v7765_v37  ;;  %v7811_v37 = vld [vmem:[#allocation12 + $0xdd8] ss:$28 sps:$4 sm:$0xff]  }
 0x465   :  { %6000 = vmatpush2.bf16.msra.mxu1 %v7768_v38  ;;  %6010 = vmatprep.subr.bf16.mxu0 %v7773_v39  ;;  %v7815_v38 = vld [vmem:[#allocation12 + $0x8a0] ss:$28 sps:$4 sm:$0xff]  }
 0x466   :  { %7018 = vmatprep.subr.bf16.mxu1 %v7774_v40  ;;  %v7818_v39 = vld [vmem:[#allocation12 + $0xda4] ss:$28 sps:$4 sm:$0xff]  }
 0x467   :  { %v8288_v50 = vpop.f32.mrf.mxu1  ;;  %5961 = vmatmul.mubr.bf16.vlgmr.msra.gmra.mxu0 %v8230_v53  ;;  %v5716_v52 = vpop.f32.mrf.mxu0  ;;  %v7819_v40 = vld [vmem:[#allocation12 + $0xa28] ss:$28 sps:$4 sm:$0xff]  }
 0x468   :  { %6002 = vmatmul.mubr.bf16.vlgmr.msra.gmra.mxu1 %v8244_v17  ;;  %v5717_v29 = vadd.f32 %v5716_v52, %v5676_v45  ;;  %6011 = vmatpush1.bf16.msra.mxu0 %v7771_v41  ;;  %v7816_v41 = vld [vmem:[#allocation12 + $0xda0] ss:$28 sps:$4 sm:$0xff]   ;;  %v7823_v45 = vld [vmem:[#allocation12 + $0xd6c] ss:$28 sps:$4 sm:$0xff]  }
 0x469   :  { %6042 = vmatprep.mubr.bf16.mxu0 %v8255_v11  ;;  %7019 = vmatpush3.bf16.msra.mxu1 %v7775_v43  ;;  %v8295_v56 = vpop.f32.mrf.mxu1  ;;  %v5718_v13 = vpop.f32.mrf.mxu0  ;;  %v7820_v43 = vld [vmem:[#allocation12 + $0x868] ss:$28 sps:$4 sm:$0xff]  }
 0x46a   :  { %7883 = vtanh.f32 %v5717_v29  ;;  %6083 = vmatprep.mubr.bf16.mxu1 %v8214_v22  ;;  %v5719_v60 = vadd.f32 %v5718_v13, %v5678_v55  ;;  %6012 = vmatprep.subr.bf16.mxu0 %v7778_v46  ;;  %v7790_v22 = vld [vmem:[#allocation12 + $0xf8] ss:$28 sps:$4 sm:$0xff]   ;;  %v7824_v46 = vld [vmem:[#allocation12 + $0x9f0] ss:$28 sps:$4 sm:$0xff]   ;;  %v7821_v52 = vld [vmem:[#allocation12 + $0xd68] ss:$28 sps:$4 sm:$0xff]  }
 0x46b   :  { %v5761_v59 = vpop.f32.mrf.mxu1  ;;  %7020 = vmatprep.subr.bf16.mxu1 %v7779_v54  ;;  %v5720_v3 = vpop.f32.mrf.mxu0  ;;  %v7825_v54 = vld [vmem:[#allocation12 + $0x830] ss:$28 sps:$4 sm:$0xff]   ;;  %v7829_v29 = vld [vmem:[#allocation12 + $0x9b8] ss:$28 sps:$4 sm:$0xff]  }
 0x46c   :  { %7885 = vtanh.f32 %v5719_v60  ;;  %6013 = vmatpush1.bf16.msra.mxu0 %v7776_v30  ;;  %v7828_v55 = vld [vmem:[#allocation12 + $0xd34] ss:$28 sps:$4 sm:$0xff]   ;;  %v7833_v13 = vld [vmem:[#allocation12 + $0xcfc] ss:$28 sps:$4 sm:$0xff]   ;;  %v7838_v60 = vld [vmem:[#allocation12 + $0xcc4] ss:$28 sps:$4 sm:$0xff]  }
 0x46d   :  { %7021 = vmatpush3.bf16.msra.mxu1 %v7780_v57  ;;  %v5762_v0 = vpop.f32.mrf.mxu1  ;;  %v5721_v1 = vpop.f32.mrf.mxu0  ;;  %6014 = vmatprep.subr.bf16.mxu0 %v7783_v58  ;;  %v7830_v30 = vld [vmem:[#allocation12 + $0x7f8] ss:$28 sps:$4 sm:$0xff]   ;;  %v7835_v58 = vld [vmem:[#allocation12 + $0x7c0] ss:$28 sps:$4 sm:$0xff]   ;;  %v7840_v3 = vld [vmem:[#allocation12 + $0x788] ss:$28 sps:$4 sm:$0xff]  }
 0x46e   :  { %7022 = vmatprep.subr.bf16.mxu1 %v7784_v61  ;;  %v7831_v57 = vld [vmem:[#allocation12 + $0xcf8] ss:$28 sps:$4 sm:$0xff]   ;;  %v7839_v61 = vld [vmem:[#allocation12 + $0x948] ss:$28 sps:$4 sm:$0xff]   ;;  %v7836_v59 = vld [vmem:[#allocation12 + $0xcc0] ss:$28 sps:$4 sm:$0xff]  }
 0x46f   :  { %v7844_v0 = vld [vmem:[#allocation12 + $0x910] ss:$28 sps:$4 sm:$0xff]   ;;  %v7841_v1 = vld [vmem:[#allocation12 + $0xc88] ss:$28 sps:$4 sm:$0xff]  }
 0x470   :  { %6015 = vmatpush1.bf16.msra.mxu0 %v7781_v63  ;;  %v7843_v63 = vld [vmem:[#allocation12 + $0xc8c] ss:$28 sps:$4 sm:$0xff]  }
 0x471   :  { %7023 = vmatpush3.bf16.msra.mxu1 %v7785_v2  ;;  %6016 = vmatprep.subr.bf16.mxu0 %v7788_v5  ;;  %v7845_v2 = vld [vmem:[#allocation12 + $0x750] ss:$28 sps:$4 sm:$0xff]  }
 0x472   :  { %7024 = vmatprep.subr.bf16.mxu1 %v7789_v6  ;;  %v7848_v5 = vld [vmem:[#allocation12 + $0xc54] ss:$28 sps:$4 sm:$0xff]  }
 0x473   :  { %v7849_v6 = vld [vmem:[#allocation12 + $0x8d8] ss:$28 sps:$4 sm:$0xff]  }
 0x474   :  { %6017 = vmatpush1.bf16.msra.mxu0 %v7786_v7  ;;  %v7846_v7 = vld [vmem:[#allocation12 + $0xc50] ss:$28 sps:$4 sm:$0xff]  }
 0x475   :  { %7025 = vmatpush3.bf16.msra.mxu1 %v7790_v22  ;;  %6018 = vmatprep.subr.bf16.mxu0 %v7793_v8  ;;  %v7850_v22 = vld [vmem:[#allocation12 + $0x718] ss:$28 sps:$4 sm:$0xff]   ;;  %v7851_v8 = vld [vmem:[#allocation12 + $0x6e0] ss:$28 sps:$4 sm:$0xff]  }
 0x476   :  { %7026 = vmatprep.subr.bf16.mxu1 %v7794_v9  ;;  %v7852_v9 = vld [vmem:[#allocation12 + $0x520] ss:$28 sps:$4 sm:$0xff]  }
 0x477   :  { %v7884_v15 = vpop.eup %7883 }
 0x478   :  { %6218 = vst [vmem:[%s8365_s9] sm:$0xff] %v7884_v15  ;;  %6019 = vmatpush1.bf16.msra.mxu0 %v7791_v62  ;;  %v7853_v62 = vld [vmem:[#allocation12 + $0x6a8] ss:$28 sps:$4 sm:$0xff]  }
 0x479   :  { %v7886_v20 = vpop.eup %7885  ;;  %7027 = vmatpush3.bf16.msra.mxu1 %v7795_v12  ;;  %6020 = vmatprep.subr.bf16.mxu0 %v7798_v10 }
 0x47a   :  { %6219 = vst [vmem:[%s8365_s9 + $0x8] sm:$0xff] %v7886_v20  ;;  %7028 = vmatprep.subr.bf16.mxu1 %v7799_v14  ;;  %v7854_v14 = vld [vmem:[#allocation12 + $0x4e8] ss:$28 sps:$4 sm:$0xff]   ;;  %v7855_v20 = vld [vmem:[#allocation12 + $0x670] ss:$28 sps:$4 sm:$0xff]  }
 0x47c   :  { %6021 = vmatpush1.bf16.msra.mxu0 %v7796_v19 }
 0x47d   :  { %7029 = vmatpush3.bf16.msra.mxu1 %v7800_v21  ;;  %6022 = vmatprep.subr.bf16.mxu0 %v7803_v23 }
 0x47e   :  { %7030 = vmatprep.subr.bf16.mxu1 %v7804_v4  ;;  %v7856_v4 = vld [vmem:[#allocation12 + $0x4b0] ss:$28 sps:$4 sm:$0xff]  }
 0x480   :  { %6023 = vmatpush1.bf16.msra.mxu0 %v7801_v25 }
 0x481   :  { %7031 = vmatpush3.bf16.msra.mxu1 %v7805_v26  ;;  %6024 = vmatprep.subr.bf16.mxu0 %v7808_v28  ;;  %v7857_v28 = vld [vmem:[#allocation12 + $0x638] ss:$28 sps:$4 sm:$0xff]  }
 0x482   :  { %7032 = vmatprep.subr.bf16.mxu1 %v7809_v31  ;;  %v7859_v31 = vld [vmem:[#allocation12 + $0x600] ss:$28 sps:$4 sm:$0xff]  }
 0x484   :  { %6025 = vmatpush1.bf16.msra.mxu0 %v7806_v32  ;;  %v7861_v32 = vld [vmem:[#allocation12 + $0x5c8] ss:$28 sps:$4 sm:$0xff]  }
 0x485   :  { %7033 = vmatpush3.bf16.msra.mxu1 %v7810_v34  ;;  %6026 = vmatprep.subr.bf16.mxu0 %v7813_v35  ;;  %v7862_v34 = vld [vmem:[#allocation12 + $0x408] ss:$28 sps:$4 sm:$0xff]   ;;  %v7863_v35 = vld [vmem:[#allocation12 + $0x590] ss:$28 sps:$4 sm:$0xff]  }
 0x486   :  { %7062 = vmatprep.subr.bf16.mxu1 %v7814_v36  ;;  %v7864_v36 = vld [vmem:[#allocation12 + $0x3d0] ss:$28 sps:$4 sm:$0xff]  }
 0x488   :  { %6084 = vmatmul.mubr.bf16.vlgmr.msra.gmra.mxu1 %v8223_v24  ;;  %6027 = vmatpush2.bf16.msra.mxu0 %v7811_v37  ;;  %v7826_v24 = vld [vmem:[#allocation12 + $0xd30] ss:$28 sps:$4 sm:$0xff]   ;;  %v7865_v37 = vld [vmem:[#allocation12 + $0x558] ss:$28 sps:$4 sm:$0xff]  }
 0x489   :  { %7063 = vmatpush3.bf16.msra.mxu1 %v7815_v38  ;;  %6163 = vmatprep.mubr.bf16.mxu1 %v8242_v16  ;;  %v7834_v16 = vld [vmem:[#allocation12 + $0x980] ss:$28 sps:$4 sm:$0xff]   ;;  %v7866_v38 = vld [vmem:[#allocation12 + $0x398] ss:$28 sps:$4 sm:$0xff]  }
 0x48a   :  { %6028 = vmatprep.subr.bf16.mxu0 %v7818_v39  ;;  %7064 = vmatprep.subr.bf16.mxu1 %v7819_v40  ;;  %v7867_v39 = vld [vmem:[#allocation12 + $0xde0] ss:$28 sps:$4 sm:$0xff]  }
 0x48b   :  { %v7868_v40 = vld [vmem:[#allocation12 + $0xc20] ss:$28 sps:$4 sm:$0xff]  }
 0x48c   :  { %6029 = vmatpush2.bf16.msra.mxu0 %v7816_v41  ;;  %v7869_v41 = vld [vmem:[#allocation12 + $0xda8] ss:$28 sps:$4 sm:$0xff]  }
 0x48d   :  { %7065 = vmatpush3.bf16.msra.mxu1 %v7820_v43  ;;  %6030 = vmatprep.subr.bf16.mxu0 %v7823_v45  ;;  %v7870_v43 = vld [vmem:[#allocation12 + $0xbe8] ss:$28 sps:$4 sm:$0xff]   ;;  %v7871_v45 = vld [vmem:[#allocation12 + $0xd70] ss:$28 sps:$4 sm:$0xff]  }
 0x48e   :  { %7066 = vmatprep.subr.bf16.mxu1 %v7824_v46  ;;  %v7872_v46 = vld [vmem:[#allocation12 + $0xbb0] ss:$28 sps:$4 sm:$0xff]  }
 0x490   :  { %6031 = vmatpush2.bf16.msra.mxu0 %v7821_v52  ;;  %v7873_v52 = vld [vmem:[#allocation12 + $0xd38] ss:$28 sps:$4 sm:$0xff]  }
 0x491   :  { %7067 = vmatpush3.bf16.msra.mxu1 %v7825_v54  ;;  %6032 = vmatprep.subr.bf16.mxu0 %v7828_v55  ;;  %v7874_v54 = vld [vmem:[#allocation12 + $0xb78] ss:$28 sps:$4 sm:$0xff]   ;;  %v7875_v55 = vld [vmem:[#allocation12 + $0xd00] ss:$28 sps:$4 sm:$0xff]  }
 0x492   :  { %7068 = vmatprep.subr.bf16.mxu1 %v7829_v29  ;;  %v7876_v29 = vld [vmem:[#allocation12 + $0xb40] ss:$28 sps:$4 sm:$0xff]  }
 0x494   :  { %6033 = vmatpush2.bf16.msra.mxu0 %v7826_v24  ;;  %v7877_v24 = vld [vmem:[#allocation12 + $0xcc8] ss:$28 sps:$4 sm:$0xff]  }
 0x495   :  { %7069 = vmatpush3.bf16.msra.mxu1 %v7830_v30  ;;  %6034 = vmatprep.subr.bf16.mxu0 %v7833_v13  ;;  %v7879_v30 = vld [vmem:[#allocation12 + $0xc90] ss:$28 sps:$4 sm:$0xff]  }
 0x496   :  { %7070 = vmatprep.subr.bf16.mxu1 %v7834_v16  ;;  %v7880_v13 = vld [vmem:[#allocation12 + $0xad0] ss:$28 sps:$4 sm:$0xff]   ;;  %v7881_v16 = vld [vmem:[#allocation12 + $0xc58] ss:$28 sps:$4 sm:$0xff]  }
 0x498   :  { %6035 = vmatpush2.bf16.msra.mxu0 %v7831_v57  ;;  %v8321_v57 = vld [vmem:[#allocation13] sm:$0xff] }
 0x499   :  { %7071 = vmatpush3.bf16.msra.mxu1 %v7835_v58  ;;  %6036 = vmatprep.subr.bf16.mxu0 %v7838_v60  ;;  %v3235_v58 = vrot.slane %v8321_v57, %v8176_v51 }
 0x49a   :  { %7072 = vmatprep.subr.bf16.mxu1 %v7839_v61  ;;  %v7882_v61 = vld [vmem:[#allocation12 + $0xa98] ss:$28 sps:$4 sm:$0xff]  }
 0x49c   :  { %6037 = vmatpush2.bf16.msra.mxu0 %v7836_v59  ;;  %v5760_v59 = vadd.f32 %v8295_v56, %v3235_v58 }
 0x49d   :  { %7073 = vmatpush3.bf16.msra.mxu1 %v7840_v3  ;;  %6038 = vmatprep.subr.bf16.mxu0 %v7843_v63 }
 0x49e   :  { %7074 = vmatprep.subr.bf16.mxu1 %v7844_v0 }
 0x4a0   :  { %6039 = vmatpush2.bf16.msra.mxu0 %v7841_v1 }
 0x4a1   :  { %7075 = vmatpush3.bf16.msra.mxu1 %v7845_v2  ;;  %6040 = vmatprep.subr.bf16.mxu0 %v7848_v5 }
 0x4a2   :  { %7076 = vmatprep.subr.bf16.mxu1 %v7849_v6 }
 0x4a4   :  { %6041 = vmatpush2.bf16.msra.mxu0 %v7846_v7 }
 0x4a5   :  { %7077 = vmatpush3.bf16.msra.mxu1 %v7850_v22  ;;  %7040 = vmatprep.subr.bf16.mxu0 %v7851_v8 }
 0x4a7   :  { %v8306_v12 = vpop.f32.mrf.mxu0  ;;  %v8308_v10 = vpop.f32.mrf.mxu1  ;;  %6043 = vmatmul.mubr.bf16.vlgmr.msra.gmra.mxu0 %v8257_v18 }
 0x4a8   :  { %6164 = vmatmul.mubr.bf16.vlgmr.msra.gmra.mxu1 %v8244_v17  ;;  %7041 = vmatpush3.bf16.msra.mxu0 %v7852_v9  ;;  %v7858_v17 = vld [vmem:[#allocation12 + $0x478] ss:$28 sps:$4 sm:$0xff]  }
 0x4a9   :  { %6123 = vmatprep.mubr.bf16.mxu0 %v8228_v48  ;;  %v8313_v15 = vpop.f32.mrf.mxu0  ;;  %v8315_v19 = vpop.f32.mrf.mxu1  ;;  %7042 = vmatprep.subr.bf16.mxu0 %v7853_v62  ;;  %v7860_v48 = vld [vmem:[#allocation12 + $0x440] ss:$28 sps:$4 sm:$0xff]  }
 0x4ab   :  { %v5802_v21 = vpop.f32.mrf.mxu0  ;;  %v5843_v23 = vpop.f32.mrf.mxu1 }
 0x4ac   :  { %7043 = vmatpush3.bf16.msra.mxu0 %v7854_v14 }
 0x4ad   :  { %v5803_v25 = vpop.f32.mrf.mxu0  ;;  %v5844_v26 = vpop.f32.mrf.mxu1  ;;  %7044 = vmatprep.subr.bf16.mxu0 %v7855_v20 }
 0x4b0   :  { %7045 = vmatpush3.bf16.msra.mxu0 %v7856_v4 }
 0x4b1   :  { %7046 = vmatprep.subr.bf16.mxu0 %v7857_v28  ;;  %v3239_v28 = vrot.slane %v8321_v57, %v1060_v42 }
 0x4b4   :  { %7047 = vmatpush3.bf16.msra.mxu0 %v7858_v17  ;;  %v3243_v17 = vrot.slane %v8321_v57, %v1064_v47 }
 0x4b5   :  { %7048 = vmatprep.subr.bf16.mxu0 %v7859_v31 }
 0x4b8   :  { %7049 = vmatpush3.bf16.msra.mxu0 %v7860_v48 }
 0x4b9   :  { %7050 = vmatprep.subr.bf16.mxu0 %v7861_v32 }
 0x4bc   :  { %7051 = vmatpush3.bf16.msra.mxu0 %v7862_v34 }
 0x4bd   :  { %7052 = vmatprep.subr.bf16.mxu0 %v7863_v35 }
 0x4c0   :  { %7053 = vmatpush3.bf16.msra.mxu0 %v7864_v36 }
 0x4c1   :  { %7054 = vmatprep.subr.bf16.mxu0 %v7865_v37 }
 0x4c4   :  { %7055 = vmatpush3.bf16.msra.mxu0 %v7866_v38 }
 0x4c5   :  { %7084 = vmatprep.subr.bf16.mxu0 %v7867_v39 }
 0x4c7   :  { %6124 = vmatmul.mubr.bf16.vlgmr.msra.gmra.mxu0 %v8230_v53  ;;  %v7878_v53 = vld [vmem:[#allocation12 + $0xb08] ss:$28 sps:$4 sm:$0xff]  }
 0x4c8   :  { %7085 = vmatpush3.bf16.msra.mxu0 %v7868_v40  ;;  %6203 = vmatprep.mubr.bf16.mxu0 %v8255_v11  ;;  %v3231_v11 = vrot.slane %v8264_v33, %v8173_v49  ;;  %v5801_v49 = vadd.f32 %v8313_v15, %v5760_v59 }
 0x4c9   :  { %7086 = vmatprep.subr.bf16.mxu0 %v7869_v41 }
 0x4ca   :  { %v5758_v60 = vadd.f32 %v8288_v50, %v3231_v11  ;;  %v5842_v0 = vadd.f32 %v8315_v19, %v5801_v49 }
 0x4cc   :  { %7087 = vmatpush3.bf16.msra.mxu0 %v7870_v43  ;;  %v5799_v3 = vadd.f32 %v8306_v12, %v5758_v60 }
 0x4cd   :  { %7088 = vmatprep.subr.bf16.mxu0 %v7871_v45 }
 0x4ce   :  { %v5840_v33 = vadd.f32 %v8308_v10, %v5799_v3 }
 0x4d0   :  { %7089 = vmatpush3.bf16.msra.mxu0 %v7872_v46 }
 0x4d1   :  { %7090 = vmatprep.subr.bf16.mxu0 %v7873_v52 }
 0x4d4   :  { %7091 = vmatpush3.bf16.msra.mxu0 %v7874_v54 }
 0x4d5   :  { %7092 = vmatprep.subr.bf16.mxu0 %v7875_v55 }
 0x4d8   :  { %7093 = vmatpush3.bf16.msra.mxu0 %v7876_v29 }
 0x4d9   :  { %7094 = vmatprep.subr.bf16.mxu0 %v7877_v24 }
 0x4dc   :  { %7095 = vmatpush3.bf16.msra.mxu0 %v7878_v53 }
 0x4dd   :  { %7096 = vmatprep.subr.bf16.mxu0 %v7879_v30  ;;  %v3247_v30 = vrot.slane %v8321_v57, %v1068_v44 }
 0x4e0   :  { %7097 = vmatpush3.bf16.msra.mxu0 %v7880_v13 }
 0x4e1   :  { %7098 = vmatprep.subr.bf16.mxu0 %v7881_v16 }
 0x4e4   :  { %7099 = vmatpush3.bf16.msra.mxu0 %v7882_v61 }
 0x4e7   :  { %v5880_v63 = vpop.f32.mrf.mxu0  ;;  %6204 = vmatmul.mubr.bf16.vlgmr.msra.gmra.mxu0 %v8257_v18 }
 0x4e8   :  { %v5881_v51 = vadd.f32 %v5880_v63, %v5840_v33  ;;  %v5921_v1 = vpop.f32.mrf.mxu1 }
 0x4e9   :  { %v5882_v50 = vpop.f32.mrf.mxu0  ;;  %v5922_v31 = vadd.f32 %v5921_v1, %v3239_v28 }
 0x4ea   :  { %7887 = vtanh.f32 %v5881_v51  ;;  %v5883_v2 = vadd.f32 %v5882_v50, %v5842_v0  ;;  %v5923_v5 = vpop.f32.mrf.mxu1 }
 0x4eb   :  { %v5884_v6 = vpop.f32.mrf.mxu0  ;;  %v5924_v48 = vadd.f32 %v5923_v5, %v3243_v17 }
 0x4ec   :  { %7889 = vtanh.f32 %v5883_v2  ;;  %v5925_v56 = vpop.f32.mrf.mxu1 }
 0x4ed   :  { %v5885_v7 = vpop.f32.mrf.mxu0 }
 0x4ee   :  { %v5926_v22 = vpop.f32.mrf.mxu1 }
 0x4f7   :  { %v7888_v8 = vpop.eup %7887 }
 0x4f8   :  { %6220 = vst [vmem:[%s8365_s9 + $0x10] sm:$0xff] %v7888_v8 }
 0x4f9   :  { %v7890_v9 = vpop.eup %7889 }
 0x4fa   :  { %6221 = vst [vmem:[%s8365_s9 + $0x18] sm:$0xff] %v7890_v9 }
 0x527   :  { %v5962_v18 = vpop.f32.mrf.mxu0 }
 0x528   :  { %v6003_v62 = vpop.f32.mrf.mxu1  ;;  %v5963_v32 = vadd.f32 %v5962_v18, %v5922_v31 }
 0x529   :  { %v5964_v12 = vpop.f32.mrf.mxu0 }
 0x52a   :  { %v6005_v10 = vpop.f32.mrf.mxu1  ;;  %v5965_v34 = vadd.f32 %v5964_v12, %v5924_v48  ;;  %v6004_v35 = vadd.f32 %v6003_v62, %v5963_v32 }
 0x52b   :  { %v5966_v14 = vpop.f32.mrf.mxu0 }
 0x52c   :  { %v6007_v15 = vpop.f32.mrf.mxu1  ;;  %v6006_v37 = vadd.f32 %v6005_v10, %v5965_v34 }
 0x52d   :  { %v5967_v19 = vpop.f32.mrf.mxu0 }
 0x52e   :  { %v6008_v20 = vpop.f32.mrf.mxu1 }
 0x548   :  { %v7034_v21 = vpop.f32.mrf.mxu1 }
 0x54a   :  { %v7035_v23 = vpop.f32.mrf.mxu1 }
 0x54b   :  { %v7036_v4 = vadd.f32 %v7035_v23, %v7034_v21 }
 0x54c   :  { %v7037_v25 = vpop.f32.mrf.mxu1 }
 0x54d   :  { %v6086_v13 = vadd.f32 %v7036_v4, %v3247_v30 }
 0x54e   :  { %v7038_v26 = vpop.f32.mrf.mxu1 }
 0x567   :  { %v6044_v36 = vpop.f32.mrf.mxu0 }
 0x568   :  { %v6045_v38 = vadd.f32 %v6044_v36, %v6004_v35  ;;  %v7078_v39 = vpop.f32.mrf.mxu1 }
 0x569   :  { %v6046_v40 = vpop.f32.mrf.mxu0 }
 0x56a   :  { %7891 = vtanh.f32 %v6045_v38  ;;  %v6047_v41 = vadd.f32 %v6046_v40, %v6006_v37  ;;  %v7079_v43 = vpop.f32.mrf.mxu1 }
 0x56b   :  { %v6048_v45 = vpop.f32.mrf.mxu0  ;;  %v7080_v60 = vadd.f32 %v7079_v43, %v7078_v39 }
 0x56c   :  { %7893 = vtanh.f32 %v6047_v41  ;;  %v7081_v42 = vpop.f32.mrf.mxu1 }
 0x56d   :  { %v6049_v46 = vpop.f32.mrf.mxu0 }
 0x56e   :  { %v7082_v52 = vpop.f32.mrf.mxu1 }
 0x577   :  { %v7892_v54 = vpop.eup %7891 }
 0x578   :  { %6222 = vst [vmem:[%s8365_s9 + $0x20] sm:$0xff] %v7892_v54 }
 0x579   :  { %v7894_v47 = vpop.eup %7893 }
 0x57a   :  { %6223 = vst [vmem:[%s8365_s9 + $0x28] sm:$0xff] %v7894_v47 }
 0x587   :  { %v7056_v55 = vpop.f32.mrf.mxu0 }
 0x589   :  { %v7057_v29 = vpop.f32.mrf.mxu0 }
 0x58a   :  { %v7058_v11 = vadd.f32 %v7057_v29, %v7056_v55 }
 0x58b   :  { %v7059_v24 = vpop.f32.mrf.mxu0 }
 0x58c   :  { %v6126_v16 = vadd.f32 %v7058_v11, %v6086_v13 }
 0x58d   :  { %v7060_v53 = vpop.f32.mrf.mxu0 }
 0x58e   :  { %v6166_v59 = vadd.f32 %v7080_v60, %v6126_v16 }
 0x5a7   :  { %v7100_v58 = vpop.f32.mrf.mxu0 }
 0x5a9   :  { %v7101_v61 = vpop.f32.mrf.mxu0 }
 0x5aa   :  { %v7102_v3 = vadd.f32 %v7101_v61, %v7100_v58 }
 0x5ab   :  { %v7103_v49 = vpop.f32.mrf.mxu0 }
 0x5ac   :  { %v6206_v33 = vadd.f32 %v7102_v3, %v6166_v59 }
 0x5ad   :  { %v7104_v63 = vpop.f32.mrf.mxu0 }
 0x5ae   :  { %7895 = vtanh.f32 %v6206_v33 }
 0x5bb   :  { %v7896_v0 = vpop.eup %7895 }
 0x5bc   :  { %6224 = vst [vmem:[%s8365_s9 + $0x30] sm:$0xff] %v7896_v0 }
 0x5bd   :  { %6229 = vsyncpa [#allocation3], 1 }
 0x5be   :  { %6230 = vsyncpa [#allocation5], 1 }
 0x5bf   :  { %6231 = vsyncpa [#allocation8], 1 }
 0x5c0   :  { %6232 = vsyncpa [#allocation11], 1 }
 0x5c1   :  { %6233 = vsyncpa [#allocation14], 1 }

</bundles_post_ra>
